<compile_context>
chip_gen: v5e
topology: v5e:2x2
jax: 0.10.0
libtpu: 0.0.40
codegen_flags: <defaults>
</compile_context>

<pallas_src>
import jax
import jax.numpy as jnp
from jax.experimental import pallas as pl
from jax.experimental.pallas import tpu as pltpu


# -----------------------------------------------------------------------------
# Fused kernel: one batch image per grid step.
# -----------------------------------------------------------------------------
def _basic_block_kernel(x_ref, w1_ref, s1_ref, b1_ref, w2_ref, s2_ref, b2_ref,
                        o_ref, xpad_ref, ypad_ref):
    """Refs:
      x_ref : (1, H, W, Cin)   input tile (f32)
      w1_ref: (9*Cin, Cmid)    conv1 weights, im2col layout (bf16)
      w2_ref: (9*Cmid, Cout)   conv2 weights, im2col layout (bf16)
      s*/b* : (1, C)           folded eval-BN scale / bias (f32)
      o_ref : (1, H, W, Cout)  output tile (f32)
      xpad_ref / ypad_ref: (H+2, W+2, C) f32 VMEM scratch with zeroed halo.
    """
    _, H, W, Cin = x_ref.shape
    Cmid = w1_ref.shape[1]
    Cout = w2_ref.shape[1]

    def conv3x3(pad_ref, w_ref):
        # im2col: cast the padded tile to bf16 once, concat the 9 shifted
        # (H*W, C) slabs along channels and do a single
        # (H*W, 9*C) x (9*C, Cout) bf16 MXU matmul with f32 accumulation.
        xp = pad_ref[...].astype(jnp.bfloat16)
        cols = [xp[ky:ky + H, kx:kx + W, :].reshape(H * W, -1)
                for ky in range(3) for kx in range(3)]
        patch = jnp.concatenate(cols, axis=-1)           # (H*W, 9*C) bf16
        return jnp.dot(patch, w_ref[...],
                       preferred_element_type=jnp.float32)

    # ---- conv1 + bn1 + relu (halo handled on-chip; no HBM pad copies) -------
    xpad_ref[...] = jnp.zeros_like(xpad_ref)
    xpad_ref[1:H + 1, 1:W + 1, :] = x_ref[0]
    y = conv3x3(xpad_ref, w1_ref)                        # (H*W, Cmid) f32
    y = jnp.maximum(y * s1_ref[...] + b1_ref[...], 0.0)

    # ---- conv2 + bn2 + residual + relu (y stays resident in VMEM) -----------
    ypad_ref[...] = jnp.zeros_like(ypad_ref)
    ypad_ref[1:H + 1, 1:W + 1, :] = y.reshape(H, W, Cmid)
    z = conv3x3(ypad_ref, w2_ref)                        # (H*W, Cout) f32
    z = z * s2_ref[...] + b2_ref[...]
    z = z + x_ref[0].reshape(H * W, Cout)                # residual from resident x
    z = jnp.maximum(z, 0.0)
    o_ref[...] = z.reshape(1, H, W, Cout).astype(o_ref.dtype)


# -----------------------------------------------------------------------------
# Wrapper / parameter plumbing
# -----------------------------------------------------------------------------
def _fold_bn(gamma, beta, mean, var, eps=1e-5):
    scale = gamma / jnp.sqrt(var + eps)
    bias = beta - mean * scale
    return (scale.reshape(1, -1).astype(jnp.float32),
            bias.reshape(1, -1).astype(jnp.float32))


def _im2col_weights(w_oihw):
    # PyTorch (O, I, 3, 3) -> (3, 3, I, O) -> (9*I, O), row-major (ky, kx, cin),
    # matching the kernel's patch column ordering; cast to bf16 for the MXU.
    w = jnp.transpose(w_oihw, (2, 3, 1, 0))
    kh, kw, cin, cout = w.shape
    return w.reshape(kh * kw * cin, cout).astype(jnp.bfloat16)


def basic_block_forward(x_nchw, params):
    """BasicBlock forward, stride=1 (downsample=None). x_nchw: (N, C, H, W)."""
    x = jnp.transpose(x_nchw, (0, 2, 3, 1)).astype(jnp.float32)   # NHWC
    N, H, W, Cin = x.shape

    w1 = _im2col_weights(params["conv1_w"])            # (9*Cin, Cmid)
    w2 = _im2col_weights(params["conv2_w"])            # (9*Cmid, Cout)
    Cmid, Cout = w1.shape[1], w2.shape[1]
    assert Cin == Cout, "stride=1 BasicBlock requires in_planes == planes"

    s1, b1 = _fold_bn(params["bn1_gamma"], params["bn1_beta"],
                      params["bn1_mean"], params["bn1_var"])
    s2, b2 = _fold_bn(params["bn2_gamma"], params["bn2_beta"],
                      params["bn2_mean"], params["bn2_var"])

    def full(shape):
        # Constant index_map -> block stays resident across the batch grid.
        return pl.BlockSpec(shape, lambda n: (0,) * len(shape))

    out = pl.pallas_call(
        _basic_block_kernel,
        out_shape=jax.ShapeDtypeStruct((N, H, W, Cout), jnp.float32),
        grid=(N,),
        in_specs=[
            pl.BlockSpec((1, H, W, Cin), lambda n: (n, 0, 0, 0)),
            full(w1.shape), full(s1.shape), full(b1.shape),
            full(w2.shape), full(s2.shape), full(b2.shape),
        ],
        out_specs=pl.BlockSpec((1, H, W, Cout), lambda n: (n, 0, 0, 0)),
        scratch_shapes=[
            pltpu.VMEM((H + 2, W + 2, Cin), jnp.float32),
            pltpu.VMEM((H + 2, W + 2, Cmid), jnp.float32),
        ],
        compiler_params=pltpu.CompilerParams(
            dimension_semantics=("parallel",)),
    )(x, w1, s1, b1, w2, s2, b2)

    return jnp.transpose(out, (0, 3, 1, 2))   # NHWC -> NCHW


# -----------------------------------------------------------------------------
# Pure-JAX references (sanity checks)
# -----------------------------------------------------------------------------
def _reference_forward(x_nchw, params, matmul_dtype=None):
    """matmul_dtype=None: exact f32 module semantics.
       matmul_dtype=bf16 : mirrors the kernel's mixed-precision matmuls."""
    x = jnp.transpose(x_nchw, (0, 2, 3, 1)).astype(jnp.float32)
    w1 = jnp.transpose(params["conv1_w"], (2, 3, 1, 0)).astype(jnp.float32)
    w2 = jnp.transpose(params["conv2_w"], (2, 3, 1, 0)).astype(jnp.float32)
    s1, b1 = _fold_bn(params["bn1_gamma"], params["bn1_beta"],
                      params["bn1_mean"], params["bn1_var"])
    s2, b2 = _fold_bn(params["bn2_gamma"], params["bn2_beta"],
                      params["bn2_mean"], params["bn2_var"])

    def conv(xin, w):
        N, H, W, Cin = xin.shape
        Cout = w.shape[-1]
        xp = jnp.pad(xin, ((0, 0), (1, 1), (1, 1), (0, 0)))
        acc = jnp.zeros((N, H, W, Cout), jnp.float32)
        for ky in range(3):
            for kx in range(3):
                a = xp[:, ky:ky + H, kx:kx + W, :]
                b = w[ky, kx]
                if matmul_dtype is not None:
                    a, b = a.astype(matmul_dtype), b.astype(matmul_dtype)
                acc = acc + jnp.einsum("nhwc,co->nhwo", a, b,
                                       preferred_element_type=jnp.float32)
        return acc

    y = jnp.maximum(conv(x, w1) * s1 + b1, 0.0)
    y = conv(y, w2) * s2 + b2
    out = jnp.maximum(x + y, 0.0)
    return jnp.transpose(out, (0, 3, 1, 2))


def make_params(key, in_planes, planes):
    keys = jax.random.split(key, 10)
    return {
        "conv1_w": 0.1 * jax.random.normal(keys[0], (planes, in_planes, 3, 3), jnp.float32),
        "conv2_w": 0.1 * jax.random.normal(keys[1], (planes, planes, 3, 3), jnp.float32),
        "bn1_gamma": jax.random.uniform(keys[2], (planes,), jnp.float32, 0.5, 1.5),
        "bn1_beta": 0.1 * jax.random.normal(keys[3], (planes,), jnp.float32),
        "bn1_mean": 0.1 * jax.random.normal(keys[4], (planes,), jnp.float32),
        "bn1_var": jax.random.uniform(keys[5], (planes,), jnp.float32, 0.5, 1.5),
        "bn2_gamma": jax.random.uniform(keys[6], (planes,), jnp.float32, 0.5, 1.5),
        "bn2_beta": 0.1 * jax.random.normal(keys[7], (planes,), jnp.float32),
        "bn2_mean": 0.1 * jax.random.normal(keys[8], (planes,), jnp.float32),
        "bn2_var": jax.random.uniform(keys[9], (planes,), jnp.float32, 0.5, 1.5),
    }


if __name__ == "__main__":
    # stride=1 BasicBlock => in_planes == planes for the residual add.
    N, C, H, W = 2, 8, 16, 16
    key = jax.random.PRNGKey(0)
    kx_, kp = jax.random.split(key)
    x = jax.random.normal(kx_, (N, C, H, W), jnp.float32)
    params = make_params(kp, in_planes=C, planes=C)

    out = jax.block_until_ready(basic_block_forward(x, params))
    assert out.shape == (N, C, H, W), out.shape

    # Tight check vs. a reference mirroring the kernel's bf16 matmul operands.
    ref_bf16 = _reference_forward(x, params, matmul_dtype=jnp.bfloat16)
    err_bf16 = float(jnp.max(jnp.abs(out - ref_bf16)))
    assert jnp.allclose(out, ref_bf16, atol=5e-3, rtol=5e-3), err_bf16

    # Loose check vs. the full-f32 module semantics (bf16 matmul rounding only).
    ref_f32 = _reference_forward(x, params, matmul_dtype=None)
    err_f32 = float(jnp.max(jnp.abs(out - ref_f32)))
    assert jnp.allclose(out, ref_f32, atol=1e-1, rtol=1e-1), err_f32

    print("KERNEL_OK")
</pallas_src>

<mosaic_0001>
module attributes {stable_mosaic.version = 11 : i64} {
  func.func @_basic_block_kernel(%arg0: i32, %arg1: memref<1x16x16x8xf32, #tpu.memory_space<vmem>>, %arg2: memref<72x8xbf16, #tpu.memory_space<vmem>>, %arg3: memref<1x8xf32, #tpu.memory_space<vmem>>, %arg4: memref<1x8xf32, #tpu.memory_space<vmem>>, %arg5: memref<72x8xbf16, #tpu.memory_space<vmem>>, %arg6: memref<1x8xf32, #tpu.memory_space<vmem>>, %arg7: memref<1x8xf32, #tpu.memory_space<vmem>>, %arg8: memref<1x16x16x8xf32, #tpu.memory_space<vmem>>, %arg9: memref<18x18x8xf32, #tpu.memory_space<vmem>>, %arg10: memref<18x18x8xf32, #tpu.memory_space<vmem>>) attributes {dimension_semantics = [#tpu.dimension_semantics<parallel>], iteration_bounds = array<i64: 2>, scalar_prefetch = 0 : i64, scratch_operands = 2 : i64, tpu.core_type = #tpu.core_type<tc>, window_params = [{transform_indices = @transform_0, window_bounds = array<i64: 1, 16, 16, 8>}, {pipeline_mode = #tpu.pipeline_mode<synchronous>, transform_indices = @transform_1, window_bounds = array<i64: 72, 8>}, {pipeline_mode = #tpu.pipeline_mode<synchronous>, transform_indices = @transform_2, window_bounds = array<i64: 1, 8>}, {pipeline_mode = #tpu.pipeline_mode<synchronous>, transform_indices = @transform_3, window_bounds = array<i64: 1, 8>}, {pipeline_mode = #tpu.pipeline_mode<synchronous>, transform_indices = @transform_4, window_bounds = array<i64: 72, 8>}, {pipeline_mode = #tpu.pipeline_mode<synchronous>, transform_indices = @transform_5, window_bounds = array<i64: 1, 8>}, {pipeline_mode = #tpu.pipeline_mode<synchronous>, transform_indices = @transform_6, window_bounds = array<i64: 1, 8>}, {transform_indices = @transform_7, window_bounds = array<i64: 1, 16, 16, 8>}]} {
    %cst = arith.constant 0.000000e+00 : f32
    %0 = vector.broadcast %cst : f32 to vector<18x18x8xf32>
    %c0 = arith.constant 0 : index
    %c0_0 = arith.constant 0 : index
    %c0_1 = arith.constant 0 : index
    %1 = vector.load %arg9[%c0, %c0_0, %c0_1] : memref<18x18x8xf32, #tpu.memory_space<vmem>>, vector<18x18x8xf32>
    tpu.vector_store %arg9[%c0, %c0_0, %c0_1], %0 {strides = array<i32>} : memref<18x18x8xf32, #tpu.memory_space<vmem>>, vector<18x18x8xf32>,
    %c0_2 = arith.constant 0 : index
    %c0_3 = arith.constant 0 : index
    %c0_4 = arith.constant 0 : index
    %c0_5 = arith.constant 0 : index
    %2 = vector.load %arg1[%c0_2, %c0_3, %c0_4, %c0_5] : memref<1x16x16x8xf32, #tpu.memory_space<vmem>>, vector<1x16x16x8xf32>
    %3 = vector.shape_cast %2 : vector<1x16x16x8xf32> to vector<16x16x8xf32>
    %c1 = arith.constant 1 : index
    %c1_6 = arith.constant 1 : index
    %c0_7 = arith.constant 0 : index
    %4 = vector.load %arg9[%c1, %c1_6, %c0_7] : memref<18x18x8xf32, #tpu.memory_space<vmem>>, vector<16x16x8xf32>
    tpu.vector_store %arg9[%c1, %c1_6, %c0_7], %3 {strides = array<i32>} : memref<18x18x8xf32, #tpu.memory_space<vmem>>, vector<16x16x8xf32>,
    %c0_8 = arith.constant 0 : index
    %c0_9 = arith.constant 0 : index
    %c0_10 = arith.constant 0 : index
    %5 = vector.load %arg9[%c0_8, %c0_9, %c0_10] : memref<18x18x8xf32, #tpu.memory_space<vmem>>, vector<18x18x8xf32>
    %6 = arith.truncf %5 : vector<18x18x8xf32> to vector<18x18x8xbf16>
    %7 = vector.extract_strided_slice %6 {offsets = [0, 0, 0], sizes = [16, 16, 8], strides = [1, 1, 1]} : vector<18x18x8xbf16> to vector<16x16x8xbf16>
    %8 = vector.shape_cast %7 : vector<16x16x8xbf16> to vector<256x8xbf16>
    %9 = vector.extract_strided_slice %6 {offsets = [0, 1, 0], sizes = [16, 16, 8], strides = [1, 1, 1]} : vector<18x18x8xbf16> to vector<16x16x8xbf16>
    %10 = vector.shape_cast %9 : vector<16x16x8xbf16> to vector<256x8xbf16>
    %11 = vector.extract_strided_slice %6 {offsets = [0, 2, 0], sizes = [16, 16, 8], strides = [1, 1, 1]} : vector<18x18x8xbf16> to vector<16x16x8xbf16>
    %12 = vector.shape_cast %11 : vector<16x16x8xbf16> to vector<256x8xbf16>
    %13 = vector.extract_strided_slice %6 {offsets = [1, 0, 0], sizes = [16, 16, 8], strides = [1, 1, 1]} : vector<18x18x8xbf16> to vector<16x16x8xbf16>
    %14 = vector.shape_cast %13 : vector<16x16x8xbf16> to vector<256x8xbf16>
    %15 = vector.extract_strided_slice %6 {offsets = [1, 1, 0], sizes = [16, 16, 8], strides = [1, 1, 1]} : vector<18x18x8xbf16> to vector<16x16x8xbf16>
    %16 = vector.shape_cast %15 : vector<16x16x8xbf16> to vector<256x8xbf16>
    %17 = vector.extract_strided_slice %6 {offsets = [1, 2, 0], sizes = [16, 16, 8], strides = [1, 1, 1]} : vector<18x18x8xbf16> to vector<16x16x8xbf16>
    %18 = vector.shape_cast %17 : vector<16x16x8xbf16> to vector<256x8xbf16>
    %19 = vector.extract_strided_slice %6 {offsets = [2, 0, 0], sizes = [16, 16, 8], strides = [1, 1, 1]} : vector<18x18x8xbf16> to vector<16x16x8xbf16>
    %20 = vector.shape_cast %19 : vector<16x16x8xbf16> to vector<256x8xbf16>
    %21 = vector.extract_strided_slice %6 {offsets = [2, 1, 0], sizes = [16, 16, 8], strides = [1, 1, 1]} : vector<18x18x8xbf16> to vector<16x16x8xbf16>
    %22 = vector.shape_cast %21 : vector<16x16x8xbf16> to vector<256x8xbf16>
    %23 = vector.extract_strided_slice %6 {offsets = [2, 2, 0], sizes = [16, 16, 8], strides = [1, 1, 1]} : vector<18x18x8xbf16> to vector<16x16x8xbf16>
    %24 = vector.shape_cast %23 : vector<16x16x8xbf16> to vector<256x8xbf16>
    %25 = tpu.concatenate %8, %10, %12, %14, %16, %18, %20, %22, %24 in 1 : vector<256x8xbf16>, vector<256x8xbf16>, vector<256x8xbf16>, vector<256x8xbf16>, vector<256x8xbf16>, vector<256x8xbf16>, vector<256x8xbf16>, vector<256x8xbf16>, vector<256x8xbf16> -> vector<256x72xbf16>
    %c0_11 = arith.constant 0 : index
    %c0_12 = arith.constant 0 : index
    %26 = vector.load %arg2[%c0_11, %c0_12] : memref<72x8xbf16, #tpu.memory_space<vmem>>, vector<72x8xbf16>
    %cst_13 = arith.constant dense<0.000000e+00> : vector<256x8xf32>
    %27 = tpu.matmul %25, %26, %cst_13 {dimension_numbers = #tpu.dot_dimension_numbers<[1], [0], [0], [1], [0, 0, 1, 1], [], []>} : vector<256x72xbf16>, vector<72x8xbf16>, vector<256x8xf32> -> vector<256x8xf32>
    %c0_14 = arith.constant 0 : index
    %c0_15 = arith.constant 0 : index
    %28 = vector.load %arg3[%c0_14, %c0_15] : memref<1x8xf32, #tpu.memory_space<vmem>>, vector<1x8xf32>
    %29 = vector.broadcast %28 : vector<1x8xf32> to vector<256x8xf32>
    %30 = arith.mulf %27, %29 : vector<256x8xf32>
    %c0_16 = arith.constant 0 : index
    %c0_17 = arith.constant 0 : index
    %31 = vector.load %arg4[%c0_16, %c0_17] : memref<1x8xf32, #tpu.memory_space<vmem>>, vector<1x8xf32>
    %32 = vector.broadcast %31 : vector<1x8xf32> to vector<256x8xf32>
    %33 = arith.addf %30, %32 : vector<256x8xf32>
    %cst_18 = arith.constant 0.000000e+00 : f32
    %34 = vector.broadcast %cst_18 : f32 to vector<256x8xf32>
    %35 = arith.maximumf %33, %34 : vector<256x8xf32>
    %cst_19 = arith.constant 0.000000e+00 : f32
    %36 = vector.broadcast %cst_19 : f32 to vector<18x18x8xf32>
    %c0_20 = arith.constant 0 : index
    %c0_21 = arith.constant 0 : index
    %c0_22 = arith.constant 0 : index
    %37 = vector.load %arg10[%c0_20, %c0_21, %c0_22] : memref<18x18x8xf32, #tpu.memory_space<vmem>>, vector<18x18x8xf32>
    tpu.vector_store %arg10[%c0_20, %c0_21, %c0_22], %36 {strides = array<i32>} : memref<18x18x8xf32, #tpu.memory_space<vmem>>, vector<18x18x8xf32>,
    %38 = vector.shape_cast %35 : vector<256x8xf32> to vector<16x16x8xf32>
    %c1_23 = arith.constant 1 : index
    %c1_24 = arith.constant 1 : index
    %c0_25 = arith.constant 0 : index
    %39 = vector.load %arg10[%c1_23, %c1_24, %c0_25] : memref<18x18x8xf32, #tpu.memory_space<vmem>>, vector<16x16x8xf32>
    tpu.vector_store %arg10[%c1_23, %c1_24, %c0_25], %38 {strides = array<i32>} : memref<18x18x8xf32, #tpu.memory_space<vmem>>, vector<16x16x8xf32>,
    %c0_26 = arith.constant 0 : index
    %c0_27 = arith.constant 0 : index
    %c0_28 = arith.constant 0 : index
    %40 = vector.load %arg10[%c0_26, %c0_27, %c0_28] : memref<18x18x8xf32, #tpu.memory_space<vmem>>, vector<18x18x8xf32>
    %41 = arith.truncf %40 : vector<18x18x8xf32> to vector<18x18x8xbf16>
    %42 = vector.extract_strided_slice %41 {offsets = [0, 0, 0], sizes = [16, 16, 8], strides = [1, 1, 1]} : vector<18x18x8xbf16> to vector<16x16x8xbf16>
    %43 = vector.shape_cast %42 : vector<16x16x8xbf16> to vector<256x8xbf16>
    %44 = vector.extract_strided_slice %41 {offsets = [0, 1, 0], sizes = [16, 16, 8], strides = [1, 1, 1]} : vector<18x18x8xbf16> to vector<16x16x8xbf16>
    %45 = vector.shape_cast %44 : vector<16x16x8xbf16> to vector<256x8xbf16>
    %46 = vector.extract_strided_slice %41 {offsets = [0, 2, 0], sizes = [16, 16, 8], strides = [1, 1, 1]} : vector<18x18x8xbf16> to vector<16x16x8xbf16>
    %47 = vector.shape_cast %46 : vector<16x16x8xbf16> to vector<256x8xbf16>
    %48 = vector.extract_strided_slice %41 {offsets = [1, 0, 0], sizes = [16, 16, 8], strides = [1, 1, 1]} : vector<18x18x8xbf16> to vector<16x16x8xbf16>
    %49 = vector.shape_cast %48 : vector<16x16x8xbf16> to vector<256x8xbf16>
    %50 = vector.extract_strided_slice %41 {offsets = [1, 1, 0], sizes = [16, 16, 8], strides = [1, 1, 1]} : vector<18x18x8xbf16> to vector<16x16x8xbf16>
    %51 = vector.shape_cast %50 : vector<16x16x8xbf16> to vector<256x8xbf16>
    %52 = vector.extract_strided_slice %41 {offsets = [1, 2, 0], sizes = [16, 16, 8], strides = [1, 1, 1]} : vector<18x18x8xbf16> to vector<16x16x8xbf16>
    %53 = vector.shape_cast %52 : vector<16x16x8xbf16> to vector<256x8xbf16>
    %54 = vector.extract_strided_slice %41 {offsets = [2, 0, 0], sizes = [16, 16, 8], strides = [1, 1, 1]} : vector<18x18x8xbf16> to vector<16x16x8xbf16>
    %55 = vector.shape_cast %54 : vector<16x16x8xbf16> to vector<256x8xbf16>
    %56 = vector.extract_strided_slice %41 {offsets = [2, 1, 0], sizes = [16, 16, 8], strides = [1, 1, 1]} : vector<18x18x8xbf16> to vector<16x16x8xbf16>
    %57 = vector.shape_cast %56 : vector<16x16x8xbf16> to vector<256x8xbf16>
    %58 = vector.extract_strided_slice %41 {offsets = [2, 2, 0], sizes = [16, 16, 8], strides = [1, 1, 1]} : vector<18x18x8xbf16> to vector<16x16x8xbf16>
    %59 = vector.shape_cast %58 : vector<16x16x8xbf16> to vector<256x8xbf16>
    %60 = tpu.concatenate %43, %45, %47, %49, %51, %53, %55, %57, %59 in 1 : vector<256x8xbf16>, vector<256x8xbf16>, vector<256x8xbf16>, vector<256x8xbf16>, vector<256x8xbf16>, vector<256x8xbf16>, vector<256x8xbf16>, vector<256x8xbf16>, vector<256x8xbf16> -> vector<256x72xbf16>
    %c0_29 = arith.constant 0 : index
    %c0_30 = arith.constant 0 : index
    %61 = vector.load %arg5[%c0_29, %c0_30] : memref<72x8xbf16, #tpu.memory_space<vmem>>, vector<72x8xbf16>
    %cst_31 = arith.constant dense<0.000000e+00> : vector<256x8xf32>
    %62 = tpu.matmul %60, %61, %cst_31 {dimension_numbers = #tpu.dot_dimension_numbers<[1], [0], [0], [1], [0, 0, 1, 1], [], []>} : vector<256x72xbf16>, vector<72x8xbf16>, vector<256x8xf32> -> vector<256x8xf32>
    %c0_32 = arith.constant 0 : index
    %c0_33 = arith.constant 0 : index
    %63 = vector.load %arg6[%c0_32, %c0_33] : memref<1x8xf32, #tpu.memory_space<vmem>>, vector<1x8xf32>
    %64 = vector.broadcast %63 : vector<1x8xf32> to vector<256x8xf32>
    %65 = arith.mulf %62, %64 : vector<256x8xf32>
    %c0_34 = arith.constant 0 : index
    %c0_35 = arith.constant 0 : index
    %66 = vector.load %arg7[%c0_34, %c0_35] : memref<1x8xf32, #tpu.memory_space<vmem>>, vector<1x8xf32>
    %67 = vector.broadcast %66 : vector<1x8xf32> to vector<256x8xf32>
    %68 = arith.addf %65, %67 : vector<256x8xf32>
    %c0_36 = arith.constant 0 : index
    %c0_37 = arith.constant 0 : index
    %c0_38 = arith.constant 0 : index
    %c0_39 = arith.constant 0 : index
    %69 = vector.load %arg1[%c0_36, %c0_37, %c0_38, %c0_39] : memref<1x16x16x8xf32, #tpu.memory_space<vmem>>, vector<1x16x16x8xf32>
    %70 = vector.shape_cast %69 : vector<1x16x16x8xf32> to vector<16x16x8xf32>
    %71 = vector.shape_cast %70 : vector<16x16x8xf32> to vector<256x8xf32>
    %72 = arith.addf %68, %71 : vector<256x8xf32>
    %cst_40 = arith.constant 0.000000e+00 : f32
    %73 = vector.broadcast %cst_40 : f32 to vector<256x8xf32>
    %74 = arith.maximumf %72, %73 : vector<256x8xf32>
    %75 = vector.shape_cast %74 : vector<256x8xf32> to vector<1x16x16x8xf32>
    %c0_41 = arith.constant 0 : index
    %c0_42 = arith.constant 0 : index
    %c0_43 = arith.constant 0 : index
    %c0_44 = arith.constant 0 : index
    %76 = vector.load %arg8[%c0_41, %c0_42, %c0_43, %c0_44] : memref<1x16x16x8xf32, #tpu.memory_space<vmem>>, vector<1x16x16x8xf32>
    tpu.vector_store %arg8[%c0_41, %c0_42, %c0_43, %c0_44], %75 {strides = array<i32>} : memref<1x16x16x8xf32, #tpu.memory_space<vmem>>, vector<1x16x16x8xf32>,
    return
  }
  func.func @transform_0(%arg0: i32) -> (i32, i32, i32, i32) {
    %c0_i32 = arith.constant 0 : i32
    %c0_i32_0 = arith.constant 0 : i32
    %c0_i32_1 = arith.constant 0 : i32
    %c0_i32_2 = arith.constant 0 : i32
    return %arg0, %c0_i32, %c0_i32_0, %c0_i32_1 : i32, i32, i32, i32
  }
  func.func @transform_1(%arg0: i32) -> (i32, i32) {
    %c0_i32 = arith.constant 0 : i32
    %c0_i32_0 = arith.constant 0 : i32
    %c0_i32_1 = arith.constant 0 : i32
    return %c0_i32, %c0_i32_0 : i32, i32
  }
  func.func @transform_2(%arg0: i32) -> (i32, i32) {
    %c0_i32 = arith.constant 0 : i32
    %c0_i32_0 = arith.constant 0 : i32
    %c0_i32_1 = arith.constant 0 : i32
    return %c0_i32, %c0_i32_0 : i32, i32
  }
  func.func @transform_3(%arg0: i32) -> (i32, i32) {
    %c0_i32 = arith.constant 0 : i32
    %c0_i32_0 = arith.constant 0 : i32
    %c0_i32_1 = arith.constant 0 : i32
    return %c0_i32, %c0_i32_0 : i32, i32
  }
  func.func @transform_4(%arg0: i32) -> (i32, i32) {
    %c0_i32 = arith.constant 0 : i32
    %c0_i32_0 = arith.constant 0 : i32
    %c0_i32_1 = arith.constant 0 : i32
    return %c0_i32, %c0_i32_0 : i32, i32
  }
  func.func @transform_5(%arg0: i32) -> (i32, i32) {
    %c0_i32 = arith.constant 0 : i32
    %c0_i32_0 = arith.constant 0 : i32
    %c0_i32_1 = arith.constant 0 : i32
    return %c0_i32, %c0_i32_0 : i32, i32
  }
  func.func @transform_6(%arg0: i32) -> (i32, i32) {
    %c0_i32 = arith.constant 0 : i32
    %c0_i32_0 = arith.constant 0 : i32
    %c0_i32_1 = arith.constant 0 : i32
    return %c0_i32, %c0_i32_0 : i32, i32
  }
  func.func @transform_7(%arg0: i32) -> (i32, i32, i32, i32) {
    %c0_i32 = arith.constant 0 : i32
    %c0_i32_0 = arith.constant 0 : i32
    %c0_i32_1 = arith.constant 0 : i32
    %c0_i32_2 = arith.constant 0 : i32
    return %arg0, %c0_i32, %c0_i32_0, %c0_i32_1 : i32, i32, i32, i32
  }
}

</mosaic_0001>

<bundles_post_ra>
// kernel: tpu_custom_call.1
= control target key start
LH: loop header
LB: loop body
LE: loop exit
PB: predicated region body
PF: predicated region fallthrough
CT: control target
= control target key end

     0   :  { %s4213_s24 = smov 0   ;;  %s6834_s0 = inlined_call_operand.vmem [shape: f32[2,16,16,8], index: 0, kind: input, shape index: {}]   ;;  %s6835_s1 = inlined_call_operand.vmem [shape: bf16[72,8], index: 1, kind: input, shape index: {}]   ;;  %s6836_s2 = inlined_call_operand.vmem [shape: f32[1,8], index: 2, kind: input, shape index: {}]   ;;  %s6837_s3 = inlined_call_operand.vmem [shape: f32[1,8], index: 3, kind: input, shape index: {}]   ;;  %s6838_s4 = inlined_call_operand.vmem [shape: bf16[72,8], index: 4, kind: input, shape index: {}]   ;;  %s6839_s5 = inlined_call_operand.vmem [shape: f32[1,8], index: 5, kind: input, shape index: {}]   ;;  %s6840_s6 = inlined_call_operand.vmem [shape: f32[1,8], index: 6, kind: input, shape index: {}]   ;;  %s6841_s7 = inlined_call_operand.vmem [shape: f32[2,16,16,8], index: 7, kind: output, shape index: {}]  }
   0x1 LB: > { %s4002_s25 = sadd.s32 4294967295, %s4162_s24   ;;  %p4006_p0 = scmp.ge.s32.totalorder %s4162_s24, 1  ;;  %s4162_s24 = sphi %s4213_s24, %s17_s24  }
   0x2   : > { %p237_p1 = scmp.lt.s32.totalorder %s4162_s24, 3 }
   0x4   : > { %p238_p2 = pnand %p4006_p0, %p237_p1 }
   0x6   : > { %241 = sbr.rel (%p238_p2) target bundleno = 1329 (0x531), region = 48 }
   0xb   : > { %vm280_vm0 = vcmask 64512   ;;  %vm283_vm1 = vcmask 58368   ;;  %v4164_v0 = vmov 0.0   ;;  %vm509_vm2 = vsmask.f32 3328  ;;  %s4165_s26 = smov 8  }
   0xc   : > { %281 = vst.msk [vmem:[#allocation2] sm:$0xff] %vm280_vm0, %v4164_v0  ;;  %vm510_vm3 = vsmask.f32 7440  ;;  %v6903_v17 = vmov 0  ;;  %p269_p3 = scmp.lt.s32.totalorder %s4002_s25, 1  ;;  %vm944_vm5 = vcmask 1042432  }
   0xd   : > { %282 = vst.msk [vmem:[#allocation2 + $0x8] sm:$0xff] %vm280_vm0, %v4164_v0  ;;  %vm4262_vm4 = vmor %vm509_vm2, %vm510_vm3  ;;  %vm945_vm6 = vcmask 1046532   ;;  %s4166_s8 = smov 16   ;;  %s4167_s9 = smov 24   ;;  %vm1893_vm8 = vcmask 1043456   ;;  %vm1626_vm9 = vcmask 195584  }
   0xe   : > { %284 = vst.msk [vmem:[#allocation2 + $0x10] sm:$0x3] %vm283_vm1, %v4164_v0  ;;  %v6904_v17 = vsel %vm4262_vm4, 4294967295, %v6903_v17  ;;  %s7035_s25 = smov (!%p269_p3, %s4002_s25), 1  ;;  %vm4804_vm7 = vmor %vm944_vm5, %vm945_vm6  ;;  %s4168_s10 = smov 32   ;;  %vm1593_vm10 = vcmask 130048  }
   0xf   : > { %285 = vst.msk [vmem:[#allocation2 + $0x18] sm:$0xff] %vm280_vm0, %v4164_v0  ;;  %s4113_s27 = sshll.u32 %s7035_s25, 8  ;;  %s4169_s11 = smov 48   ;;  %vm1692_vm11 = vcmask 326656   ;;  %vm1659_vm12 = vcmask 261120   ;;  %vm1725_vm13 = vcmask 392192  }
  0x10   : > { %286 = vst.msk [vmem:[#allocation2 + $0x20] sm:$0xff] %vm280_vm0, %v4164_v0  ;;  %s4459_s30 = scalar_lea.vmem %s6834_s0, %s4113_s27  ;;  %s4170_s12 = smov 40   ;;  %vm1758_vm14 = vcmask 457728   ;;  %vm1791_vm15 = vcmask 523264  }
  0x11   : > { %287 = vst.msk [vmem:[#allocation2 + $0x28] sm:$0x3] %vm283_vm1, %v4164_v0  ;;  %v342_v27 = vld [vmem:[%s4459_s30 + $0x30] sm:$0xff]  ;;  %v343_v28 = vld [vmem:[%s4459_s30 + $0x38] sm:$0xff]  ;;  %v336_v31 = vld [vmem:[%s4459_s30] sm:$0xff]  ;;  %s4171_s13 = smov 56  }
  0x12   : > { %288 = vst.msk [vmem:[#allocation2 + $0x30] sm:$0xff] %vm280_vm0, %v4164_v0  ;;  %v338_v29 = vld [vmem:[%s4459_s30 + $0x10] sm:$0xff]  ;;  %v339_v30 = vld [vmem:[%s4459_s30 + $0x18] sm:$0xff]  ;;  %v337_v32 = vld [vmem:[%s4459_s30 + $0x8] sm:$0xff]  ;;  %s4172_s14 = smov 64  }
  0x13   : > { %v401_v1 = vld [vmem:[#allocation2] sm:$0xff]  ;;  %289 = vst.msk [vmem:[#allocation2 + $0x38] sm:$0xff] %vm280_vm0, %v4164_v0  ;;  %v345_v34 = vld [vmem:[%s4459_s30 + $0x48] sm:$0xff]  ;;  %v346_v38 = vld [vmem:[%s4459_s30 + $0x50] sm:$0xff] }
  0x14   : > { %v402_v2 = vld [vmem:[#allocation2 + $0x8] sm:$0xff]  ;;  %v4237_v3 = vpack.c.bf16 %v401_v1, %v401_v1  ;;  %290 = vst.msk [vmem:[#allocation2 + $0x40] sm:$0x3] %vm283_vm1, %v4164_v0  ;;  %v344_v33 = vld [vmem:[%s4459_s30 + $0x40] sm:$0xff]  ;;  %v347_v42 = vld [vmem:[%s4459_s30 + $0x58] sm:$0xff] }
  0x15   : > { %v403_v4 = vld [vmem:[#allocation2 + $0x10] sm:$0x3]  ;;  %v4241_v5 = vpack.c.bf16 %v402_v2, %v402_v2  ;;  %291 = vst.msk [vmem:[#allocation2 + $0x48] sm:$0xff] %vm280_vm0, %v4164_v0  ;;  %v340_v35 = vld [vmem:[%s4459_s30 + $0x20] sm:$0xff]  ;;  %v341_v36 = vld [vmem:[%s4459_s30 + $0x28] sm:$0xff] }
  0x16   : > { %v4245_v6 = vpack.c.bf16 %v403_v4, %v403_v4  ;;  %v513_v7 = vshrl.u32 %v4237_v3, 16  ;;  %v516_v8 = vshll.u32 %v4237_v3, 16  ;;  %292 = vst.msk [vmem:[#allocation2 + $0x50] sm:$0xff] %vm280_vm0, %v4164_v0  ;;  %v350_v46 = vld [vmem:[%s4459_s30 + $0x70] sm:$0xff]  ;;  %v351_v61 = vld [vmem:[%s4459_s30 + $0x78] sm:$0xff] }
  0x17   : > { %v522_v9 = vshll.u32 %v4241_v5, 16  ;;  %v526_v10 = vshrl.u32 %v4241_v5, 16  ;;  %293 = vst.msk [vmem:[#allocation2 + $0x58] sm:$0x3] %vm283_vm1, %v4164_v0 }
  0x18   : > { %v515_v11 = vrot.slane %v513_v7, 4  ;;  %v518_v12 = vrot.slane %v516_v8, 5  ;;  %v532_v13 = vshll.u32 %v4245_v6, 16  ;;  %294 = vst.msk [vmem:[#allocation2 + $0x60] sm:$0xff] %vm280_vm0, %v4164_v0 }
  0x19   : > { %v524_v14 = vrot.slane %v522_v9, 5  ;;  %v528_v15 = vrot.slane %v526_v10, 4  ;;  %295 = vst.msk [vmem:[#allocation2 + $0x68] sm:$0xff] %vm280_vm0, %v4164_v0 }
  0x1a   : > { %v519_v16 = vor.u32 %v518_v12, %v515_v11  ;;  %296 = vst.msk [vmem:[#allocation2 + $0x70] sm:$0x3] %vm283_vm1, %v4164_v0  ;;  %v534_v19 = vrot.slane %v532_v13, 5  ;;  %v348_v11 = vld [vmem:[%s4459_s30 + $0x60] sm:$0xff] }
  0x1b   : > { %6905 = vst [vmem:[#allocation4_spill] sm:$0xff] %v6904_v17  ;;  %v529_v18 = vor.u32 %v528_v15, %v524_v14 }
  0x1c   : > { %297 = vst.msk [vmem:[#allocation2 + $0x78] sm:$0xff] %vm280_vm0, %v4164_v0  ;;  %v520_v20 = vrot.slane %v519_v16, 4  ;;  %v349_v16 = vld [vmem:[%s4459_s30 + $0x68] sm:$0xff] }
  0x1d   : > { %298 = vst.msk [vmem:[#allocation2 + $0x80] sm:$0xff] %vm280_vm0, %v4164_v0  ;;  %v530_v21 = vrot.slane %v529_v18, 4 }
  0x1e   : > { %299 = vst.msk [vmem:[#allocation2 + $0x88] sm:$0x3] %vm283_vm1, %v4164_v0  ;;  %v525_v22 = vsel %vm4262_vm4, %v520_v20, %v524_v14 }
  0x1f   : > { %300 = vst.msk [vmem:[#allocation2 + $0x90] sm:$0xff] %vm280_vm0, %v4164_v0  ;;  %v535_v23 = vsel %vm4262_vm4, %v530_v21, %v534_v19  ;;  %v1175_v24 = vunpack.c.l.b16 %v525_v22  ;;  %v352_v22 = vld [vmem:[%s4459_s30 + $0x80] sm:$0xff] }
  0x20   : > { %301 = vst.msk [vmem:[#allocation2 + $0x98] sm:$0xff] %vm280_vm0, %v4164_v0  ;;  %v1176_v25 = vunpack.c.l.b16 %v535_v23 }
  0x21   : > { %302 = vst.msk [vmem:[#allocation2 + $0xa0] sm:$0x3] %vm283_vm1, %v4164_v0 }
  0x22   : > { %303 = vst.msk [vmem:[#allocation2 + $0xa8] sm:$0xff] %vm280_vm0, %v4164_v0  ;;  %v1207_v26 = vpack.c.b16 %v1176_v25, %v1175_v24 }
  0x23   : > { %304 = vst.msk [vmem:[#allocation2 + $0xb0] sm:$0xff] %vm280_vm0, %v4164_v0 }
  0x24   : > { %305 = vst.msk [vmem:[#allocation2 + $0xb8] sm:$0x3] %vm283_vm1, %v4164_v0  ;;  %1223 = vrot.lane.b32.xlu0 %v1207_v26, %s4165_s26 }
  0x25   : > { %306 = vst.msk [vmem:[#allocation2 + $0xc0] sm:$0xff] %vm280_vm0, %v4164_v0 }
  0x26   : > { %307 = vst.msk [vmem:[#allocation2 + $0xc8] sm:$0xff] %vm280_vm0, %v4164_v0 }
  0x27   : > { %308 = vst.msk [vmem:[#allocation2 + $0xd0] sm:$0x3] %vm283_vm1, %v4164_v0 }
  0x28   : > { %309 = vst.msk [vmem:[#allocation2 + $0xd8] sm:$0xff] %vm280_vm0, %v4164_v0 }
  0x29   : > { %310 = vst.msk [vmem:[#allocation2 + $0xe0] sm:$0xff] %vm280_vm0, %v4164_v0 }
  0x2a   : > { %311 = vst.msk [vmem:[#allocation2 + $0xe8] sm:$0x3] %vm283_vm1, %v4164_v0 }
  0x2b   : > { %312 = vst.msk [vmem:[#allocation2 + $0xf0] sm:$0xff] %vm280_vm0, %v4164_v0 }
  0x2c   : > { %313 = vst.msk [vmem:[#allocation2 + $0xf8] sm:$0xff] %vm280_vm0, %v4164_v0 }
  0x2d   : > { %314 = vst.msk [vmem:[#allocation2 + $0x100] sm:$0x3] %vm283_vm1, %v4164_v0 }
  0x2e   : > { %315 = vst.msk [vmem:[#allocation2 + $0x108] sm:$0xff] %vm280_vm0, %v4164_v0 }
  0x2f   : > { %316 = vst.msk [vmem:[#allocation2 + $0x110] sm:$0xff] %vm280_vm0, %v4164_v0 }
  0x30   : > { %317 = vst.msk [vmem:[#allocation2 + $0x118] sm:$0x3] %vm283_vm1, %v4164_v0 }
  0x31   : > { %318 = vst.msk [vmem:[#allocation2 + $0x120] sm:$0xff] %vm280_vm0, %v4164_v0 }
  0x32   : > { %319 = vst.msk [vmem:[#allocation2 + $0x128] sm:$0xff] %vm280_vm0, %v4164_v0 }
  0x33   : > { %320 = vst.msk [vmem:[#allocation2 + $0x130] sm:$0x3] %vm283_vm1, %v4164_v0 }
  0x34   : > { %321 = vst.msk [vmem:[#allocation2 + $0x138] sm:$0xff] %vm280_vm0, %v4164_v0 }
  0x35   : > { %322 = vst.msk [vmem:[#allocation2 + $0x140] sm:$0xff] %vm280_vm0, %v4164_v0 }
  0x36   : > { %323 = vst.msk [vmem:[#allocation2 + $0x148] sm:$0x3] %vm283_vm1, %v4164_v0 }
  0x37   : > { %324 = vst.msk [vmem:[#allocation2 + $0x150] sm:$0xff] %vm280_vm0, %v4164_v0 }
  0x38   : > { %325 = vst.msk [vmem:[#allocation2 + $0x158] sm:$0xff] %vm280_vm0, %v4164_v0 }
  0x39   : > { %326 = vst.msk [vmem:[#allocation2 + $0x160] sm:$0x3] %vm283_vm1, %v4164_v0 }
  0x3a   : > { %327 = vst.msk [vmem:[#allocation2 + $0x168] sm:$0xff] %vm280_vm0, %v4164_v0 }
  0x3b   : > { %328 = vst.msk [vmem:[#allocation2 + $0x170] sm:$0xff] %vm280_vm0, %v4164_v0 }
  0x3c   : > { %329 = vst.msk [vmem:[#allocation2 + $0x178] sm:$0x3] %vm283_vm1, %v4164_v0 }
  0x3d   : > { %330 = vst.msk [vmem:[#allocation2 + $0x180] sm:$0xff] %vm280_vm0, %v4164_v0 }
  0x3e   : > { %331 = vst.msk [vmem:[#allocation2 + $0x188] sm:$0xff] %vm280_vm0, %v4164_v0 }
  0x3f   : > { %332 = vst.msk [vmem:[#allocation2 + $0x190] sm:$0x3] %vm283_vm1, %v4164_v0 }
  0x40   : > { %333 = vst.msk [vmem:[#allocation2 + $0x198] sm:$0xff] %vm280_vm0, %v4164_v0 }
  0x41   : > { %334 = vst.msk [vmem:[#allocation2 + $0x1a0] sm:$0xff] %vm280_vm0, %v4164_v0 }
  0x42   : > { %335 = vst.msk [vmem:[#allocation2 + $0x1a8] sm:$0x3] %vm283_vm1, %v4164_v0 }
  0x43   : > { %2090 = vst.msk [vmem:[#allocation3] sm:$0xff] %vm280_vm0, %v4164_v0 }
  0x44   : > { %2091 = vst.msk [vmem:[#allocation3 + $0x8] sm:$0xff] %vm280_vm0, %v4164_v0 }
  0x45   : > { %2092 = vst.msk [vmem:[#allocation3 + $0x10] sm:$0x3] %vm283_vm1, %v4164_v0 }
  0x46   : > { %2093 = vst.msk [vmem:[#allocation3 + $0x18] sm:$0xff] %vm280_vm0, %v4164_v0 }
  0x47   : > { %2094 = vst.msk [vmem:[#allocation3 + $0x20] sm:$0xff] %vm280_vm0, %v4164_v0 }
  0x48   : > { %2095 = vst.msk [vmem:[#allocation3 + $0x28] sm:$0x3] %vm283_vm1, %v4164_v0 }
  0x49   : > { %2096 = vst.msk [vmem:[#allocation3 + $0x30] sm:$0xff] %vm280_vm0, %v4164_v0 }
  0x4a   : > { %2097 = vst.msk [vmem:[#allocation3 + $0x38] sm:$0xff] %vm280_vm0, %v4164_v0 }
  0x4b   : > { %2098 = vst.msk [vmem:[#allocation3 + $0x40] sm:$0x3] %vm283_vm1, %v4164_v0 }
  0x4c   : > { %2099 = vst.msk [vmem:[#allocation3 + $0x48] sm:$0xff] %vm280_vm0, %v4164_v0 }
  0x4d   : > { %2100 = vst.msk [vmem:[#allocation3 + $0x50] sm:$0xff] %vm280_vm0, %v4164_v0 }
  0x4e   : > { %2101 = vst.msk [vmem:[#allocation3 + $0x58] sm:$0x3] %vm283_vm1, %v4164_v0 }
  0x4f   : > { %2102 = vst.msk [vmem:[#allocation3 + $0x60] sm:$0xff] %vm280_vm0, %v4164_v0 }
  0x50   : > { %2103 = vst.msk [vmem:[#allocation3 + $0x68] sm:$0xff] %vm280_vm0, %v4164_v0 }
  0x51   : > { %2104 = vst.msk [vmem:[#allocation3 + $0x70] sm:$0x3] %vm283_vm1, %v4164_v0 }
  0x52   : > { %2105 = vst.msk [vmem:[#allocation3 + $0x78] sm:$0xff] %vm280_vm0, %v4164_v0 }
  0x53   : > { %2106 = vst.msk [vmem:[#allocation3 + $0x80] sm:$0xff] %vm280_vm0, %v4164_v0 }
  0x54   : > { %2107 = vst.msk [vmem:[#allocation3 + $0x88] sm:$0x3] %vm283_vm1, %v4164_v0 }
  0x55   : > { %2108 = vst.msk [vmem:[#allocation3 + $0x90] sm:$0xff] %vm280_vm0, %v4164_v0 }
  0x56   : > { %2109 = vst.msk [vmem:[#allocation3 + $0x98] sm:$0xff] %vm280_vm0, %v4164_v0 }
  0x57   : > { %2110 = vst.msk [vmem:[#allocation3 + $0xa0] sm:$0x3] %vm283_vm1, %v4164_v0 }
  0x58   : > { %2111 = vst.msk [vmem:[#allocation3 + $0xa8] sm:$0xff] %vm280_vm0, %v4164_v0 }
  0x59   : > { %2112 = vst.msk [vmem:[#allocation3 + $0xb0] sm:$0xff] %vm280_vm0, %v4164_v0 }
  0x5a   : > { %2113 = vst.msk [vmem:[#allocation3 + $0xb8] sm:$0x3] %vm283_vm1, %v4164_v0 }
  0x5b   : > { %2114 = vst.msk [vmem:[#allocation3 + $0xc0] sm:$0xff] %vm280_vm0, %v4164_v0 }
  0x5c   : > { %2115 = vst.msk [vmem:[#allocation3 + $0xc8] sm:$0xff] %vm280_vm0, %v4164_v0 }
  0x5d   : > { %2116 = vst.msk [vmem:[#allocation3 + $0xd0] sm:$0x3] %vm283_vm1, %v4164_v0 }
  0x5e   : > { %2117 = vst.msk [vmem:[#allocation3 + $0xd8] sm:$0xff] %vm280_vm0, %v4164_v0 }
  0x5f   : > { %2118 = vst.msk [vmem:[#allocation3 + $0xe0] sm:$0xff] %vm280_vm0, %v4164_v0 }
  0x60   : > { %2119 = vst.msk [vmem:[#allocation3 + $0xe8] sm:$0x3] %vm283_vm1, %v4164_v0 }
  0x61   : > { %2120 = vst.msk [vmem:[#allocation3 + $0xf0] sm:$0xff] %vm280_vm0, %v4164_v0 }
  0x62   : > { %2121 = vst.msk [vmem:[#allocation3 + $0xf8] sm:$0xff] %vm280_vm0, %v4164_v0 }
  0x63   : > { %2122 = vst.msk [vmem:[#allocation3 + $0x100] sm:$0x3] %vm283_vm1, %v4164_v0 }
  0x64   : > { %2123 = vst.msk [vmem:[#allocation3 + $0x108] sm:$0xff] %vm280_vm0, %v4164_v0 }
  0x65   : > { %2124 = vst.msk [vmem:[#allocation3 + $0x110] sm:$0xff] %vm280_vm0, %v4164_v0 }
  0x66   : > { %2125 = vst.msk [vmem:[#allocation3 + $0x118] sm:$0x3] %vm283_vm1, %v4164_v0 }
  0x67   : > { %2126 = vst.msk [vmem:[#allocation3 + $0x120] sm:$0xff] %vm280_vm0, %v4164_v0 }
  0x68   : > { %2127 = vst.msk [vmem:[#allocation3 + $0x128] sm:$0xff] %vm280_vm0, %v4164_v0 }
  0x69   : > { %2128 = vst.msk [vmem:[#allocation3 + $0x130] sm:$0x3] %vm283_vm1, %v4164_v0 }
  0x6a   : > { %2129 = vst.msk [vmem:[#allocation3 + $0x138] sm:$0xff] %vm280_vm0, %v4164_v0 }
  0x6b   : > { %2130 = vst.msk [vmem:[#allocation3 + $0x140] sm:$0xff] %vm280_vm0, %v4164_v0 }
  0x6c   : > { %2131 = vst.msk [vmem:[#allocation3 + $0x148] sm:$0x3] %vm283_vm1, %v4164_v0 }
  0x6d   : > { %2132 = vst.msk [vmem:[#allocation3 + $0x150] sm:$0xff] %vm280_vm0, %v4164_v0 }
  0x6e   : > { %2133 = vst.msk [vmem:[#allocation3 + $0x158] sm:$0xff] %vm280_vm0, %v4164_v0 }
  0x6f   : > { %2134 = vst.msk [vmem:[#allocation3 + $0x160] sm:$0x3] %vm283_vm1, %v4164_v0 }
  0x70   : > { %2135 = vst.msk [vmem:[#allocation3 + $0x168] sm:$0xff] %vm280_vm0, %v4164_v0 }
  0x71   : > { %2136 = vst.msk [vmem:[#allocation3 + $0x170] sm:$0xff] %vm280_vm0, %v4164_v0 }
  0x72   : > { %2137 = vst.msk [vmem:[#allocation3 + $0x178] sm:$0x3] %vm283_vm1, %v4164_v0 }
  0x73   : > { %2138 = vst.msk [vmem:[#allocation3 + $0x180] sm:$0xff] %vm280_vm0, %v4164_v0 }
  0x74   : > { %2139 = vst.msk [vmem:[#allocation3 + $0x188] sm:$0xff] %vm280_vm0, %v4164_v0 }
  0x75   : > { %2140 = vst.msk [vmem:[#allocation3 + $0x190] sm:$0x3] %vm283_vm1, %v4164_v0 }
  0x76   : > { %2141 = vst.msk [vmem:[#allocation3 + $0x198] sm:$0xff] %vm280_vm0, %v4164_v0 }
  0x77   : > { %2142 = vst.msk [vmem:[#allocation3 + $0x1a0] sm:$0xff] %vm280_vm0, %v4164_v0 }
  0x78   : > { %2143 = vst.msk [vmem:[#allocation3 + $0x1a8] sm:$0x3] %vm283_vm1, %v4164_v0  ;;  %vm1860_vm1 = vcmask 588800  }
  0x79   : > { %375 = vst.msk [vmem:[#allocation2 + $0x61] sm:$0xff] %vm280_vm0, %v342_v27  ;;  %v353_v27 = vld [vmem:[%s4459_s30 + $0x88] sm:$0xff] }
  0x7a   : > { %376 = vst.msk [vmem:[#allocation2 + $0x69] sm:$0xff] %vm280_vm0, %v343_v28 }
  0x7b   : > { %371 = vst.msk [vmem:[#allocation2 + $0x31] sm:$0xff] %vm280_vm0, %v338_v29 }
  0x7c   : > { %372 = vst.msk [vmem:[#allocation2 + $0x39] sm:$0xff] %vm280_vm0, %v339_v30 }
  0x7d   : > { %369 = vst.msk [vmem:[#allocation2 + $0x19] sm:$0xff] %vm280_vm0, %v336_v31 }
  0x7e   : > { %370 = vst.msk [vmem:[#allocation2 + $0x21] sm:$0xff] %vm280_vm0, %v337_v32 }
  0x7f   : > { %377 = vst.msk [vmem:[#allocation2 + $0x79] sm:$0xff] %vm280_vm0, %v344_v33  ;;  %v356_v33 = vld [vmem:[%s4459_s30 + $0xa0] sm:$0xff] }
  0x80   : > { %v413_v37 = vld [vmem:[#allocation2 + $0x60] sm:$0xff]  ;;  %378 = vst.msk [vmem:[#allocation2 + $0x81] sm:$0xff] %vm280_vm0, %v345_v34 }
  0x81   : > { %v414_v39 = vld [vmem:[#allocation2 + $0x68] sm:$0xff]  ;;  %v415_v40 = vld [vmem:[#allocation2 + $0x70] sm:$0x3]  ;;  %v4490_v41 = vpack.c.bf16 %v413_v37, %v413_v37  ;;  %373 = vst.msk [vmem:[#allocation2 + $0x49] sm:$0xff] %vm280_vm0, %v340_v35 }
  0x82   : > { %v4494_v43 = vpack.c.bf16 %v414_v39, %v414_v39  ;;  %v4496_v44 = vpack.c.bf16 %v415_v40, %v415_v40  ;;  %v407_v45 = vld [vmem:[#allocation2 + $0x30] sm:$0xff]  ;;  %374 = vst.msk [vmem:[#allocation2 + $0x51] sm:$0xff] %vm280_vm0, %v341_v36  ;;  %v357_v39 = vld [vmem:[%s4459_s30 + $0xa8] sm:$0xff] }
  0x83   : > { %v609_v47 = vshrl.u32 %v4490_v41, 16  ;;  %v612_v48 = vshll.u32 %v4490_v41, 16  ;;  %v408_v49 = vld [vmem:[#allocation2 + $0x38] sm:$0xff]  ;;  %v409_v50 = vld [vmem:[#allocation2 + $0x40] sm:$0x3]  ;;  %v4502_v51 = vpack.c.bf16 %v407_v45, %v407_v45  ;;  %379 = vst.msk [vmem:[#allocation2 + $0x91] sm:$0xff] %vm280_vm0, %v346_v38 }
  0x84   : > { %v618_v52 = vshll.u32 %v4494_v43, 16  ;;  %v622_v53 = vshrl.u32 %v4494_v43, 16  ;;  %v628_v54 = vshll.u32 %v4496_v44, 16  ;;  %v4508_v55 = vpack.c.bf16 %v408_v49, %v408_v49  ;;  %380 = vst.msk [vmem:[#allocation2 + $0x99] sm:$0xff] %vm280_vm0, %v347_v42  ;;  %v404_v60 = vld [vmem:[#allocation2 + $0x18] sm:$0xff] }
  0x85   : > { %v611_v56 = vrot.slane %v609_v47, 4  ;;  %v614_v57 = vrot.slane %v612_v48, 5  ;;  %v4511_v58 = vpack.c.bf16 %v409_v50, %v409_v50  ;;  %v561_v59 = vshrl.u32 %v4502_v51, 16  ;;  %v405_v2 = vld [vmem:[#allocation2 + $0x20] sm:$0xff]  ;;  %383 = vst.msk [vmem:[#allocation2 + $0xc1] sm:$0xff] %vm280_vm0, %v350_v46  ;;  %v354_v48 = vld [vmem:[%s4459_s30 + $0x90] sm:$0xff] }
  0x86   : > { %v620_v62 = vrot.slane %v618_v52, 5  ;;  %v624_v63 = vrot.slane %v622_v53, 4  ;;  %v630_v0 = vrot.slane %v628_v54, 5  ;;  %v564_v1 = vshll.u32 %v4502_v51, 16  ;;  %v406_v10 = vld [vmem:[#allocation2 + $0x28] sm:$0x3] }
  0x87   : > { %v615_v4 = vor.u32 %v614_v57, %v611_v56  ;;  %v563_v7 = vrot.slane %v561_v59, 4  ;;  %v570_v8 = vshll.u32 %v4508_v55, 16  ;;  %v574_v9 = vshrl.u32 %v4508_v55, 16  ;;  %384 = vst.msk [vmem:[#allocation2 + $0xc9] sm:$0xff] %vm280_vm0, %v351_v61  ;;  %v416_v32 = vld [vmem:[#allocation2 + $0x78] sm:$0xff]  ;;  %v417_v47 = vld [vmem:[#allocation2 + $0x80] sm:$0xff] }
  0x88   : > { %v625_v12 = vor.u32 %v624_v63, %v620_v62  ;;  %v566_v13 = vrot.slane %v564_v1, 5  ;;  %v580_v14 = vshll.u32 %v4511_v58, 16  ;;  %v4521_v15 = vpack.c.bf16 %v404_v60, %v404_v60  ;;  %381 = vst.msk [vmem:[#allocation2 + $0xa9] sm:$0xff] %vm280_vm0, %v348_v11  ;;  %v418_v38 = vld [vmem:[#allocation2 + $0x88] sm:$0x3]  ;;  %v355_v56 = vld [vmem:[%s4459_s30 + $0x98] sm:$0xff] }
  0x89   : > { %v616_v18 = vrot.slane %v615_v4, 4  ;;  %v572_v19 = vrot.slane %v570_v8, 5  ;;  %v576_v20 = vrot.slane %v574_v9, 4  ;;  %v4525_v21 = vpack.c.bf16 %v405_v2, %v405_v2  ;;  %382 = vst.msk [vmem:[#allocation2 + $0xb1] sm:$0xff] %vm280_vm0, %v349_v16  ;;  %v410_v54 = vld [vmem:[#allocation2 + $0x48] sm:$0xff]  ;;  %v358_v2 = vld [vmem:[%s4459_s30 + $0xb0] sm:$0xff] }
  0x8a   : > { %v626_v23 = vrot.slane %v625_v12, 4  ;;  %v567_v24 = vor.u32 %v566_v13, %v563_v7  ;;  %v582_v25 = vrot.slane %v580_v14, 5  ;;  %v4528_v26 = vpack.c.bf16 %v406_v10, %v406_v10  ;;  %385 = vst.msk [vmem:[#allocation2 + $0xd9] sm:$0xff] %vm280_vm0, %v352_v22  ;;  %v359_v4 = vld [vmem:[%s4459_s30 + $0xb8] sm:$0xff]  ;;  %v411_v16 = vld [vmem:[#allocation2 + $0x50] sm:$0xff] }
  0x8b   : > { %v621_v28 = vsel %vm4262_vm4, %v616_v18, %v620_v62  ;;  %v577_v29 = vor.u32 %v576_v20, %v572_v19  ;;  %v537_v30 = vshrl.u32 %v4521_v15, 16  ;;  %v540_v31 = vshll.u32 %v4521_v15, 16  ;;  %386 = vst.msk [vmem:[#allocation2 + $0xe1] sm:$0xff] %vm280_vm0, %v353_v27 }
  0x8c   : > { %v631_v34 = vsel %vm4262_vm4, %v626_v23, %v630_v0  ;;  %v1183_v35 = vunpack.c.l.b16 %v621_v28  ;;  %v568_v36 = vrot.slane %v567_v24, 4  ;;  %v546_v37 = vshll.u32 %v4525_v21, 16  ;;  %389 = vst.msk [vmem:[#allocation2 + $0x109] sm:$0xff] %vm280_vm0, %v356_v33  ;;  %v412_v23 = vld [vmem:[#allocation2 + $0x58] sm:$0x3] }
  0x8d   : > { %v1184_v40 = vunpack.c.l.b16 %v631_v34  ;;  %v578_v42 = vrot.slane %v577_v29, 4  ;;  %v539_v45 = vrot.slane %v537_v30, 4  ;;  %v542_v46 = vrot.slane %v540_v31, 5  ;;  %390 = vst.msk [vmem:[#allocation2 + $0x111] sm:$0xff] %vm280_vm0, %v357_v39 }
  0x8e   : > { %v573_v49 = vsel %vm4262_vm4, %v568_v36, %v572_v19  ;;  %v548_v50 = vrot.slane %v546_v37, 5  ;;  %v550_v52 = vshrl.u32 %v4525_v21, 16  ;;  %v556_v53 = vshll.u32 %v4528_v26, 16  ;;  %387 = vst.msk [vmem:[#allocation2 + $0xf1] sm:$0xff] %vm280_vm0, %v354_v48 }
  0x8f   : > { %v4551_v57 = vpack.c.b16 %v1184_v40, %v1183_v35  ;;  %v583_v59 = vsel %vm4262_vm4, %v578_v42, %v582_v25  ;;  %v1179_v60 = vunpack.c.l.b16 %v573_v49  ;;  %v543_v61 = vor.u32 %v542_v46, %v539_v45  ;;  %388 = vst.msk [vmem:[#allocation2 + $0xf9] sm:$0xff] %vm280_vm0, %v355_v56  ;;  %v419_v42 = vld [vmem:[#allocation2 + $0x90] sm:$0xff]  ;;  %v420_v49 = vld [vmem:[#allocation2 + $0x98] sm:$0xff]  ;;  %v421_v56 = vld [vmem:[#allocation2 + $0xa0] sm:$0x3] }
  0x90   : > { %v1180_v62 = vunpack.c.l.b16 %v583_v59  ;;  %v552_v63 = vrot.slane %v550_v52, 4  ;;  %v558_v0 = vrot.slane %v556_v53, 5  ;;  %v4556_v1 = vpack.c.bf16 %v416_v32, %v416_v32  ;;  %391 = vst.msk [vmem:[#allocation2 + $0x121] sm:$0xff] %vm280_vm0, %v358_v2 }
  0x91   : > { %6906 = vst [vmem:[#allocation5_spill] sm:$0xff] %v4551_v57  ;;  %1231 = vrot.lane.b32.xlu2 %v4551_v57, %s4165_s26  ;;  %v544_v7 = vrot.slane %v543_v61, 4  ;;  %v4563_v8 = vpack.c.bf16 %v417_v47, %v417_v47  ;;  %v4565_v9 = vpack.c.bf16 %v418_v38, %v418_v38  ;;  %v4567_v10 = vpack.c.bf16 %v410_v54, %v410_v54 }
  0x92   : > { %v4570_v11 = vpack.c.b16 %v1180_v62, %v1179_v60  ;;  %v553_v12 = vor.u32 %v552_v63, %v548_v50  ;;  %v633_v13 = vshrl.u32 %v4556_v1, 16  ;;  %v636_v14 = vshll.u32 %v4556_v1, 16  ;;  %392 = vst.msk [vmem:[#allocation2 + $0x129] sm:$0xff] %vm280_vm0, %v359_v4  ;;  %v362_v63 = vld [vmem:[%s4459_s30 + $0xd0] sm:$0xff] }
  0x93   : > { %v549_v18 = vsel %vm4262_vm4, %v544_v7, %v548_v50  ;;  %v642_v19 = vshll.u32 %v4563_v8, 16  ;;  %v646_v20 = vshrl.u32 %v4563_v8, 16  ;;  %v652_v22 = vshll.u32 %v4565_v9, 16  ;;  %395 = vst.msk [vmem:[#allocation2 + $0x151] sm:$0xff] %vm280_vm0, %v362_v63 }
  0x94   : > { %6907 = vst [vmem:[#allocation6_spill] sm:$0xff] %v4570_v11  ;;  %1227 = vrot.lane.b32.xlu1 %v4570_v11, %s4165_s26  ;;  %v554_v24 = vrot.slane %v553_v12, 4  ;;  %v1177_v25 = vunpack.c.l.b16 %v549_v18  ;;  %v635_v27 = vrot.slane %v633_v13, 4  ;;  %v638_v28 = vrot.slane %v636_v14, 5  ;;  %v360_v13 = vld [vmem:[%s4459_s30 + $0xc0] sm:$0xff]  ;;  %v361_v14 = vld [vmem:[%s4459_s30 + $0xc8] sm:$0xff] }
  0x95   : > { %v644_v29 = vrot.slane %v642_v19, 5  ;;  %v648_v30 = vrot.slane %v646_v20, 4  ;;  %v654_v31 = vrot.slane %v652_v22, 5  ;;  %v4583_v32 = vpack.c.bf16 %v411_v16, %v411_v16  ;;  %393 = vst.msk [vmem:[#allocation2 + $0x139] sm:$0xff] %vm280_vm0, %v360_v13 }
  0x96   : > { %v559_v33 = vsel %vm4262_vm4, %v554_v24, %v558_v0  ;;  %v639_v34 = vor.u32 %v638_v28, %v635_v27  ;;  %v4587_v35 = vpack.c.bf16 %v412_v23, %v412_v23  ;;  %v585_v36 = vshrl.u32 %v4567_v10, 16  ;;  %v363_v0 = vld [vmem:[%s4459_s30 + $0xd8] sm:$0xff]  ;;  %v425_v27 = vld [vmem:[#allocation2 + $0xc0] sm:$0xff]  ;;  %394 = vst.msk [vmem:[#allocation2 + $0x141] sm:$0xff] %vm280_vm0, %v361_v14 }
  0x97   : > { %v1178_v37 = vunpack.c.l.b16 %v559_v33  ;;  %v649_v38 = vor.u32 %v648_v30, %v644_v29  ;;  %v588_v39 = vshll.u32 %v4567_v10, 16  ;;  %v594_v40 = vshll.u32 %v4583_v32, 16  ;;  %396 = vst.msk [vmem:[#allocation2 + $0x159] sm:$0xff] %vm280_vm0, %v363_v0  ;;  %v426_v33 = vld [vmem:[#allocation2 + $0xc8] sm:$0xff]  ;;  %v423_v0 = vld [vmem:[#allocation2 + $0xb0] sm:$0xff] }
  0x98   : > { %v640_v45 = vrot.slane %v639_v34, 4  ;;  %v587_v46 = vrot.slane %v585_v36, 4  ;;  %v598_v47 = vshrl.u32 %v4583_v32, 16  ;;  %v604_v48 = vshll.u32 %v4587_v35, 16 }
  0x99   : > { %v4594_v50 = vpack.c.b16 %v1178_v37, %v1177_v25  ;;  %v650_v52 = vrot.slane %v649_v38, 4  ;;  %v590_v53 = vrot.slane %v588_v39, 5  ;;  %v596_v54 = vrot.slane %v594_v40, 5  ;;  %v427_v39 = vld [vmem:[#allocation2 + $0xd0] sm:$0x3]  ;;  %v422_v40 = vld [vmem:[#allocation2 + $0xa8] sm:$0xff] }
  0x9a   : > { %v645_v59 = vsel %vm4262_vm4, %v640_v45, %v644_v29  ;;  %v600_v60 = vrot.slane %v598_v47, 4  ;;  %v606_v61 = vrot.slane %v604_v48, 5  ;;  %v4598_v62 = vpack.c.bf16 %v419_v42, %v419_v42 }
  0x9b   : > { %6908 = vst [vmem:[#allocation7_spill] sm:$0xff] %v4594_v50  ;;  %1225 = vrot.lane.b32.xlu0 %v4594_v50, %s4165_s26  ;;  %v655_v2 = vsel %vm4262_vm4, %v650_v52, %v654_v31  ;;  %v1185_v4 = vunpack.c.l.b16 %v645_v59  ;;  %v591_v7 = vor.u32 %v590_v53, %v587_v46  ;;  %v4606_v12 = vpack.c.bf16 %v420_v49, %v420_v49 }
  0x9c   : > { %v1186_v16 = vunpack.c.l.b16 %v655_v2  ;;  %v601_v18 = vor.u32 %v600_v60, %v596_v54  ;;  %v4611_v19 = vpack.c.bf16 %v421_v56, %v421_v56  ;;  %v657_v20 = vshrl.u32 %v4598_v62, 16  ;;  %v365_v56 = vld [vmem:[%s4459_s30 + $0xe8] sm:$0xff] }
  0x9d   : > { %v592_v22 = vrot.slane %v591_v7, 4  ;;  %v660_v23 = vshll.u32 %v4598_v62, 16  ;;  %v666_v24 = vshll.u32 %v4606_v12, 16  ;;  %v670_v25 = vshrl.u32 %v4606_v12, 16  ;;  %398 = vst.msk [vmem:[#allocation2 + $0x171] sm:$0xff] %vm280_vm0, %v365_v56 }
  0x9e   : > { %v4619_v28 = vpack.c.b16 %v1186_v16, %v1185_v4  ;;  %v602_v29 = vrot.slane %v601_v18, 4  ;;  %v659_v30 = vrot.slane %v657_v20, 4  ;;  %v676_v31 = vshll.u32 %v4611_v19, 16 }
  0x9f   : > { %v597_v34 = vsel %vm4262_vm4, %v592_v22, %v596_v54  ;;  %v662_v36 = vrot.slane %v660_v23, 5  ;;  %v668_v37 = vrot.slane %v666_v24, 5  ;;  %v672_v38 = vrot.slane %v670_v25, 4  ;;  %v364_v54 = vld [vmem:[%s4459_s30 + $0xe0] sm:$0xff]  ;;  %v424_v22 = vld [vmem:[#allocation2 + $0xb8] sm:$0x3] }
  0xa0   : > { %6909 = vst [vmem:[#allocation8_spill] sm:$0xff] %v4619_v28  ;;  %1233 = vrot.lane.b32.xlu2 %v4619_v28, %s4165_s26  ;;  %v607_v42 = vsel %vm4262_vm4, %v602_v29, %v606_v61  ;;  %v1181_v45 = vunpack.c.l.b16 %v597_v34  ;;  %v678_v46 = vrot.slane %v676_v31, 5  ;;  %v4629_v47 = vpack.c.bf16 %v425_v27, %v425_v27 }
  0xa1   : > { %v1182_v48 = vunpack.c.l.b16 %v607_v42  ;;  %v663_v49 = vor.u32 %v662_v36, %v659_v30  ;;  %v673_v52 = vor.u32 %v672_v38, %v668_v37  ;;  %v4631_v53 = vpack.c.bf16 %v426_v33, %v426_v33  ;;  %397 = vst.msk [vmem:[#allocation2 + $0x169] sm:$0xff] %vm280_vm0, %v364_v54 }
  0xa2   : > { %v4635_v59 = vpack.c.bf16 %v427_v39, %v427_v39  ;;  %v705_v60 = vshrl.u32 %v4629_v47, 16  ;;  %v708_v63 = vshll.u32 %v4629_v47, 16  ;;  %v4639_v2 = vpack.c.bf16 %v422_v40, %v422_v40  ;;  %v428_v40 = vld [vmem:[#allocation2 + $0xd8] sm:$0xff] }
  0xa3   : > { %v4642_v61 = vpack.c.b16 %v1182_v48, %v1181_v45  ;;  %v664_v4 = vrot.slane %v663_v49, 4  ;;  %v674_v7 = vrot.slane %v673_v52, 4  ;;  %v714_v13 = vshll.u32 %v4631_v53, 16  ;;  %v429_v48 = vld [vmem:[#allocation2 + $0xe0] sm:$0xff] }
  0xa4   : > { %v707_v14 = vrot.slane %v705_v60, 4  ;;  %v710_v16 = vrot.slane %v708_v63, 5  ;;  %v718_v18 = vshrl.u32 %v4631_v53, 16  ;;  %v724_v20 = vshll.u32 %v4635_v59, 16  ;;  %v430_v60 = vld [vmem:[#allocation2 + $0xe8] sm:$0x3] }
  0xa5   : > { %6910 = vst [vmem:[#allocation9_spill] sm:$0xff] %v4642_v61  ;;  %1229 = vrot.lane.b32.xlu1 %v4642_v61, %s4165_s26  ;;  %v669_v23 = vsel %vm4262_vm4, %v664_v4, %v668_v37  ;;  %v679_v24 = vsel %vm4262_vm4, %v674_v7, %v678_v46  ;;  %v716_v25 = vrot.slane %v714_v13, 5  ;;  %v4654_v27 = vpack.c.bf16 %v423_v0, %v423_v0 }
  0xa6   : > { %v1187_v29 = vunpack.c.l.b16 %v669_v23  ;;  %v1188_v30 = vunpack.c.l.b16 %v679_v24  ;;  %v711_v31 = vor.u32 %v710_v16, %v707_v14  ;;  %v720_v33 = vrot.slane %v718_v18, 4 }
  0xa7   : > { %v726_v34 = vrot.slane %v724_v20, 5  ;;  %v4656_v36 = vpack.c.bf16 %v424_v22, %v424_v22  ;;  %v681_v38 = vshrl.u32 %v4639_v2, 16  ;;  %v684_v39 = vshll.u32 %v4639_v2, 16 }
  0xa8   : > { %v4660_v42 = vpack.c.b16 %v1188_v30, %v1187_v29  ;;  %v712_v37 = vrot.slane %v711_v31, 4  ;;  %v721_v45 = vor.u32 %v720_v33, %v716_v25  ;;  %v690_v46 = vshll.u32 %v4654_v27, 16 }
  0xa9   : > { %v683_v49 = vrot.slane %v681_v38, 4  ;;  %v686_v52 = vrot.slane %v684_v39, 5  ;;  %v694_v54 = vshrl.u32 %v4654_v27, 16  ;;  %v700_v56 = vshll.u32 %v4656_v36, 16 }
  0xaa   : > { %6911 = vst [vmem:[#allocation10_spill] sm:$0xff] %v4660_v42  ;;  %1235 = vrot.lane.b32.xlu0 %v4660_v42, %s4165_s26  ;;  %v717_v63 = vsel %vm4262_vm4, %v712_v37, %v716_v25  ;;  %v722_v0 = vrot.slane %v721_v45, 4  ;;  %v692_v4 = vrot.slane %v690_v46, 5  ;;  %v4669_v7 = vpack.c.bf16 %v428_v40, %v428_v40  ;;  %v434_v37 = vld [vmem:[#allocation2 + $0x108] sm:$0xff] }
  0xab   : > { %v1191_v13 = vunpack.c.l.b16 %v717_v63  ;;  %v687_v14 = vor.u32 %v686_v52, %v683_v49  ;;  %v696_v16 = vrot.slane %v694_v54, 4  ;;  %v702_v18 = vrot.slane %v700_v56, 5  ;;  %v436_v52 = vld [vmem:[#allocation2 + $0x118] sm:$0x3]  ;;  %v431_v54 = vld [vmem:[#allocation2 + $0xf0] sm:$0xff] }
  0xac   : > { %v727_v20 = vsel %vm4262_vm4, %v722_v0, %v726_v34  ;;  %v4673_v22 = vpack.c.bf16 %v429_v48, %v429_v48  ;;  %v4675_v23 = vpack.c.bf16 %v430_v60, %v430_v60  ;;  %v729_v24 = vshrl.u32 %v4669_v7, 16  ;;  %v435_v34 = vld [vmem:[#allocation2 + $0x110] sm:$0xff] }
  0xad   : > { %v1192_v29 = vunpack.c.l.b16 %v727_v20  ;;  %v688_v30 = vrot.slane %v687_v14, 4  ;;  %v697_v25 = vor.u32 %v696_v16, %v692_v4  ;;  %v732_v31 = vshll.u32 %v4669_v7, 16 }
  0xae   : > { %v731_v33 = vrot.slane %v729_v24, 4  ;;  %v738_v38 = vshll.u32 %v4673_v22, 16  ;;  %v742_v39 = vshrl.u32 %v4673_v22, 16  ;;  %v748_v40 = vshll.u32 %v4675_v23, 16 }
  0xaf   : > { %v4682_v45 = vpack.c.b16 %v1192_v29, %v1191_v13  ;;  %v693_v46 = vsel %vm4262_vm4, %v688_v30, %v692_v4  ;;  %v698_v48 = vrot.slane %v697_v25, 4  ;;  %v734_v49 = vrot.slane %v732_v31, 5 }
  0xb0   : > { %v1189_v56 = vunpack.c.l.b16 %v693_v46  ;;  %v740_v60 = vrot.slane %v738_v38, 5  ;;  %v744_v63 = vrot.slane %v742_v39, 4  ;;  %v750_v0 = vrot.slane %v748_v40, 5  ;;  %v433_v46 = vld [vmem:[#allocation2 + $0x100] sm:$0x3] }
  0xb1   : > { %6912 = vst [vmem:[#allocation11_spill] sm:$0xff] %v4682_v45  ;;  %1239 = vrot.lane.b32.xlu2 %v4682_v45, %s4165_s26  ;;  %v703_v14 = vsel %vm4262_vm4, %v698_v48, %v702_v18  ;;  %v735_v16 = vor.u32 %v734_v49, %v731_v33  ;;  %v4690_v13 = vpack.c.bf16 %v434_v37, %v434_v37 }
  0xb2   : > { %v4692_v20 = vpack.c.bf16 %v435_v34, %v435_v34  ;;  %v1190_v4 = vunpack.c.l.b16 %v703_v14  ;;  %v745_v24 = vor.u32 %v744_v63, %v740_v60  ;;  %v4694_v29 = vpack.c.bf16 %v436_v52, %v436_v52  ;;  %v432_v34 = vld [vmem:[#allocation2 + $0xf8] sm:$0xff]  ;;  %v437_v63 = vld [vmem:[#allocation2 + $0x120] sm:$0xff] }
  0xb3   : > { %v4696_v30 = vpack.c.bf16 %v431_v54, %v431_v54  ;;  %v736_v25 = vrot.slane %v735_v16, 4  ;;  %v777_v31 = vshrl.u32 %v4690_v13, 16  ;;  %v780_v38 = vshll.u32 %v4690_v13, 16 }
  0xb4   : > { %v786_v39 = vshll.u32 %v4692_v20, 16  ;;  %v4701_v40 = vpack.c.b16 %v1190_v4, %v1189_v56  ;;  %v746_v18 = vrot.slane %v745_v24, 4  ;;  %v790_v33 = vshrl.u32 %v4692_v20, 16 }
  0xb5   : > { %v796_v37 = vshll.u32 %v4694_v29, 16  ;;  %v741_v48 = vsel %vm4262_vm4, %v736_v25, %v740_v60  ;;  %v779_v49 = vrot.slane %v777_v31, 4  ;;  %v782_v52 = vrot.slane %v780_v38, 5  ;;  %v438_v38 = vld [vmem:[#allocation2 + $0x128] sm:$0xff] }
  0xb6   : > { %6913 = vst [vmem:[#allocation12_spill] sm:$0xff] %v4701_v40  ;;  %v788_v54 = vrot.slane %v786_v39, 5  ;;  %1237 = vrot.lane.b32.xlu1 %v4701_v40, %s4165_s26  ;;  %v751_v56 = vsel %vm4262_vm4, %v746_v18, %v750_v0  ;;  %v1193_v14 = vunpack.c.l.b16 %v741_v48  ;;  %v792_v16 = vrot.slane %v790_v33, 4 }
  0xb7   : > { %v798_v4 = vrot.slane %v796_v37, 5  ;;  %v1194_v24 = vunpack.c.l.b16 %v751_v56  ;;  %v783_v45 = vor.u32 %v782_v52, %v779_v49  ;;  %v4711_v42 = vpack.c.bf16 %v432_v34, %v432_v34  ;;  %v439_v49 = vld [vmem:[#allocation2 + $0x130] sm:$0x3] }
  0xb8   : > { %v4713_v28 = vpack.c.bf16 %v433_v46, %v433_v46  ;;  %v793_v60 = vor.u32 %v792_v16, %v788_v54  ;;  %v753_v25 = vshrl.u32 %v4696_v30, 16  ;;  %v756_v31 = vshll.u32 %v4696_v30, 16 }
  0xb9   : > { %v4717_v39 = vpack.c.bf16 %v437_v63, %v437_v63  ;;  %v4719_v40 = vpack.c.b16 %v1194_v24, %v1193_v14  ;;  %v784_v0 = vrot.slane %v783_v45, 4  ;;  %v762_v18 = vshll.u32 %v4711_v42, 16 }
  0xba   : > { %v766_v33 = vshrl.u32 %v4711_v42, 16  ;;  %v794_v37 = vrot.slane %v793_v60, 4  ;;  %v755_v34 = vrot.slane %v753_v25, 4  ;;  %v758_v48 = vrot.slane %v756_v31, 5 }
  0xbb   : > { %6914 = vst [vmem:[#allocation13_spill] sm:$0xff] %v4719_v40  ;;  %v772_v46 = vshll.u32 %v4713_v28, 16  ;;  %1241 = vrot.lane.b32.xlu0 %v4719_v40, %s4165_s26  ;;  %v789_v52 = vsel %vm4262_vm4, %v784_v0, %v788_v54  ;;  %v764_v63 = vrot.slane %v762_v18, 5  ;;  %v4728_v14 = vpack.c.bf16 %v438_v38, %v438_v38  ;;  %v443_v0 = vld [vmem:[#allocation2 + $0x150] sm:$0xff] }
  0xbc   : > { %v768_v56 = vrot.slane %v766_v33, 4  ;;  %v799_v45 = vsel %vm4262_vm4, %v794_v37, %v798_v4  ;;  %v1197_v16 = vunpack.c.l.b16 %v789_v52  ;;  %v759_v24 = vor.u32 %v758_v48, %v755_v34  ;;  %v444_v34 = vld [vmem:[#allocation2 + $0x158] sm:$0xff] }
  0xbd   : > { %6915 = vst [vmem:[#allocation14_spill] sm:$0xff] %v4728_v14  ;;  %v774_v60 = vrot.slane %v772_v46, 5  ;;  %v1198_v25 = vunpack.c.l.b16 %v799_v45  ;;  %v4732_v57 = vpack.c.bf16 %v439_v49, %v439_v49  ;;  %v801_v61 = vshrl.u32 %v4717_v39, 16  ;;  %v440_v45 = vld [vmem:[#allocation2 + $0x138] sm:$0xff] }
  0xbe   : > { %v769_v31 = vor.u32 %v768_v56, %v764_v63  ;;  %v760_v40 = vrot.slane %v759_v24, 4  ;;  %v804_v11 = vshll.u32 %v4717_v39, 16  ;;  %v810_v54 = vshll.u32 %v4728_v14, 16  ;;  %v445_v56 = vld [vmem:[#allocation2 + $0x160] sm:$0x3] }
  0xbf   : > { %6916 = vst [vmem:[#allocation15_spill] sm:$0xff] %v4732_v57  ;;  %v814_v38 = vshrl.u32 %v4728_v14, 16  ;;  %v4738_v18 = vpack.c.b16 %v1198_v25, %v1197_v16  ;;  %v803_v33 = vrot.slane %v801_v61, 4  ;;  %v820_v37 = vshll.u32 %v4732_v57, 16 }
  0xc0   : > { %v770_v4 = vrot.slane %v769_v31, 4  ;;  %v765_v48 = vsel %vm4262_vm4, %v760_v40, %v764_v63  ;;  %v806_v46 = vrot.slane %v804_v11, 5  ;;  %v812_v49 = vrot.slane %v810_v54, 5  ;;  %v441_v54 = vld [vmem:[#allocation2 + $0x140] sm:$0xff] }
  0xc1   : > { %6917 = vst [vmem:[#allocation16_spill] sm:$0xff] %v4738_v18  ;;  %v816_v52 = vrot.slane %v814_v38, 4  ;;  %1245 = vrot.lane.b32.xlu2 %v4738_v18, %s4165_s26  ;;  %v1195_v24 = vunpack.c.l.b16 %v765_v48  ;;  %v822_v25 = vrot.slane %v820_v37, 5  ;;  %v4747_v61 = vpack.c.bf16 %v443_v0, %v443_v0 }
  0xc2   : > { %v775_v16 = vsel %vm4262_vm4, %v770_v4, %v774_v60  ;;  %v807_v50 = vor.u32 %v806_v46, %v803_v33  ;;  %v4749_v14 = vpack.c.bf16 %v444_v34, %v444_v34  ;;  %v4751_v11 = vpack.c.bf16 %v445_v56, %v445_v56  ;;  %v442_v46 = vld [vmem:[#allocation2 + $0x148] sm:$0x3] }
  0xc3   : > { %6918 = vst [vmem:[#allocation17_spill] sm:$0xff] %v4747_v61  ;;  %v1196_v31 = vunpack.c.l.b16 %v775_v16  ;;  %v817_v57 = vor.u32 %v816_v52, %v812_v49  ;;  %v849_v40 = vshrl.u32 %v4747_v61, 16  ;;  %v852_v63 = vshll.u32 %v4747_v61, 16  ;;  %v446_v61 = vld [vmem:[#allocation2 + $0x168] sm:$0xff] }
  0xc4   : > { %6919 = vst [vmem:[#allocation18_spill] sm:$0xff] %v4749_v14  ;;  %v4755_v38 = vpack.c.bf16 %v440_v45, %v440_v45  ;;  %v808_v60 = vrot.slane %v807_v50, 4  ;;  %v858_v0 = vshll.u32 %v4749_v14, 16  ;;  %v862_v34 = vshrl.u32 %v4749_v14, 16 }
  0xc5   : > { %6920 = vst [vmem:[#allocation19_spill] sm:$0xff] %v4751_v11  ;;  %v4757_v18 = vpack.c.b16 %v1196_v31, %v1195_v24  ;;  %v818_v4 = vrot.slane %v817_v57, 4  ;;  %v851_v37 = vrot.slane %v849_v40, 4  ;;  %v854_v33 = vrot.slane %v852_v63, 5 }
  0xc6   : > { %6921 = vst [vmem:[#allocation20_spill] sm:$0xff] %v4755_v38  ;;  %v868_v48 = vshll.u32 %v4751_v11, 16  ;;  %v813_v52 = vsel %vm4262_vm4, %v808_v60, %v812_v49  ;;  %v860_v50 = vrot.slane %v858_v0, 5  ;;  %v4768_v57 = vpack.c.bf16 %v441_v54, %v441_v54  ;;  %v447_v54 = vld [vmem:[#allocation2 + $0x170] sm:$0xff] }
  0xc7   : > { %6922 = vst [vmem:[#allocation21_spill] sm:$0xff] %v4757_v18  ;;  %1243 = vrot.lane.b32.xlu1 %v4757_v18, %s4165_s26  ;;  %v823_v56 = vsel %vm4262_vm4, %v818_v4, %v822_v25  ;;  %v1199_v45 = vunpack.c.l.b16 %v813_v52  ;;  %v855_v24 = vor.u32 %v854_v33, %v851_v37  ;;  %v864_v31 = vrot.slane %v862_v34, 4  ;;  %v448_v34 = vld [vmem:[#allocation2 + $0x178] sm:$0x3] }
  0xc8   : > { %6923 = vst [vmem:[#allocation22_spill] sm:$0xff] %v4768_v57  ;;  %v1200_v16 = vunpack.c.l.b16 %v823_v56  ;;  %v870_v40 = vrot.slane %v868_v48, 5  ;;  %v4770_v63 = vpack.c.bf16 %v442_v46, %v442_v46  ;;  %v825_v11 = vshrl.u32 %v4755_v38, 16 }
  0xc9   : > { %v828_v18 = vshll.u32 %v4755_v38, 16  ;;  %v856_v49 = vrot.slane %v855_v24, 4  ;;  %v865_v60 = vor.u32 %v864_v31, %v860_v50  ;;  %v834_v25 = vshll.u32 %v4768_v57, 16 }
  0xca   : > { %6924 = vst [vmem:[#allocation23_spill] sm:$0xff] %v4770_v63  ;;  %v4774_v14 = vpack.c.b16 %v1200_v16, %v1199_v45  ;;  %v827_v4 = vrot.slane %v825_v11, 4  ;;  %v838_v37 = vshrl.u32 %v4768_v57, 16  ;;  %v844_v33 = vshll.u32 %v4770_v63, 16 }
  0xcb   : > { %v830_v0 = vrot.slane %v828_v18, 5  ;;  %v861_v48 = vsel %vm4262_vm4, %v856_v49, %v860_v50  ;;  %v866_v46 = vrot.slane %v865_v60, 4  ;;  %v836_v52 = vrot.slane %v834_v25, 5 }
  0xcc   : > { %6925 = vst [vmem:[#allocation24_spill] sm:$0xff] %v4774_v14  ;;  %1247 = vrot.lane.b32.xlu0 %v4774_v14, %s4165_s26  ;;  %v4783_v56 = vpack.c.bf16 %v446_v61, %v446_v61  ;;  %v1203_v45 = vunpack.c.l.b16 %v861_v48  ;;  %v840_v24 = vrot.slane %v838_v37, 4  ;;  %v846_v11 = vrot.slane %v844_v33, 5 }
  0xcd   : > { %v831_v16 = vor.u32 %v830_v0, %v827_v4  ;;  %v871_v18 = vsel %vm4262_vm4, %v866_v46, %v870_v40  ;;  %v4787_v31 = vpack.c.bf16 %v447_v54, %v447_v54  ;;  %v4789_v63 = vpack.c.bf16 %v448_v34, %v448_v34 }
  0xce   : > { %v873_v14 = vshrl.u32 %v4783_v56, 16  ;;  %v1204_v57 = vunpack.c.l.b16 %v871_v18  ;;  %v841_v50 = vor.u32 %v840_v24, %v836_v52  ;;  %v876_v49 = vshll.u32 %v4783_v56, 16 }
  0xcf   : > { %v832_v38 = vrot.slane %v831_v16, 4  ;;  %v882_v60 = vshll.u32 %v4787_v31, 16  ;;  %v886_v25 = vshrl.u32 %v4787_v31, 16  ;;  %v892_v4 = vshll.u32 %v4789_v63, 16 }
  0xd0   : > { %v875_v61 = vrot.slane %v873_v14, 4  ;;  %v4796_v0 = vpack.c.b16 %v1204_v57, %v1203_v45  ;;  %v842_v54 = vrot.slane %v841_v50, 4  ;;  %v878_v37 = vrot.slane %v876_v49, 5 }
  0xd1   : > { %v837_v40 = vsel %vm4262_vm4, %v832_v38, %v836_v52  ;;  %v884_v34 = vrot.slane %v882_v60, 5  ;;  %v888_v48 = vrot.slane %v886_v25, 4  ;;  %v894_v46 = vrot.slane %v892_v4, 5  ;;  %v6935_v17 = vld [vmem:[#allocation23_spill] sm:$0xff] }
  0xd2   : > { %6926 = vst [vmem:[#allocation25_spill] sm:$0xff] %v4796_v0  ;;  %v1201_v33 = vunpack.c.l.b16 %v837_v40  ;;  %1251 = vrot.lane.b32.xlu2 %v4796_v0, %s4165_s26  ;;  %v847_v14 = vsel %vm4262_vm4, %v842_v54, %v846_v11  ;;  %v879_v16 = vor.u32 %v878_v37, %v875_v61  ;;  %v4011_v38 = vrot.slane %v4237_v3, 9 }
  0xd3   : > { %v1202_v57 = vunpack.c.l.b16 %v847_v14  ;;  %v889_v45 = vor.u32 %v888_v48, %v884_v34  ;;  %v949_v52 = vrot.slane %v4241_v5, 5  ;;  %v952_v50 = vrot.slane %v4245_v6, 5 }
  0xd4   : > { %v880_v18 = vrot.slane %v879_v16, 4  ;;  %v4012_v49 = vrot.slane %v4521_v15, 9  ;;  %v956_v11 = vrot.slane %v4525_v21, 5  ;;  %v959_v16 = vrot.slane %v4528_v26, 5 }
  0xd5   : > { %v4813_v61 = vpack.c.b16 %v1202_v57, %v1201_v33  ;;  %v890_v60 = vrot.slane %v889_v45, 4  ;;  %v950_v25 = vsel %vm4804_vm7, %v4011_v38, %v949_v52  ;;  %v951_v4 = vrot.slane %v949_v52, 4 }
  0xd6   : > { %v885_v40 = vsel %vm4262_vm4, %v880_v18, %v884_v34  ;;  %v1255_v54 = vunpack.c.l.b16 %v950_v25  ;;  %v957_v37 = vsel %vm4804_vm7, %v4012_v49, %v956_v11  ;;  %v958_v48 = vrot.slane %v956_v11, 4 }
  0xd7   : > { %6929 = vst [vmem:[#allocation26_spill] sm:$0xff] %v4813_v61  ;;  %1249 = vrot.lane.b32.xlu1 %v4813_v61, %s4165_s26  ;;  %v895_v6 = vsel %vm4262_vm4, %v890_v60, %v894_v46  ;;  %v1205_v33 = vunpack.c.l.b16 %v885_v40  ;;  %v953_v14 = vsel %vm4804_vm7, %v951_v4, %v952_v50  ;;  %v1257_v34 = vunpack.c.l.b16 %v957_v37 }
  0xd8   : > { %v1206_v57 = vunpack.c.l.b16 %v895_v6  ;;  %v1256_v45 = vunpack.c.l.b16 %v953_v14  ;;  %v4013_v38 = vrot.slane %v4502_v51, 9  ;;  %v960_v52 = vsel %vm4804_vm7, %v958_v48, %v959_v16 }
  0xd9   : > { %v963_v18 = vrot.slane %v4508_v55, 5  ;;  %v966_v49 = vrot.slane %v4511_v58, 5  ;;  %v4014_v46 = vrot.slane %v4567_v10, 9  ;;  %v1258_v50 = vunpack.c.l.b16 %v960_v52 }
  0xda   : > { %v4834_v11 = vpack.c.b16 %v1206_v57, %v1205_v33  ;;  %v1287_v60 = vpack.c.b16 %v1256_v45, %v1255_v54  ;;  %v970_v26 = vrot.slane %v4583_v32, 5  ;;  %v973_v40 = vrot.slane %v4587_v35, 5 }
  0xdb   : > { %v964_v25 = vsel %vm4804_vm7, %v4013_v38, %v963_v18  ;;  %v965_v4 = vrot.slane %v963_v18, 4  ;;  %v4015_v37 = vrot.slane %v4490_v41, 9  ;;  %v4843_v58 = vpack.c.b16 %v1258_v50, %v1257_v34 }
  0xdc   : > { %6930 = vst [vmem:[#allocation27_spill] sm:$0xff] %v4834_v11  ;;  %1253 = vrot.lane.b32.xlu0 %v4834_v11, %s4165_s26  ;;  %v1259_v48 = vunpack.c.l.b16 %v964_v25  ;;  %v971_v54 = vsel %vm4804_vm7, %v4014_v46, %v970_v26  ;;  %v972_v6 = vrot.slane %v970_v26, 4  ;;  %v977_v16 = vrot.slane %v4494_v43, 5 }
  0xdd   : > { %v967_v33 = vsel %vm4804_vm7, %v965_v4, %v966_v49  ;;  %v1261_v14 = vunpack.c.l.b16 %v971_v54  ;;  %v980_v35 = vrot.slane %v4496_v44, 5  ;;  %1305 = vrot.lane.b32.xlu2 %v4843_v58, %s4166_s8  ;;  %v4016_v34 = vrot.slane %v4556_v1, 9 }
  0xde   : > { %v1260_v57 = vunpack.c.l.b16 %v967_v33  ;;  %v974_v45 = vsel %vm4804_vm7, %v972_v6, %v973_v40  ;;  %v984_v38 = vrot.slane %v4563_v8, 5  ;;  %v978_v18 = vsel %vm4804_vm7, %v4015_v37, %v977_v16 }
  0xdf   : > { %1303 = vrot.lane.b32.xlu1 %v1287_v60, %s4166_s8  ;;  %v1262_v52 = vunpack.c.l.b16 %v974_v45  ;;  %v979_v49 = vrot.slane %v977_v16, 4  ;;  %v987_v44 = vrot.slane %v4565_v9, 5  ;;  %v1263_v50 = vunpack.c.l.b16 %v978_v18 }
  0xe0   : > { %v4861_v46 = vpack.c.b16 %v1260_v57, %v1259_v48  ;;  %v985_v26 = vsel %vm4804_vm7, %v4016_v34, %v984_v38  ;;  %v986_v25 = vrot.slane %v984_v38, 4  ;;  %v4017_v54 = vrot.slane %v4598_v62, 9 }
  0xe1   : > { %v4865_v4 = vpack.c.b16 %v1262_v52, %v1261_v14  ;;  %v981_v40 = vsel %vm4804_vm7, %v979_v49, %v980_v35  ;;  %v1265_v60 = vunpack.c.l.b16 %v985_v26  ;;  %v991_v9 = vrot.slane %v4606_v12, 5 }
  0xe2   : > { %v1264_v6 = vunpack.c.l.b16 %v981_v40  ;;  %v988_v37 = vsel %vm4804_vm7, %v986_v25, %v987_v44  ;;  %v994_v48 = vrot.slane %v4611_v19, 5  ;;  %v4018_v16 = vrot.slane %v4639_v2, 9 }
  0xe3   : > { %v1266_v33 = vunpack.c.l.b16 %v988_v37  ;;  %v998_v14 = vrot.slane %v4654_v27, 5  ;;  %v1001_v57 = vrot.slane %v4656_v36, 5  ;;  %v992_v45 = vsel %vm4804_vm7, %v4017_v54, %v991_v9 }
  0xe4   : > { %1307 = vrot.lane.b32.xlu0 %v4861_v46, %s4166_s8  ;;  %v4879_v35 = vpack.c.b16 %v1264_v6, %v1263_v50  ;;  %v993_v34 = vrot.slane %v991_v9, 4  ;;  %v4019_v38 = vrot.slane %v4629_v47, 9  ;;  %v1267_v19 = vunpack.c.l.b16 %v992_v45 }
  0xe5   : > { %v4884_v52 = vpack.c.b16 %v1266_v33, %v1265_v60  ;;  %v999_v18 = vsel %vm4804_vm7, %v4018_v16, %v998_v14  ;;  %v1000_v49 = vrot.slane %v998_v14, 4  ;;  %v1005_v50 = vrot.slane %v4631_v53, 5 }
  0xe6   : > { %1311 = vrot.lane.b32.xlu2 %v4879_v35, %s4166_s8  ;;  %v995_v36 = vsel %vm4804_vm7, %v993_v34, %v994_v48  ;;  %v1269_v44 = vunpack.c.l.b16 %v999_v18  ;;  %v1008_v26 = vrot.slane %v4635_v59, 5  ;;  %v4020_v60 = vrot.slane %v4669_v7, 9 }
  0xe7   : > { %1309 = vrot.lane.b32.xlu1 %v4865_v4, %s4166_s8  ;;  %v1268_v25 = vunpack.c.l.b16 %v995_v36  ;;  %v1002_v40 = vsel %vm4804_vm7, %v1000_v49, %v1001_v57  ;;  %v1012_v54 = vrot.slane %v4673_v22, 5  ;;  %v1006_v37 = vsel %vm4804_vm7, %v4019_v38, %v1005_v50 }
  0xe8   : > { %v1270_v6 = vunpack.c.l.b16 %v1002_v40  ;;  %v1007_v9 = vrot.slane %v1005_v50, 4  ;;  %v1015_v48 = vrot.slane %v4675_v23, 5  ;;  %v1271_v59 = vunpack.c.l.b16 %v1006_v37 }
  0xe9   : > { %v4903_v33 = vpack.c.b16 %v1268_v25, %v1267_v19  ;;  %v1014_v16 = vrot.slane %v1012_v54, 4  ;;  %v1013_v45 = vsel %vm4804_vm7, %v4020_v60, %v1012_v54  ;;  %v4021_v34 = vrot.slane %v4696_v30, 9 }
  0xea   : > { %v4905_v14 = vpack.c.b16 %v1270_v6, %v1269_v44  ;;  %v1009_v57 = vsel %vm4804_vm7, %v1007_v9, %v1008_v26  ;;  %v1019_v23 = vrot.slane %v4711_v42, 5  ;;  %v1022_v19 = vrot.slane %v4713_v28, 5  ;;  %v6931_v9 = vld [vmem:[#allocation14_spill] sm:$0xff] }
  0xeb   : > { %v1272_v18 = vunpack.c.l.b16 %v1009_v57  ;;  %v1016_v38 = vsel %vm4804_vm7, %v1014_v16, %v1015_v48  ;;  %v4022_v49 = vrot.slane %v4690_v13, 9  ;;  %v1026_v36 = vrot.slane %v4692_v20, 5  ;;  %v6932_v16 = vld [vmem:[#allocation15_spill] sm:$0xff] }
  0xec   : > { %1313 = vrot.lane.b32.xlu0 %v4884_v52, %s4166_s8  ;;  %v1029_v44 = vrot.slane %v4694_v29, 5  ;;  %v1273_v50 = vunpack.c.l.b16 %v1013_v45  ;;  %v1274_v26 = vunpack.c.l.b16 %v1016_v38  ;;  %v1020_v25 = vsel %vm4804_vm7, %v4021_v34, %v1019_v23  ;;  %v6933_v34 = vld [vmem:[#allocation20_spill] sm:$0xff]  ;;  %v6934_v38 = vld [vmem:[#allocation22_spill] sm:$0xff] }
  0xed   : > { %v1021_v40 = vrot.slane %v1019_v23, 4  ;;  %v4925_v60 = vpack.c.b16 %v1272_v18, %v1271_v59  ;;  %v1275_v28 = vunpack.c.l.b16 %v1020_v25  ;;  %v1028_v54 = vrot.slane %v1026_v36, 4 }
  0xee   : > { %1317 = vrot.lane.b32.xlu2 %v4905_v14, %s4166_s8  ;;  %v4023_v6 = vrot.slane %v4717_v39, 9  ;;  %v1027_v37 = vsel %vm4804_vm7, %v4022_v49, %v1026_v36  ;;  %v1033_v48 = vrot.slane %v6931_v9, 5  ;;  %v1036_v57 = vrot.slane %v6932_v16, 5  ;;  %v6939_v16 = vld [vmem:[#allocation19_spill] sm:$0xff] }
  0xef   : > { %1315 = vrot.lane.b32.xlu1 %v4903_v33, %s4166_s8  ;;  %v1023_v29 = vsel %vm4804_vm7, %v1021_v40, %v1022_v19  ;;  %v1030_v59 = vsel %vm4804_vm7, %v1028_v54, %v1029_v44  ;;  %v4024_v18 = vrot.slane %v6933_v34, 9  ;;  %v1040_v23 = vrot.slane %v6934_v38, 5 }
  0xf0   : > { %v1276_v45 = vunpack.c.l.b16 %v1023_v29  ;;  %v1035_v25 = vrot.slane %v1033_v48, 4  ;;  %v1043_v11 = vrot.slane %v6935_v17, 5  ;;  %v4943_v40 = vpack.c.b16 %v1274_v26, %v1273_v50  ;;  %v6938_v26 = vld [vmem:[#allocation17_spill] sm:$0xff] }
  0xf1   : > { %v1042_v19 = vrot.slane %v1040_v23, 4  ;;  %v1277_v49 = vunpack.c.l.b16 %v1027_v37  ;;  %v1278_v36 = vunpack.c.l.b16 %v1030_v59  ;;  %v1041_v29 = vsel %vm4804_vm7, %v4024_v18, %v1040_v23 }
  0xf2   : > { %v4941_v0 = vpack.c.b16 %v1276_v45, %v1275_v28  ;;  %v1034_v44 = vsel %vm4804_vm7, %v4023_v6, %v1033_v48  ;;  %v1037_v54 = vsel %vm4804_vm7, %v1035_v25, %v1036_v57  ;;  %v6937_v28 = vld [vmem:[#allocation18_spill] sm:$0xff]  ;;  %v4025_v37 = vrot.slane %v6938_v26, 9 }
  0xf3   : > { %v1044_v17 = vsel %vm4804_vm7, %v1042_v19, %v1043_v11  ;;  %v1047_v50 = vrot.slane %v6937_v28, 5  ;;  %v1050_v45 = vrot.slane %v6939_v16, 5  ;;  %v1054_v59 = vrot.slane %v4787_v31, 5 }
  0xf4   : > { %6936 = vst [vmem:[#allocation14_spill] sm:$0xff] %v4941_v0  ;;  %1319 = vrot.lane.b32.xlu0 %v4925_v60, %s4166_s8  ;;  %v1281_v18 = vunpack.c.l.b16 %v1041_v29  ;;  %v1282_v23 = vunpack.c.l.b16 %v1044_v17  ;;  %v1279_v48 = vunpack.c.l.b16 %v1034_v44  ;;  %v1280_v57 = vunpack.c.l.b16 %v1037_v54 }
  0xf5   : > { %v1049_v6 = vrot.slane %v1047_v50, 4  ;;  %v4963_v11 = vpack.c.b16 %v1278_v36, %v1277_v49  ;;  %v4026_v25 = vrot.slane %v4783_v56, 9  ;;  %v1056_v19 = vrot.slane %v1054_v59, 4 }
  0xf6   : > { %1323 = vrot.lane.b32.xlu2 %v4941_v0, %s4166_s8  ;;  %v1057_v16 = vrot.slane %v4789_v63, 5  ;;  %v1048_v61 = vsel %vm4804_vm7, %v4025_v37, %v1047_v50  ;;  %v4971_v17 = vpack.c.b16 %v1282_v23, %v1281_v18  ;;  %v4973_v0 = vpack.c.b16 %v1280_v57, %v1279_v48  ;;  %v366_v23 = vld [vmem:[%s4459_s30 + $0xf0] sm:$0xff] }
  0xf7   : > { %1321 = vrot.lane.b32.xlu1 %v4943_v40, %s4166_s8  ;;  %v1051_v29 = vsel %vm4804_vm7, %v1049_v6, %v1050_v45  ;;  %v1283_v49 = vunpack.c.l.b16 %v1048_v61  ;;  %v1055_v63 = vsel %vm4804_vm7, %v4026_v25, %v1054_v59  ;;  %v1129_v54 = vunpack.c.l.b16 %v4521_v15  ;;  %v367_v6 = vld [vmem:[%s4459_s30 + $0xf8] sm:$0xff]  ;;  %399 = vst.msk [vmem:[#allocation2 + $0x181] sm:$0xff] %vm280_vm0, %v366_v23  ;;  %v5005_v25 = vpop.permute.xlu2 %1231 }
  0xf8   : > { %v1284_v36 = vunpack.c.l.b16 %v1051_v29  ;;  %v1058_v44 = vsel %vm4804_vm7, %v1056_v19, %v1057_v16  ;;  %v1130_v50 = vunpack.c.l.b16 %v4525_v21  ;;  %v1285_v37 = vunpack.c.l.b16 %v1055_v63  ;;  %400 = vst.msk [vmem:[#allocation2 + $0x189] sm:$0xff] %vm280_vm0, %v367_v6 }
  0xf9   : > { %v1286_v45 = vunpack.c.l.b16 %v1058_v44  ;;  %v1131_v15 = vunpack.c.l.b16 %v4502_v51  ;;  %v1132_v21 = vunpack.c.l.b16 %v4508_v55  ;;  %v1135_v48 = vunpack.c.l.b16 %v4490_v41 }
  0xfa   : > { %v4987_v61 = vpack.c.b16 %v1284_v36, %v1283_v49  ;;  %v4989_v18 = vpack.c.b16 %v1130_v50, %v1129_v54  ;;  %v1136_v57 = vunpack.c.l.b16 %v4494_v43  ;;  %v1153_v19 = vunpack.c.l.b16 %v6933_v34 }
  0xfb   : > { %v4991_v59 = vpack.c.b16 %v1286_v45, %v1285_v37  ;;  %v1154_v51 = vunpack.c.l.b16 %v6934_v38  ;;  %v1133_v55 = vunpack.c.l.b16 %v4567_v10  ;;  %v1134_v16 = vunpack.c.l.b16 %v4583_v32 }
  0xfc   : > { %1325 = vrot.lane.b32.xlu0 %v4963_v11, %s4166_s8  ;;  %v5013_v29 = vpack.c.b16 %v1132_v21, %v1131_v15  ;;  %v5017_v41 = vpack.c.b16 %v1136_v57, %v1135_v48  ;;  %v1137_v34 = vunpack.c.l.b16 %v4556_v1  ;;  %v1138_v38 = vunpack.c.l.b16 %v4563_v8  ;;  %v5069_v15 = vpop.permute.xlu0 %1223 }
  0xfd   : > { %v5015_v49 = vpack.c.b16 %v1154_v51, %v1153_v19  ;;  %v5019_v43 = vpack.c.b16 %v1134_v16, %v1133_v55  ;;  %v1157_v36 = vunpack.c.l.b16 %v4783_v56  ;;  %v1158_v10 = vunpack.c.l.b16 %v4787_v31 }
  0xfe   : > { %1329 = vrot.lane.b32.xlu2 %v4971_v17, %s4166_s8  ;;  %v1141_v32 = vunpack.c.l.b16 %v4639_v2  ;;  %v1142_v63 = vunpack.c.l.b16 %v4654_v27  ;;  %v1139_v1 = vunpack.c.l.b16 %v4598_v62  ;;  %v1140_v8 = vunpack.c.l.b16 %v4606_v12  ;;  %v449_v21 = vld [vmem:[#allocation2 + $0x180] sm:$0xff] }
  0xff   : > { %1327 = vrot.lane.b32.xlu1 %v4973_v0, %s4166_s8  ;;  %v5031_v44 = vpack.c.b16 %v1158_v10, %v1157_v36  ;;  %v5037_v54 = vpack.c.b16 %v1138_v38, %v1137_v34  ;;  %v5039_v56 = vpop.permute.xlu2 %1233  ;;  %v1143_v2 = vunpack.c.l.b16 %v4629_v47  ;;  %v1144_v27 = vunpack.c.l.b16 %v4631_v53  ;;  %v450_v48 = vld [vmem:[#allocation2 + $0x188] sm:$0xff] }
 0x100   : > { %v5041_v31 = vpack.c.b16 %v1142_v63, %v1141_v32  ;;  %v5043_v50 = vpack.c.b16 %v1140_v8, %v1139_v1  ;;  %v1147_v62 = vunpack.c.l.b16 %v4696_v30  ;;  %v1148_v12 = vunpack.c.l.b16 %v4711_v42  ;;  %v6943_v63 = vld [vmem:[#allocation7_spill] sm:$0xff] }
 0x101   : > { %v1145_v37 = vunpack.c.l.b16 %v4669_v7  ;;  %v1146_v45 = vunpack.c.l.b16 %v4673_v22  ;;  %v5057_v23 = vpack.c.b16 %v1144_v27, %v1143_v2  ;;  %v1149_v42 = vunpack.c.l.b16 %v4690_v13  ;;  %v6945_v27 = vld [vmem:[#allocation6_spill] sm:$0xff] }
 0x102   : > { %v5059_v6 = vpack.c.b16 %v1148_v12, %v1147_v62  ;;  %v1150_v30 = vunpack.c.l.b16 %v4692_v20  ;;  %v1151_v7 = vunpack.c.l.b16 %v4717_v39  ;;  %v1152_v22 = vunpack.c.l.b16 %v6931_v9 }
 0x103   : > { %v5063_v53 = vpack.c.b16 %v1146_v45, %v1145_v37  ;;  %v5081_v13 = vpack.c.bf16 %v449_v21, %v449_v21  ;;  %v5083_v20 = vpack.c.bf16 %v450_v48, %v450_v48  ;;  %v1155_v39 = vunpack.c.l.b16 %v6938_v26  ;;  %v6948_v37 = vld [vmem:[#allocation9_spill] sm:$0xff] }
 0x104   : > { %1331 = vrot.lane.b32.xlu0 %v4987_v61, %s4166_s8  ;;  %6940 = vst [vmem:[#allocation15_spill] sm:$0xff] %v5059_v6  ;;  %v5077_v57 = vpack.c.b16 %v1150_v30, %v1149_v42  ;;  %v5085_v51 = vpack.c.b16 %v1152_v22, %v1151_v7  ;;  %v1156_v9 = vunpack.c.l.b16 %v6937_v28  ;;  %v6953_v21 = vld [vmem:[#allocation5_spill] sm:$0xff] }
 0x105   : > { %v1335_v34 = vunpack.c.l.b16 %v5081_v13  ;;  %v1336_v38 = vunpack.c.l.b16 %v5083_v20 }
 0x106   : > { %1338 = vrot.lane.b32.xlu2 %v4989_v18, %s4167_s9  ;;  %v5079_v19 = vpop.permute.xlu1 %1227  ;;  %v5101_v36 = vpack.c.b16 %v1156_v9, %v1155_v39 }
 0x107   : > { %1333 = vrot.lane.b32.xlu1 %v4991_v59, %s4166_s8  ;;  %v5103_v10 = vpack.c.b16 %v1336_v38, %v1335_v34  ;;  %v6955_v38 = vld [vmem:[#allocation8_spill] sm:$0xff] }
 0x10b   : > { %v5061_v47 = vpop.permute.xlu2 %1239 }
 0x10c   : > { %1340 = vrot.lane.b32.xlu0 %v5013_v29, %s4167_s9 }
 0x10d   : > { %v5095_v16 = vpop.permute.xlu0 %1225 }
 0x10e   : > { %1344 = vrot.lane.b32.xlu2 %v5017_v41, %s4167_s9 }
 0x10f   : > { %1342 = vrot.lane.b32.xlu1 %v5019_v43, %s4167_s9 }
 0x114   : > { %1346 = vrot.lane.b32.xlu0 %v5037_v54, %s4167_s9 }
 0x116   : > { %1350 = vrot.lane.b32.xlu2 %v5041_v31, %s4167_s9 }
 0x117   : > { %1348 = vrot.lane.b32.xlu1 %v5043_v50, %s4167_s9  ;;  %v5105_v32 = vpop.permute.xlu1 %1229 }
 0x11b   : > { %v5089_v55 = vpop.permute.xlu2 %1245 }
 0x11c   : > { %1352 = vrot.lane.b32.xlu0 %v5057_v23, %s4167_s9  ;;  %6941 = vst [vmem:[#allocation20_spill] sm:$0xff] %v5089_v55  ;;  %v5115_v26 = vpop.permute.xlu0 %1235  ;;  %v6965_v55 = vld [vmem:[#allocation13_spill] sm:$0xff] }
 0x11e   : > { %1356 = vrot.lane.b32.xlu2 %v5059_v6, %s4167_s9 }
 0x11f   : > { %1354 = vrot.lane.b32.xlu1 %v5063_v53, %s4167_s9 }
 0x124   : > { %1358 = vrot.lane.b32.xlu0 %v5077_v57, %s4167_s9 }
 0x126   : > { %1362 = vrot.lane.b32.xlu2 %v5015_v49, %s4167_s9 }
 0x127   : > { %1360 = vrot.lane.b32.xlu1 %v5085_v51, %s4167_s9 }
 0x128   : > { %v5119_v1 = vpop.permute.xlu1 %1237 }
 0x12c   : > { %1364 = vrot.lane.b32.xlu0 %v5101_v36, %s4167_s9  ;;  %v5111_v28 = vpop.permute.xlu2 %1251 }
 0x12d   : > { %6942 = vst [vmem:[#allocation22_spill] sm:$0xff] %v5111_v28  ;;  %v5127_v2 = vpop.permute.xlu0 %1241 }
 0x12e   : > { %1368 = vrot.lane.b32.xlu2 %v5103_v10, %s4167_s9  ;;  %6944 = vst [vmem:[#allocation23_spill] sm:$0xff] %v5127_v2 }
 0x12f   : > { %1366 = vrot.lane.b32.xlu1 %v5031_v44, %s4167_s9 }
 0x134   : > { %1373 = vrot.lane.b32.xlu0 %v6943_v63, %s4168_s10 }
 0x136   : > { %1443 = vrot.lane.b32.xlu2 %v5013_v29, %s4169_s11 }
 0x137   : > { %1408 = vrot.lane.b32.xlu1 %v4843_v58, %s4170_s12  ;;  %v5125_v8 = vpop.permute.xlu2 %1305 }
 0x139   : > { %v5135_v62 = vpop.permute.xlu1 %1243 }
 0x13a   : > { %6946 = vst [vmem:[#allocation18_spill] sm:$0xff] %v5135_v62 }
 0x13c   : > { %1478 = vrot.lane.b32.xlu0 %v6945_v27, %s4171_s13 }
 0x13e   : > { %1375 = vrot.lane.b32.xlu2 %v6945_v27, %s4168_s10  ;;  %v5141_v58 = vpop.permute.xlu0 %1247 }
 0x13f   : > { %1513 = vrot.lane.b32.xlu1 %v4861_v46, %s4172_s14  ;;  %6947 = vst [vmem:[#allocation17_spill] sm:$0xff] %v5141_v58 }
 0x140   : > { %v5137_v12 = vpop.permute.xlu2 %1311 }
 0x144   : > { %1410 = vrot.lane.b32.xlu0 %v4861_v46, %s4170_s12 }
 0x146   : > { %1480 = vrot.lane.b32.xlu2 %v6948_v37, %s4171_s13 }
 0x147   : > { %1445 = vrot.lane.b32.xlu1 %v5019_v43, %s4169_s11 }
 0x148   : > { %v5147_v45 = vpop.permute.xlu2 %1317 }
 0x149   : > { %6949 = vst [vmem:[#allocation19_spill] sm:$0xff] %v5147_v45  ;;  %v5149_v42 = vpop.permute.xlu1 %1249 }
 0x14a   : > { %6950 = vst [vmem:[#allocation7_spill] sm:$0xff] %v5149_v42 }
 0x14c   : > { %1515 = vrot.lane.b32.xlu0 %v4865_v4, %s4172_s14 }
 0x14e   : > { %v5153_v30 = vpop.permute.xlu0 %1253  ;;  %1412 = vrot.lane.b32.xlu2 %v4865_v4, %s4170_s12 }
 0x14f   : > { %6951 = vst [vmem:[#allocation6_spill] sm:$0xff] %v5153_v30  ;;  %1377 = vrot.lane.b32.xlu1 %v6948_v37, %s4168_s10 }
 0x150   : > { %v5159_v46 = vpop.permute.xlu2 %1323 }
 0x151   : > { %6952 = vst [vmem:[#allocation9_spill] sm:$0xff] %v5159_v46  ;;  %v5161_v7 = vpop.permute.xlu1 %1303  ;;  %v4116_v46 = vld [vmem:[%s6835_s1 + $0x8] sm:$0xff] }
 0x154   : > { %1447 = vrot.lane.b32.xlu0 %v5017_v41, %s4169_s11 }
 0x156   : > { %v5165_v22 = vpop.permute.xlu0 %1307  ;;  %1517 = vrot.lane.b32.xlu2 %v4879_v35, %s4172_s14 }
 0x157   : > { %1482 = vrot.lane.b32.xlu1 %v6953_v21, %s4171_s13 }
 0x158   : > { %v5171_v48 = vpop.permute.xlu2 %1329 }
 0x159   : > { %6954 = vst [vmem:[#allocation5_spill] sm:$0xff] %v5171_v48  ;;  %v5173_v4 = vpop.permute.xlu1 %1309  ;;  %v6961_v48 = vld [vmem:[#allocation12_spill] sm:$0xff] }
 0x15c   : > { %1379 = vrot.lane.b32.xlu0 %v6953_v21, %s4168_s10  ;;  %v6958_v21 = vld [vmem:[#allocation10_spill] sm:$0xff] }
 0x15e   : > { %v5177_v39 = vpop.permute.xlu0 %1313  ;;  %1449 = vrot.lane.b32.xlu2 %v5037_v54, %s4169_s11 }
 0x15f   : > { %1414 = vrot.lane.b32.xlu1 %v4879_v35, %s4170_s12 }
 0x160   : > { %v5183_v9 = vpop.permute.xlu2 %1338 }
 0x161   : > { %v5185_v34 = vpop.permute.xlu1 %1315 }
 0x164   : > { %1484 = vrot.lane.b32.xlu0 %v6955_v38, %s4171_s13 }
 0x166   : > { %v5189_v63 = vpop.permute.xlu0 %1319  ;;  %1381 = vrot.lane.b32.xlu2 %v6955_v38, %s4168_s10 }
 0x167   : > { %1519 = vrot.lane.b32.xlu1 %v4884_v52, %s4172_s14 }
 0x168   : > { %v5195_v27 = vpop.permute.xlu2 %1344 }
 0x169   : > { %v5197_v37 = vpop.permute.xlu1 %1321 }
 0x16a   : > { %6956 = vst [vmem:[#allocation8_spill] sm:$0xff] %v5197_v37 }
 0x16c   : > { %1416 = vrot.lane.b32.xlu0 %v4884_v52, %s4170_s12 }
 0x16e   : > { %v5201_v35 = vpop.permute.xlu0 %1325  ;;  %1486 = vrot.lane.b32.xlu2 %v6958_v21, %s4171_s13 }
 0x16f   : > { %6957 = vst [vmem:[#allocation28_spill] sm:$0xff] %v5201_v35  ;;  %1451 = vrot.lane.b32.xlu1 %v5043_v50, %s4169_s11 }
 0x170   : > { %v5207_v30 = vpop.permute.xlu2 %1350 }
 0x171   : > { %v5209_v38 = vpop.permute.xlu1 %1327 }
 0x172   : > { %6959 = vst [vmem:[#allocation10_spill] sm:$0xff] %v5209_v38  ;;  %v1832_v38 = vld [vmem:[%s6835_s1 + $0x20] sm:$0xf] }
 0x174   : > { %1521 = vrot.lane.b32.xlu0 %v4903_v33, %s4172_s14 }
 0x176   : > { %v5213_v28 = vpop.permute.xlu0 %1331  ;;  %1385 = vrot.lane.b32.xlu2 %v6961_v48, %s4168_s10 }
 0x177   : > { %6960 = vst [vmem:[#allocation29_spill] sm:$0xff] %v5213_v28  ;;  %1383 = vrot.lane.b32.xlu1 %v6958_v21, %s4168_s10  ;;  %v1850_v28 = vunpack.c.l.b16 %v1832_v38 }
 0x178   : > { %v5219_v52 = vpop.permute.xlu2 %1356 }
 0x179   : > { %6962 = vst [vmem:[#allocation12_spill] sm:$0xff] %v5219_v52  ;;  %v5221_v42 = vpop.permute.xlu1 %1333  ;;  %v6970_v52 = vld [vmem:[#allocation21_spill] sm:$0xff] }
 0x17a   : > { %6963 = vst [vmem:[#allocation30_spill] sm:$0xff] %v5221_v42  ;;  %v1855_v42 = vpack.c.b16 %v1850_v28, %v1850_v28  ;;  %v6966_v28 = vld [vmem:[#allocation11_spill] sm:$0xff] }
 0x17c   : > { %1418 = vrot.lane.b32.xlu0 %v4903_v33, %s4170_s12  ;;  %v1895_v33 = vsel %vm1893_vm8, %v1855_v42, 0  ;;  %v4117_v42 = vld [vmem:[%s6835_s1 + $0x10] sm:$0xff] }
 0x17d   : > { %1900 = vmatpush.bf16.msra.mxu0 %v1895_v33  ;;  %4123 = vmatpush.bf16.msra.mxu2 %v1895_v33 }
 0x17e   : > { %v5228_v58 = vpop.permute.xlu0 %1340  ;;  %1488 = vrot.lane.b32.xlu2 %v6961_v48, %s4171_s13  ;;  %v4118_v48 = vld [vmem:[%s6835_s1 + $0x18] sm:$0xff] }
 0x17f   : > { %1453 = vrot.lane.b32.xlu1 %v5041_v31, %s4169_s11 }
 0x180   : > { %v5234_v21 = vpop.permute.xlu2 %1362 }
 0x181   : > { %6964 = vst [vmem:[#allocation31_spill] sm:$0xff] %v5234_v21  ;;  %v5236_v35 = vpop.permute.xlu1 %1342  ;;  %1901 = vmatpush.bf16.msra.mxu0 %v4118_v48  ;;  %4124 = vmatpush.bf16.msra.mxu2 %v4118_v48  ;;  %v4115_v48 = vld [vmem:[%s6835_s1] sm:$0xff] }
 0x184   : > { %1523 = vrot.lane.b32.xlu0 %v4905_v14, %s4172_s14 }
 0x185   : > { %1902 = vmatpush.bf16.msra.mxu0 %v4117_v42  ;;  %4125 = vmatpush.bf16.msra.mxu2 %v4117_v42 }
 0x186   : > { %v5244_v38 = vpop.permute.xlu0 %1346  ;;  %1389 = vrot.lane.b32.xlu2 %v6965_v55, %s4168_s10 }
 0x187   : > { %1387 = vrot.lane.b32.xlu1 %v6966_v28, %s4168_s10 }
 0x188   : > { %v5253_v33 = vpop.permute.xlu2 %1368 }
 0x189   : > { %6967 = vst [vmem:[#allocation13_spill] sm:$0xff] %v5253_v33  ;;  %v5255_v21 = vpop.permute.xlu1 %1348  ;;  %1903 = vmatpush.bf16.msra.mxu0 %v4116_v46  ;;  %4126 = vmatpush.bf16.msra.mxu2 %v4116_v46 }
 0x18c   : > { %1420 = vrot.lane.b32.xlu0 %v4905_v14, %s4170_s12 }
 0x18d   : > { %1904 = vmatpush.bf16.msra.mxu0 %v4115_v48  ;;  %4127 = vmatpush.bf16.msra.mxu2 %v4115_v48  ;;  %v1127_v48 = vunpack.c.l.b16 %v4237_v3 }
 0x18e   : > { %v5262_v62 = vpop.permute.xlu0 %1352  ;;  %1455 = vrot.lane.b32.xlu2 %v5057_v23, %s4169_s11 }
 0x18f   : > { %6968 = vst [vmem:[#allocation11_spill] sm:$0xff] %v5262_v62  ;;  %1424 = vrot.lane.b32.xlu1 %v4943_v40, %s4170_s12 }
 0x190   : > { %v1444_v33 = vpop.permute.xlu2 %1443 }
 0x191   : > { %v5271_v14 = vpop.permute.xlu1 %1354 }
 0x194   : > { %1459 = vrot.lane.b32.xlu0 %v5059_v6, %s4169_s11  ;;  %v6972_v6 = vld [vmem:[#allocation14_spill] sm:$0xff] }
 0x196   : > { %v5275_v42 = vpop.permute.xlu0 %1358  ;;  %1494 = vrot.lane.b32.xlu2 %v6970_v52, %s4171_s13 }
 0x197   : > { %6969 = vst [vmem:[#allocation32_spill] sm:$0xff] %v5275_v42  ;;  %1490 = vrot.lane.b32.xlu1 %v6966_v28, %s4171_s13  ;;  %v1128_v42 = vunpack.c.l.b16 %v4241_v5 }
 0x198   : > { %v1376_v37 = vpop.permute.xlu2 %1375 }
 0x199   : > { %v5281_v2 = vpop.permute.xlu1 %1360  ;;  %v1159_v45 = vpack.c.b16 %v1128_v42, %v1127_v48 }
 0x19a   : > { %6971 = vst [vmem:[#allocation21_spill] sm:$0xff] %v5281_v2 }
 0x19b   : > { %v1547_v3 = vsel %vm280_vm0, %v1159_v45, %v5069_v15  ;;  %v6974_v45 = vld [vmem:[#allocation16_spill] sm:$0xff] }
 0x19c   : > { %1525 = vrot.lane.b32.xlu0 %v4925_v60, %s4172_s14  ;;  %v1595_v5 = vsel %vm1593_vm10, %v1547_v3, %v5161_v7 }
 0x19e   : > { %v5285_v46 = vpop.permute.xlu0 %1364  ;;  %1391 = vrot.lane.b32.xlu2 %v6970_v52, %s4168_s10 }
 0x19f   : > { %1529 = vrot.lane.b32.xlu1 %v6972_v6, %s4172_s14 }
 0x1a0   : > { %v1481_v62 = vpop.permute.xlu2 %1480 }
 0x1a1   : > { %v5293_v28 = vpop.permute.xlu1 %1366 }
 0x1a2   : > { %6973 = vst [vmem:[#allocation14_spill] sm:$0xff] %v5293_v28 }
 0x1a4   : > { %1422 = vrot.lane.b32.xlu0 %v4925_v60, %s4170_s12  ;;  %v1628_v60 = vsel %vm1626_vm9, %v1595_v5, %v5183_v9 }
 0x1a6   : > { %v1374_v2 = vpop.permute.xlu0 %1373  ;;  %1457 = vrot.lane.b32.xlu2 %v5063_v53, %s4169_s11 }
 0x1a7   : > { %1426 = vrot.lane.b32.xlu1 %v6972_v6, %s4170_s12  ;;  %v1661_v48 = vsel %vm1659_vm12, %v1628_v60, %v1374_v2 }
 0x1a8   : > { %v1413_v52 = vpop.permute.xlu2 %1412 }
 0x1a9   : > { %v1409_v42 = vpop.permute.xlu1 %1408 }
 0x1aa   : > { %v1694_v28 = vsel %vm1692_vm11, %v1661_v48, %v1409_v42 }
 0x1ab   : > { %v1727_v6 = vsel %vm1725_vm13, %v1694_v28, %v1444_v33 }
 0x1ac   : > { %1461 = vrot.lane.b32.xlu0 %v5077_v57, %s4169_s11 }
 0x1ae   : > { %v1479_v15 = vpop.permute.xlu0 %1478  ;;  %1496 = vrot.lane.b32.xlu2 %v6974_v45, %s4171_s13 }
 0x1af   : > { %1492 = vrot.lane.b32.xlu1 %v6965_v55, %s4171_s13  ;;  %v1760_v2 = vsel %vm1758_vm14, %v1727_v6, %v1479_v15  ;;  %v1550_v55 = vsel %vm280_vm0, %v4989_v18, %v5095_v16  ;;  %v6975_v16 = vld [vmem:[#allocation24_spill] sm:$0xff] }
 0x1b0   : > { %v1518_v7 = vpop.permute.xlu2 %1517  ;;  %v1597_v28 = vsel %vm1593_vm10, %v1550_v55, %v5125_v8 }
 0x1b1   : > { %v1514_v9 = vpop.permute.xlu1 %1513  ;;  %v1630_v5 = vsel %vm1626_vm9, %v1597_v28, %v5228_v58 }
 0x1b2   : > { %v1793_v3 = vsel %vm1791_vm15, %v1760_v2, %v1514_v9 }
 0x1b3   : > { %4045 = vmatmul.msk.bf16.vlgmr.msra.gmra.mxu0 %vm1860_vm1, %v1793_v3 }
 0x1b4   : > { %1527 = vrot.lane.b32.xlu0 %v4943_v40, %s4172_s14  ;;  %v1663_v40 = vsel %vm1659_vm12, %v1630_v5, %v1376_v37  ;;  %v1556_v5 = vsel %vm280_vm0, %v5019_v43, %v5105_v32  ;;  %v451_v43 = vld [vmem:[#allocation2 + $0x190] sm:$0x3]  ;;  %v1060_v32 = vshrl.u32 %v5081_v13, 16 }
 0x1b6   : > { %v1411_v33 = vpop.permute.xlu0 %1410  ;;  %1393 = vrot.lane.b32.xlu2 %v6974_v45, %s4168_s10 }
 0x1b7   : > { %1531 = vrot.lane.b32.xlu1 %v4963_v11, %s4172_s14  ;;  %v1696_v48 = vsel %vm1692_vm11, %v1663_v40, %v1411_v33 }
 0x1b8   : > { %v1450_v42 = vpop.permute.xlu2 %1449 }
 0x1b9   : > { %v1446_v60 = vpop.permute.xlu1 %1445 }
 0x1ba   : > { %v1729_v6 = vsel %vm1725_vm13, %v1696_v48, %v1446_v60  ;;  %v1601_v60 = vsel %vm1593_vm10, %v1556_v5, %v5173_v4  ;;  %v1069_v4 = vshll.u32 %v5083_v20, 16 }
 0x1bb   : > { %v1762_v8 = vsel %vm1758_vm14, %v1729_v6, %v1481_v62  ;;  %v1634_v40 = vsel %vm1626_vm9, %v1601_v60, %v5195_v27  ;;  %v1088_v60 = vrot.slane %v5083_v20, 5 }
 0x1bc   : > { %1428 = vrot.lane.b32.xlu0 %v4963_v11, %s4170_s12  ;;  %v1553_v11 = vsel %vm280_vm0, %v5013_v29, %v5079_v19 }
 0x1bd   : > { %v1599_v45 = vsel %vm1593_vm10, %v1553_v11, %v5165_v22  ;;  %v1062_v11 = vrot.slane %v1060_v32, 4  ;;  %v4027_v32 = vrot.slane %v5081_v13, 9 }
 0x1be   : > { %v1516_v18 = vpop.permute.xlu0 %1515  ;;  %1498 = vrot.lane.b32.xlu2 %v6975_v16, %s4171_s13  ;;  %v1632_v62 = vsel %vm1626_vm9, %v1599_v45, %v5236_v35  ;;  %v6976_v35 = vld [vmem:[#allocation26_spill] sm:$0xff] }
 0x1bf   : > { %1463 = vrot.lane.b32.xlu1 %v5085_v51, %s4169_s11  ;;  %v1795_v37 = vsel %vm1791_vm15, %v1762_v8, %v1516_v18  ;;  %v1073_v8 = vshrl.u32 %v5083_v20, 16 }
 0x1c0   : > { %v5344_v15 = vpop.permute.xlu2 %1381 }
 0x1c1   : > { %v1378_v58 = vpop.permute.xlu1 %1377 }
 0x1c2   : > { %v1665_v9 = vsel %vm1659_vm12, %v1632_v62, %v1378_v58  ;;  %v1075_v62 = vrot.slane %v1073_v8, 4  ;;  %v454_v8 = vld [vmem:[#allocation2 + $0x1a8] sm:$0x3] }
 0x1c3   : > { %4046 = vmatmul.msk.bf16.gmra.mxu0 %vm1860_vm1, %v1795_v37  ;;  %v1698_v33 = vsel %vm1692_vm11, %v1665_v9, %v1413_v52  ;;  %v505_v37 = vpack.c.bf16 %v451_v43, %v451_v43  ;;  %v452_v9 = vld [vmem:[#allocation2 + $0x198] sm:$0xff] }
 0x1c4   : > { %1533 = vrot.lane.b32.xlu0 %v4973_v0, %s4172_s14 }
 0x1c6   : > { %v1448_v2 = vpop.permute.xlu0 %1447  ;;  %1430 = vrot.lane.b32.xlu2 %v4973_v0, %s4170_s12 }
 0x1c7   : > { %1395 = vrot.lane.b32.xlu1 %v6975_v16, %s4168_s10  ;;  %v1731_v29 = vsel %vm1725_vm13, %v1698_v33, %v1448_v2  ;;  %v6977_v16 = vld [vmem:[#allocation25_spill] sm:$0xff]  ;;  %v1071_v2 = vrot.slane %v1069_v4, 5  ;;  %v1091_v4 = vrot.slane %v505_v37, 5 }
 0x1c8   : > { %v5364_v19 = vpop.permute.xlu2 %1486 }
 0x1c9   : > { %v1483_v3 = vpop.permute.xlu1 %1482 }
 0x1ca   : > { %v1764_v0 = vsel %vm1758_vm14, %v1731_v29, %v1483_v3  ;;  %v453_v29 = vld [vmem:[#allocation2 + $0x1a0] sm:$0xff] }
 0x1cb   : > { %v1797_v28 = vsel %vm1791_vm15, %v1764_v0, %v1518_v7  ;;  %v5406_v0 = vpack.c.bf16 %v452_v9, %v452_v9  ;;  %v5410_v5 = vpack.c.bf16 %v453_v29, %v453_v29 }
 0x1cc   : > { %1465 = vrot.lane.b32.xlu0 %v5015_v49, %s4169_s11 }
 0x1cd   : > { %v1103_v43 = vshll.u32 %v5410_v5, 16 }
 0x1ce   : > { %v1380_v22 = vpop.permute.xlu0 %1379  ;;  %1535 = vrot.lane.b32.xlu2 %v4971_v17, %s4172_s14 }
 0x1cf   : > { %1500 = vrot.lane.b32.xlu1 %v6976_v35, %s4171_s13  ;;  %v1667_v6 = vsel %vm1659_vm12, %v1634_v40, %v1380_v22 }
 0x1d0   : > { %v5384_v7 = vpop.permute.xlu2 %1385 }
 0x1d1   : > { %v1415_v55 = vpop.permute.xlu1 %1414 }
 0x1d2   : > { %v1700_v18 = vsel %vm1692_vm11, %v1667_v6, %v1415_v55  ;;  %v1076_v55 = vor.u32 %v1075_v62, %v1071_v2  ;;  %v6978_v6 = vld [vmem:[#allocation27_spill] sm:$0xff] }
 0x1d3   : > { %4047 = vmatmul.msk.bf16.gmra.mxu0 %vm1860_vm1, %v1797_v28  ;;  %v1733_v58 = vsel %vm1725_vm13, %v1700_v18, %v1450_v42  ;;  %v1079_v28 = vshll.u32 %v505_v37, 16  ;;  %v1094_v18 = vshrl.u32 %v5406_v0, 16 }
 0x1d4   : > { %1397 = vrot.lane.b32.xlu0 %v6976_v35, %s4168_s10 }
 0x1d5   : > { %v1081_v20 = vrot.slane %v1079_v28, 5 }
 0x1d6   : > { %v1485_v52 = vpop.permute.xlu0 %1484  ;;  %1467 = vrot.lane.b32.xlu2 %v5101_v36, %s4169_s11 }
 0x1d7   : > { %1432 = vrot.lane.b32.xlu1 %v4971_v17, %s4170_s12  ;;  %v1063_v17 = vshll.u32 %v5081_v13, 16  ;;  %v1766_v3 = vsel %vm1758_vm14, %v1733_v58, %v1485_v52  ;;  %v1559_v52 = vsel %vm280_vm0, %v5017_v41, %v5005_v25  ;;  %v1077_v41 = vrot.slane %v1076_v55, 4 }
 0x1d8   : > { %v5402_v22 = vpop.permute.xlu2 %1488  ;;  %v1603_v40 = vsel %vm1593_vm10, %v1559_v52, %v5137_v12 }
 0x1d9   : > { %v1520_v48 = vpop.permute.xlu1 %1519  ;;  %v1065_v45 = vrot.slane %v1063_v17, 5  ;;  %v1090_v17 = vrot.slane %v1088_v60, 4  ;;  %v1082_v29 = vsel %vm4262_vm4, %v1077_v41, %v1081_v20 }
 0x1da   : > { %v1799_v42 = vsel %vm1791_vm15, %v1766_v3, %v1520_v48  ;;  %v1371_v52 = vunpack.c.l.b16 %v1082_v29 }
 0x1db   : > { %v1066_v35 = vor.u32 %v1065_v45, %v1062_v11  ;;  %v1096_v45 = vrot.slane %v1094_v18, 4 }
 0x1dc   : > { %1502 = vrot.lane.b32.xlu0 %v6977_v16, %s4171_s13 }
 0x1dd   : > { %v1067_v25 = vrot.slane %v1066_v35, 4  ;;  %v1105_v35 = vrot.slane %v1103_v43, 5  ;;  %v1562_v43 = vsel %vm280_vm0, %v5037_v54, %v5039_v56  ;;  %v1441_v54 = vunpack.c.l.b16 %v5410_v5 }
 0x1de   : > { %v1417_v27 = vpop.permute.xlu0 %1416  ;;  %1399 = vrot.lane.b32.xlu2 %v6977_v16, %s4168_s10  ;;  %v1097_v16 = vshll.u32 %v5406_v0, 16 }
 0x1df   : > { %1537 = vrot.lane.b32.xlu1 %v4987_v61, %s4172_s14  ;;  %v1072_v37 = vsel %vm4262_vm4, %v1067_v25, %v1071_v2 }
 0x1e0   : > { %v1099_v62 = vrot.slane %v1097_v16, 5  ;;  %v5433_v3 = vpop.permute.xlu2 %1389  ;;  %v1370_v28 = vunpack.c.l.b16 %v1072_v37 }
 0x1e1   : > { %v1452_v33 = vpop.permute.xlu1 %1451 }
 0x1e2   : > { %v1372_v20 = vpack.c.b16 %v1371_v52, %v1370_v28 }
 0x1e3   : > { %4048 = vmatmul.msk.bf16.gmra.mxu0 %vm1860_vm1, %v1799_v42  ;;  %v508_v42 = vpack.c.bf16 %v454_v8, %v454_v8 }
 0x1e4   : > { %1434 = vrot.lane.b32.xlu0 %v4987_v61, %s4170_s12  ;;  %v1636_v61 = vsel %vm1626_vm9, %v1603_v40, %v5244_v38  ;;  %v1107_v38 = vshrl.u32 %v5410_v5, 16  ;;  %v1100_v40 = vor.u32 %v1099_v62, %v1096_v45 }
 0x1e5   : > { %v1669_v58 = vsel %vm1659_vm12, %v1636_v61, %v5344_v15  ;;  %v1089_v15 = vsel %vm4804_vm7, %v4027_v32, %v1088_v60  ;;  %v1113_v25 = vshll.u32 %v508_v42, 16  ;;  %v1125_v45 = vrot.slane %v508_v42, 5 }
 0x1e6   : > { %v1522_v48 = vpop.permute.xlu0 %1521  ;;  %1504 = vrot.lane.b32.xlu2 %v6978_v6, %s4171_s13  ;;  %v1702_v11 = vsel %vm1692_vm11, %v1669_v58, %v1417_v27  ;;  %v1092_v27 = vsel %vm4804_vm7, %v1090_v17, %v1091_v4  ;;  %v1405_v61 = vunpack.c.l.b16 %v1089_v15  ;;  %v1605_v4 = vsel %vm1593_vm10, %v1562_v43, %v5177_v39 }
 0x1e7   : > { %1469 = vrot.lane.b32.xlu1 %v5031_v44, %s4169_s11  ;;  %v1735_v9 = vsel %vm1725_vm13, %v1702_v11, %v1452_v33  ;;  %v1109_v33 = vrot.slane %v1107_v38, 4  ;;  %v1406_v60 = vunpack.c.l.b16 %v1092_v27  ;;  %v1115_v17 = vrot.slane %v1113_v25, 5 }
 0x1e8   : > { %v1768_v2 = vsel %vm1758_vm14, %v1735_v9, %v5364_v19  ;;  %v1122_v19 = vrot.slane %v5410_v5, 5  ;;  %v1638_v38 = vsel %vm1626_vm9, %v1605_v4, %v5255_v21  ;;  %v1440_v58 = vunpack.c.l.b16 %v5406_v0 }
 0x1e9   : > { %v1384_v12 = vpop.permute.xlu1 %1383  ;;  %v1110_v16 = vor.u32 %v1109_v33, %v1105_v35  ;;  %v1801_v41 = vsel %vm1791_vm15, %v1768_v2, %v1522_v48  ;;  %v1456_v48 = vpop.permute.xlu2 %1455  ;;  %v4028_v39 = vrot.slane %v5406_v0, 9  ;;  %v1568_v4 = vsel %vm280_vm0, %v5041_v31, %v5119_v1  ;;  %v6984_v31 = vld [vmem:[#allocation12_spill] sm:$0xff] }
 0x1ea   : > { %v1671_v56 = vsel %vm1659_vm12, %v1638_v38, %v1384_v12  ;;  %v1124_v11 = vrot.slane %v1122_v19, 4  ;;  %v1442_v21 = vpack.c.b16 %v1441_v54, %v1440_v58  ;;  %v6981_v38 = vld [vmem:[#allocation11_spill] sm:$0xff] }
 0x1eb   : > { %v1111_v32 = vrot.slane %v1110_v16, 4  ;;  %v1123_v5 = vsel %vm4804_vm7, %v4028_v39, %v1122_v19 }
 0x1ec   : > { %1539 = vrot.lane.b32.xlu0 %v4991_v59, %s4172_s14  ;;  %v1126_v0 = vsel %vm4804_vm7, %v1124_v11, %v1125_v45  ;;  %v6983_v45 = vld [vmem:[#allocation8_spill] sm:$0xff] }
 0x1ed   : > { %v1116_v9 = vsel %vm4262_vm4, %v1111_v32, %v1115_v17  ;;  %v1511_v33 = vunpack.c.l.b16 %v1126_v0 }
 0x1ee   : > { %v1419_v55 = vpop.permute.xlu0 %1418  ;;  %1436 = vrot.lane.b32.xlu2 %v4991_v59, %s4170_s12  ;;  %v1101_v59 = vrot.slane %v1100_v40, 4  ;;  %v1476_v27 = vunpack.c.l.b16 %v1116_v9 }
 0x1ef   : > { %1401 = vrot.lane.b32.xlu1 %v6978_v6, %s4168_s10  ;;  %v1407_v6 = vpack.c.b16 %v1406_v60, %v1405_v61  ;;  %v1704_v37 = vsel %vm1692_vm11, %v1671_v56, %v1419_v55  ;;  %v1571_v60 = vsel %vm280_vm0, %v5057_v23, %v5061_v47  ;;  %v6982_v56 = vld [vmem:[#allocation23_spill] sm:$0xff] }
 0x1f0   : > { %v1611_v16 = vsel %vm1593_vm10, %v1571_v60, %v5189_v63  ;;  %v1574_v39 = vsel %vm280_vm0, %v5063_v53, %v6982_v56  ;;  %v6987_v60 = vld [vmem:[#allocation9_spill] sm:$0xff] }
 0x1f1   : > { %v1454_v18 = vpop.permute.xlu1 %1453  ;;  %v1495_v55 = vpop.permute.xlu2 %1494  ;;  %v1613_v9 = vsel %vm1593_vm10, %v1574_v39, %v6983_v45 }
 0x1f2   : > { %v1737_v15 = vsel %vm1725_vm13, %v1704_v37, %v1454_v18  ;;  %v1646_v1 = vsel %vm1626_vm9, %v1613_v9, %v6984_v31  ;;  %v2177_v31 = vld [vmem:[#allocation3] sm:$0xff] }
 0x1f3   : > { %4049 = vmatmul.msk.bf16.gmra.mxu0 %vm1860_vm1, %v1801_v41  ;;  %v1770_v42 = vsel %vm1758_vm14, %v1737_v15, %v5402_v22  ;;  %v1565_v22 = vsel %vm280_vm0, %v5043_v50, %v5115_v26  ;;  %v1644_v41 = vsel %vm1626_vm9, %v1611_v16, %v5271_v14  ;;  %v6988_v16 = vld [vmem:[#allocation32_spill] sm:$0xff] }
 0x1f4   : > { %1471 = vrot.lane.b32.xlu0 %v5103_v10, %s4169_s11  ;;  %v1106_v10 = vsel %vm4262_vm4, %v1101_v59, %v1105_v35  ;;  %v1510_v35 = vunpack.c.l.b16 %v1123_v5  ;;  %v1607_v18 = vsel %vm1593_vm10, %v1565_v22, %v5185_v34  ;;  %v1677_v50 = vsel %vm1659_vm12, %v1644_v41, %v5433_v3 }
 0x1f5   : > { %v1475_v29 = vunpack.c.l.b16 %v1106_v10  ;;  %v1640_v25 = vsel %vm1626_vm9, %v1607_v18, %v5207_v30 }
 0x1f6   : > { %v1524_v8 = vpop.permute.xlu0 %1523  ;;  %1541 = vrot.lane.b32.xlu2 %v1407_v6, %s4172_s14  ;;  %v1512_v40 = vpack.c.b16 %v1511_v33, %v1510_v35  ;;  %v1673_v23 = vsel %vm1659_vm12, %v1640_v25, %v5384_v7 }
 0x1f7   : > { %1506 = vrot.lane.b32.xlu1 %v1372_v20, %s4171_s13  ;;  %v1477_v2 = vpack.c.b16 %v1476_v27, %v1475_v29  ;;  %v1803_v52 = vsel %vm1791_vm15, %v1770_v42, %v1524_v8 }
 0x1f9   : > { %v1388_v62 = vpop.permute.xlu1 %1387  ;;  %v1392_v47 = vpop.permute.xlu2 %1391 }
 0x1fa   : > { %v1679_v29 = vsel %vm1659_vm12, %v1646_v1, %v1392_v47  ;;  %v2178_v1 = vld [vmem:[#allocation3 + $0x8] sm:$0xff] }
 0x1fc   : > { %1403 = vrot.lane.b32.xlu0 %v1372_v20, %s4168_s10 }
 0x1fe   : > { %v1421_v12 = vpop.permute.xlu0 %1420  ;;  %1473 = vrot.lane.b32.xlu2 %v1442_v21, %s4169_s11 }
 0x1ff   : > { %1438 = vrot.lane.b32.xlu1 %v1407_v6, %s4170_s12  ;;  %v1706_v26 = vsel %vm1692_vm11, %v1673_v23, %v1421_v12 }
 0x200   : > { %v1739_v59 = vsel %vm1725_vm13, %v1706_v26, %v1456_v48  ;;  %v6980_v48 = vld [vmem:[#allocation19_spill] sm:$0xff] }
 0x201   : > { %v1425_v28 = vpop.permute.xlu1 %1424  ;;  %v1458_v3 = vpop.permute.xlu2 %1457  ;;  %v1609_v8 = vsel %vm1593_vm10, %v1568_v4, %v6980_v48  ;;  %v6990_v4 = vld [vmem:[#allocation28_spill] sm:$0xff] }
 0x202   : > { %v1710_v34 = vsel %vm1692_vm11, %v1677_v50, %v1425_v28  ;;  %v1642_v10 = vsel %vm1626_vm9, %v1609_v8, %v6981_v38  ;;  %v6985_v28 = vld [vmem:[#allocation18_spill] sm:$0xff]  ;;  %v6991_v38 = vld [vmem:[#allocation21_spill] sm:$0xff] }
 0x203   : > { %4050 = vmatmul.msk.bf16.gmra.mxu0 %vm1860_vm1, %v1803_v52  ;;  %v1675_v11 = vsel %vm1659_vm12, %v1642_v10, %v1388_v62  ;;  %v6986_v52 = vld [vmem:[#allocation15_spill] sm:$0xff] }
 0x204   : > { %1508 = vrot.lane.b32.xlu0 %v1477_v2, %s4171_s13 }
 0x206   : > { %v1460_v61 = vpop.permute.xlu0 %1459 }
 0x207   : > { %1543 = vrot.lane.b32.xlu1 %v1512_v40, %s4172_s14  ;;  %v1743_v63 = vsel %vm1725_vm13, %v1710_v34, %v1460_v61  ;;  %v1577_v40 = vsel %vm280_vm0, %v6986_v52, %v6985_v28  ;;  %v5553_v61 = vld [vmem:[%s6837_s3] ss:$0 sm:$0xff]  ;;  %v6994_v28 = vld [vmem:[#allocation31_spill] sm:$0xff] }
 0x208   : > { %v1776_v19 = vsel %vm1758_vm14, %v1743_v63, %v1495_v55  ;;  %v5545_v55 = vld [vmem:[%s6836_s2] ss:$0 sm:$0xff]  ;;  %v1615_v22 = vsel %vm1593_vm10, %v1577_v40, %v6987_v60 }
 0x209   : > { %v1491_v20 = vpop.permute.xlu1 %1490  ;;  %v1497_v58 = vpop.permute.xlu2 %1496  ;;  %v1648_v25 = vsel %vm1626_vm9, %v1615_v22, %v6988_v16  ;;  %v2179_v22 = vld [vmem:[#allocation3 + $0x10] sm:$0x3] }
 0x20a   : > { %v1772_v6 = vsel %vm1758_vm14, %v1739_v59, %v1491_v20 }
 0x20e   : > { %v1526_v30 = vpop.permute.xlu0 %1525 }
 0x20f   : > { %v1805_v7 = vsel %vm1791_vm15, %v1772_v6, %v1526_v30 }
 0x211   : > { %v1530_v14 = vpop.permute.xlu1 %1529  ;;  %v1394_v12 = vpop.permute.xlu2 %1393 }
 0x212   : > { %v1809_v43 = vsel %vm1791_vm15, %v1776_v19, %v1530_v14  ;;  %v1681_v23 = vsel %vm1659_vm12, %v1648_v25, %v1394_v12 }
 0x213   : > { %4051 = vmatmul.msk.bf16.gmra.mxu0 %vm1860_vm1, %v1805_v7  ;;  %4053 = vmatmul.msk.bf16.vlgmr.msra.gmra.mxu2 %vm1860_vm1, %v1809_v43 }
 0x216   : > { %v1423_v32 = vpop.permute.xlu0 %1422 }
 0x217   : > { %v1708_v21 = vsel %vm1692_vm11, %v1675_v11, %v1423_v32 }
 0x218   : > { %v1741_v27 = vsel %vm1725_vm13, %v1708_v21, %v1458_v3  ;;  %v6989_v3 = vld [vmem:[#allocation20_spill] sm:$0xff] }
 0x219   : > { %v1427_v17 = vpop.permute.xlu1 %1426  ;;  %v1499_v50 = vpop.permute.xlu2 %1498  ;;  %v1580_v32 = vsel %vm280_vm0, %v5077_v57, %v6989_v3 }
 0x21a   : > { %v1712_v15 = vsel %vm1692_vm11, %v1679_v29, %v1427_v17  ;;  %v1617_v48 = vsel %vm1593_vm10, %v1580_v32, %v6990_v4 }
 0x21b   : > { %v1650_v10 = vsel %vm1626_vm9, %v1617_v48, %v6991_v38 }
 0x21e   : > { %v1462_v54 = vpop.permute.xlu0 %1461 }
 0x21f   : > { %v1745_v53 = vsel %vm1725_vm13, %v1712_v15, %v1462_v54 }
 0x220   : > { %v1778_v35 = vsel %vm1758_vm14, %v1745_v53, %v1497_v58  ;;  %v6993_v53 = vld [vmem:[#allocation10_spill] sm:$0xff] }
 0x221   : > { %v1493_v37 = vpop.permute.xlu1 %1492  ;;  %v1431_v17 = vpop.permute.xlu2 %1430 }
 0x222   : > { %v1774_v5 = vsel %vm1758_vm14, %v1741_v27, %v1493_v37  ;;  %v6992_v37 = vld [vmem:[#allocation17_spill] sm:$0xff]  ;;  %v5588_v27 = vpack.c.bf16 %v2177_v31, %v2177_v31 }
 0x223   : > { %v1583_v29 = vsel %vm280_vm0, %v5085_v51, %v6992_v37 }
 0x226   : > { %v1528_v62 = vpop.permute.xlu0 %1527 }
 0x227   : > { %v1807_v0 = vsel %vm1791_vm15, %v1774_v5, %v1528_v62  ;;  %v5590_v5 = vpack.c.bf16 %v2178_v1, %v2178_v1  ;;  %v1619_v62 = vsel %vm1593_vm10, %v1583_v29, %v6993_v53 }
 0x228   : > { %4052 = vmatmul.msk.bf16.gmra.mxu0 %vm1860_vm1, %v1807_v0  ;;  %v1652_v52 = vsel %vm1626_vm9, %v1619_v62, %v6994_v28 }
 0x229   : > { %v1532_v42 = vpop.permute.xlu1 %1531  ;;  %v2299_v51 = vshrl.u32 %v5590_v5, 16 }
 0x22a   : > { %v1811_v33 = vsel %vm1791_vm15, %v1778_v35, %v1532_v42  ;;  %v2286_v35 = vshrl.u32 %v5588_v27, 16 }
 0x22b   : > { %4054 = vmatmul.msk.bf16.gmra.mxu2 %vm1860_vm1, %v1811_v33  ;;  %v2289_v33 = vshll.u32 %v5588_v27, 16 }
 0x22e   : > { %v1429_v2 = vpop.permute.xlu0 %1428 }
 0x22f   : > { %v1714_v47 = vsel %vm1692_vm11, %v1681_v23, %v1429_v2  ;;  %v2295_v2 = vshll.u32 %v5590_v5, 16  ;;  %v2291_v23 = vrot.slane %v2289_v33, 5 }
 0x230   : > { %v1906_v18 = vpop.f32.mrf.mxu0 }
 0x231   : > { %v1990_v41 = vmul.f32 %v5545_v55, %v1906_v18  ;;  %v1464_v20 = vpop.permute.xlu1 %1463  ;;  %v1536_v18 = vpop.permute.xlu2 %1535 }
 0x232   : > { %v1747_v34 = vsel %vm1725_vm13, %v1714_v47, %v1464_v20  ;;  %v2288_v20 = vrot.slane %v2286_v35, 4 }
 0x233   : > { %v2026_v26 = vadd.f32 %v5553_v61, %v1990_v41  ;;  %v1780_v30 = vsel %vm1758_vm14, %v1747_v34, %v1499_v50  ;;  %v5602_v41 = vpack.c.bf16 %v2179_v22, %v2179_v22  ;;  %v2297_v50 = vrot.slane %v2295_v2, 5 }
 0x235   : > { %v2058_v63 = vmax.f32 %v2026_v26, 0.0 }
 0x236   : > { %v1534_v59 = vpop.permute.xlu0 %1533 }
 0x237   : > { %2145 = vst.msk [vmem:[#allocation3 + $0x19] sm:$0xff] %vm280_vm0, %v2058_v63  ;;  %v1813_v7 = vsel %vm1791_vm15, %v1780_v30, %v1534_v59 }
 0x238   : > { %v1908_v6 = vpop.f32.mrf.mxu0 }
 0x239   : > { %v1991_v14 = vmul.f32 %v5545_v55, %v1908_v6  ;;  %v1396_v19 = vpop.permute.xlu1 %1395  ;;  %v1468_v2 = vpop.permute.xlu2 %1467 }
 0x23a   : > { %v1683_v56 = vsel %vm1659_vm12, %v1650_v10, %v1396_v19  ;;  %v2301_v19 = vrot.slane %v2299_v51, 4 }
 0x23b   : > { %v2027_v43 = vadd.f32 %v5553_v61, %v1991_v14  ;;  %4055 = vmatmul.msk.bf16.gmra.mxu2 %vm1860_vm1, %v1813_v7  ;;  %v1716_v15 = vsel %vm1692_vm11, %v1683_v56, %v1431_v17  ;;  %v2292_v14 = vor.u32 %v2291_v23, %v2288_v20  ;;  %v2305_v7 = vshll.u32 %v5602_v41, 16 }
 0x23d   : > { %v2059_v8 = vmax.f32 %v2027_v43, 0.0  ;;  %v2293_v48 = vrot.slane %v2292_v14, 4  ;;  %v2307_v38 = vrot.slane %v2305_v7, 5 }
 0x23e   : > { %v1466_v58 = vpop.permute.xlu0 %1465  ;;  %v2180_v54 = vld [vmem:[#allocation3 + $0x18] sm:$0xff] }
 0x23f   : > { %2146 = vst.msk [vmem:[#allocation3 + $0x21] sm:$0xff] %vm280_vm0, %v2059_v8  ;;  %v5579_v39 = vpack.c.bf16 %v2180_v54, %v2180_v54  ;;  %v1749_v40 = vsel %vm1725_vm13, %v1716_v15, %v1466_v58  ;;  %v2302_v8 = vor.u32 %v2301_v19, %v2297_v50 }
 0x240   : > { %v1911_v11 = vpop.f32.mrf.mxu0 }
 0x241   : > { %v1992_v45 = vmul.f32 %v5545_v55, %v1911_v11  ;;  %v1501_v57 = vpop.permute.xlu1 %1500  ;;  %v2310_v9 = vshrl.u32 %v5579_v39, 16  ;;  %v2313_v21 = vshll.u32 %v5579_v39, 16  ;;  %v2899_v59 = vunpack.c.l.b16 %v5579_v39 }
 0x242   : > { %v1782_v47 = vsel %vm1758_vm14, %v1749_v40, %v1501_v57  ;;  %v4062_v11 = vrot.slane %v5579_v39, 9  ;;  %v2298_v57 = vsel %vm4262_vm4, %v2293_v48, %v2297_v50 }
 0x243   : > { %v2028_v0 = vadd.f32 %v5553_v61, %v1992_v45  ;;  %v2312_v12 = vrot.slane %v2310_v9, 4  ;;  %v2315_v42 = vrot.slane %v2313_v21, 5  ;;  %v1815_v4 = vsel %vm1791_vm15, %v1782_v47, %v1536_v18 }
 0x244   : > { %v2303_v9 = vrot.slane %v2302_v8, 4  ;;  %v2945_v62 = vunpack.c.l.b16 %v2298_v57  ;;  %v6995_v8 = vld [vmem:[#allocation7_spill] sm:$0xff] }
 0x245   : > { %v2060_v60 = vmax.f32 %v2028_v0, 0.0  ;;  %v2316_v6 = vor.u32 %v2315_v42, %v2312_v12 }
 0x246   : > { %v2181_v16 = vld [vmem:[#allocation3 + $0x20] sm:$0xff]  ;;  %v2182_v25 = vld [vmem:[#allocation3 + $0x28] sm:$0x3]  ;;  %v1398_v26 = vpop.permute.xlu0 %1397  ;;  %v2308_v53 = vsel %vm4262_vm4, %v2303_v9, %v2307_v38  ;;  %v1586_v38 = vsel %vm280_vm0, %v5015_v49, %v6995_v8 }
 0x247   : > { %2147 = vst.msk [vmem:[#allocation3 + $0x31] sm:$0xff] %vm280_vm0, %v2060_v60  ;;  %v2235_v34 = vpack.c.bf16 %v2181_v16, %v2181_v16  ;;  %v2236_v63 = vpack.c.bf16 %v2182_v25, %v2182_v25  ;;  %v1685_v45 = vsel %vm1659_vm12, %v1652_v52, %v1398_v26  ;;  %v2317_v1 = vrot.slane %v2316_v6, 4 }
 0x248   : > { %v1913_v30 = vpop.f32.mrf.mxu0  ;;  %v2946_v33 = vunpack.c.l.b16 %v2308_v53 }
 0x249   : > { %v1993_v43 = vmul.f32 %v5545_v55, %v1913_v30  ;;  %v2319_v3 = vshll.u32 %v2235_v34, 16  ;;  %v2323_v32 = vshrl.u32 %v2235_v34, 16  ;;  %v2329_v17 = vshll.u32 %v2236_v63, 16  ;;  %v1433_v58 = vpop.permute.xlu1 %1432 }
 0x24a   : > { %v2900_v21 = vunpack.c.l.b16 %v2235_v34  ;;  %v2726_v12 = vrot.slane %v2235_v34, 5  ;;  %v1718_v51 = vsel %vm1692_vm11, %v1685_v45, %v1433_v58  ;;  %v2977_v50 = vpack.c.b16 %v2946_v33, %v2945_v62 }
 0x24b   : > { %v2029_v10 = vadd.f32 %v5553_v61, %v1993_v43  ;;  %4056 = vmatmul.msk.bf16.gmra.mxu2 %vm1860_vm1, %v1815_v4  ;;  %v2321_v54 = vrot.slane %v2319_v3, 5  ;;  %v2325_v56 = vrot.slane %v2323_v32, 4  ;;  %v2331_v29 = vrot.slane %v2329_v17, 5 }
 0x24c   : > { %v5618_v0 = vpack.c.b16 %v2900_v21, %v2899_v59  ;;  %v2727_v52 = vsel %vm4804_vm7, %v4062_v11, %v2726_v12  ;;  %v2728_v40 = vrot.slane %v2726_v12, 4  ;;  %v2729_v47 = vrot.slane %v2236_v63, 5  ;;  %2993 = vrot.lane.b32.xlu2 %v2977_v50, %s4165_s26  ;;  %v1400_v21 = vpop.permute.xlu2 %1399 }
 0x24d   : > { %v2061_v31 = vmax.f32 %v2029_v10, 0.0  ;;  %v2326_v37 = vor.u32 %v2325_v56, %v2321_v54  ;;  %v2322_v39 = vsel %vm4262_vm4, %v2317_v1, %v2321_v54  ;;  %v1751_v34 = vsel %vm1725_vm13, %v1718_v51, %v1468_v2 }
 0x24e   : > { %v2183_v15 = vld [vmem:[#allocation3 + $0x30] sm:$0xff]  ;;  %v1503_v60 = vpop.permute.xlu0 %1502  ;;  %v2947_v20 = vunpack.c.l.b16 %v2322_v39  ;;  %v2730_v30 = vsel %vm4804_vm7, %v2728_v40, %v2729_v47  ;;  %v3027_v32 = vunpack.c.l.b16 %v2727_v52 }
 0x24f   : > { %2148 = vst.msk [vmem:[#allocation3 + $0x39] sm:$0xff] %vm280_vm0, %v2061_v31  ;;  %v2327_v42 = vrot.slane %v2326_v37, 4  ;;  %v2237_v35 = vpack.c.bf16 %v2183_v15, %v2183_v15  ;;  %v3028_v43 = vunpack.c.l.b16 %v2730_v30  ;;  %v1784_v17 = vsel %vm1758_vm14, %v1751_v34, %v1503_v60  ;;  %v6996_v15 = vld [vmem:[#allocation5_spill] sm:$0xff] }
 0x250   : > { %v1916_v28 = vpop.f32.mrf.mxu0  ;;  %v1621_v53 = vsel %vm1593_vm10, %v1586_v38, %v6996_v15 }
 0x251   : > { %v1994_v22 = vmul.f32 %v5545_v55, %v1916_v28  ;;  %v2332_v18 = vsel %vm4262_vm4, %v2327_v42, %v2331_v29  ;;  %v2334_v16 = vshrl.u32 %v2237_v35, 16  ;;  %v2337_v25 = vshll.u32 %v2237_v35, 16  ;;  %v1538_v14 = vpop.permute.xlu1 %1537 }
 0x252   : > { %v2948_v23 = vunpack.c.l.b16 %v2332_v18  ;;  %v1817_v58 = vsel %vm1791_vm15, %v1784_v17, %v1538_v14  ;;  %v4063_v54 = vrot.slane %v2237_v35, 9  ;;  %v5644_v56 = vpack.c.b16 %v3028_v43, %v3027_v32 }
 0x253   : > { %v2030_v26 = vadd.f32 %v5553_v61, %v1994_v22  ;;  %v2336_v19 = vrot.slane %v2334_v16, 4  ;;  %v2339_v7 = vrot.slane %v2337_v25, 5  ;;  %v2901_v37 = vunpack.c.l.b16 %v2237_v35 }
 0x254   : > { %v5631_v59 = vpack.c.b16 %v2948_v23, %v2947_v20  ;;  %v1654_v35 = vsel %vm1626_vm9, %v1621_v53, %v5285_v46  ;;  %v1505_v43 = vpop.permute.xlu2 %1504 }
 0x255   : > { %v2062_v6 = vmax.f32 %v2030_v26, 0.0  ;;  %v2340_v45 = vor.u32 %v2339_v7, %v2336_v19  ;;  %v1687_v60 = vsel %vm1659_vm12, %v1654_v35, %v1400_v21 }
 0x256   : > { %2995 = vrot.lane.b32.xlu0 %v5631_v59, %s4165_s26  ;;  %v2184_v63 = vld [vmem:[#allocation3 + $0x38] sm:$0xff]  ;;  %v2185_v3 = vld [vmem:[#allocation3 + $0x40] sm:$0x3]  ;;  %v1435_v49 = vpop.permute.xlu0 %1434 }
 0x257   : > { %2149 = vst.msk [vmem:[#allocation3 + $0x49] sm:$0xff] %vm280_vm0, %v2062_v6  ;;  %v2238_v4 = vpack.c.bf16 %v2184_v63, %v2184_v63  ;;  %v2239_v48 = vpack.c.bf16 %v2185_v3, %v2185_v3  ;;  %v2341_v52 = vrot.slane %v2340_v45, 4  ;;  %v1720_v46 = vsel %vm1692_vm11, %v1687_v60, %v1435_v49 }
 0x258   : > { %v1918_v10 = vpop.f32.mrf.mxu0 }
 0x259   : > { %v1995_v11 = vmul.f32 %v5545_v55, %v1918_v10  ;;  %v2343_v57 = vshll.u32 %v2238_v4, 16  ;;  %v2347_v9 = vshrl.u32 %v2238_v4, 16  ;;  %v2353_v31 = vshll.u32 %v2239_v48, 16  ;;  %v1470_v25 = vpop.permute.xlu1 %1469 }
 0x25a   : > { %v2733_v1 = vrot.slane %v2238_v4, 5  ;;  %v2902_v29 = vunpack.c.l.b16 %v2238_v4  ;;  %v2736_v2 = vrot.slane %v2239_v48, 5  ;;  %v1753_v7 = vsel %vm1725_vm13, %v1720_v46, %v1470_v25 }
 0x25b   : > { %v2031_v62 = vadd.f32 %v5553_v61, %v1995_v11  ;;  %4057 = vmatmul.msk.bf16.gmra.mxu2 %vm1860_vm1, %v1817_v58  ;;  %v2345_v12 = vrot.slane %v2343_v57, 5  ;;  %v2349_v39 = vrot.slane %v2347_v9, 4  ;;  %v2355_v22 = vrot.slane %v2353_v31, 5  ;;  %v6997_v9 = vld [vmem:[#allocation22_spill] sm:$0xff] }
 0x25c   : > { %v2734_v42 = vsel %vm4804_vm7, %v4063_v54, %v2733_v1  ;;  %v2735_v33 = vrot.slane %v2733_v1, 4  ;;  %v5653_v51 = vpack.c.b16 %v2902_v29, %v2901_v37  ;;  %v1786_v48 = vsel %vm1758_vm14, %v1753_v7, %v1505_v43 }
 0x25d   : > { %v2063_v28 = vmax.f32 %v2031_v62, 0.0  ;;  %v2350_v40 = vor.u32 %v2349_v39, %v2345_v12  ;;  %v2346_v20 = vsel %vm4262_vm4, %v2341_v52, %v2345_v12  ;;  %v3029_v34 = vunpack.c.l.b16 %v2734_v42 }
 0x25e   : > { %v2186_v18 = vld [vmem:[#allocation3 + $0x48] sm:$0xff]  ;;  %v2737_v16 = vsel %vm4804_vm7, %v2735_v33, %v2736_v2  ;;  %v2949_v63 = vunpack.c.l.b16 %v2346_v20  ;;  %v1540_v8 = vpop.permute.xlu0 %1539  ;;  %v1589_v21 = vsel %vm280_vm0, %v5101_v36, %v6997_v9 }
 0x25f   : > { %2150 = vst.msk [vmem:[#allocation3 + $0x51] sm:$0xff] %vm280_vm0, %v2063_v28  ;;  %v2351_v23 = vrot.slane %v2350_v40, 4  ;;  %v2240_v50 = vpack.c.bf16 %v2186_v18, %v2186_v18  ;;  %v3030_v47 = vunpack.c.l.b16 %v2737_v16  ;;  %v1819_v1 = vsel %vm1791_vm15, %v1786_v48, %v1540_v8  ;;  %v1437_v16 = vpop.permute.xlu2 %1436 }
 0x260   : > { %v1921_v26 = vpop.f32.mrf.mxu0 }
 0x261   : > { %v1996_v30 = vmul.f32 %v5545_v55, %v1921_v26  ;;  %v2356_v6 = vsel %vm4262_vm4, %v2351_v23, %v2355_v22  ;;  %v2358_v14 = vshrl.u32 %v2240_v50, 16  ;;  %v2361_v19 = vshll.u32 %v2240_v50, 16  ;;  %v1402_v37 = vpop.permute.xlu1 %1401  ;;  %v6999_v22 = vld [vmem:[#allocation29_spill] sm:$0xff] }
 0x262   : > { %v2950_v3 = vunpack.c.l.b16 %v2356_v6  ;;  %v5668_v32 = vpack.c.b16 %v3030_v47, %v3029_v34  ;;  %v2903_v62 = vunpack.c.l.b16 %v2240_v50  ;;  %v4064_v39 = vrot.slane %v2240_v50, 9  ;;  %v7000_v50 = vld [vmem:[#allocation14_spill] sm:$0xff] }
 0x263   : > { %v2032_v17 = vadd.f32 %v5553_v61, %v1996_v30  ;;  %v2360_v10 = vrot.slane %v2358_v14, 4  ;;  %v2363_v58 = vrot.slane %v2361_v19, 5  ;;  %v1623_v18 = vsel %vm1593_vm10, %v1589_v21, %v6999_v22  ;;  %v7006_v22 = vld [vmem:[#allocation13_spill] sm:$0xff] }
 0x264   : > { %v5671_v4 = vpack.c.b16 %v2950_v3, %v2949_v63  ;;  %v1656_v47 = vsel %vm1626_vm9, %v1623_v18, %v7000_v50 }
 0x265   : > { %v2064_v38 = vmax.f32 %v2032_v17, 0.0  ;;  %v2364_v15 = vor.u32 %v2363_v58, %v2360_v10  ;;  %v1689_v14 = vsel %vm1659_vm12, %v1656_v47, %v1402_v37 }
 0x266   : > { %2997 = vrot.lane.b32.xlu1 %v5671_v4, %s4165_s26  ;;  %v2187_v54 = vld [vmem:[#allocation3 + $0x50] sm:$0xff]  ;;  %v2188_v11 = vld [vmem:[#allocation3 + $0x58] sm:$0x3]  ;;  %v1472_v3 = vpop.permute.xlu0 %1471 }
 0x267   : > { %2151 = vst.msk [vmem:[#allocation3 + $0x61] sm:$0xff] %vm280_vm0, %v2064_v38  ;;  %v2241_v45 = vpack.c.bf16 %v2187_v54, %v2187_v54  ;;  %v2242_v57 = vpack.c.bf16 %v2188_v11, %v2188_v11  ;;  %v2365_v20 = vrot.slane %v2364_v15, 4  ;;  %v1722_v38 = vsel %vm1692_vm11, %v1689_v14, %v1437_v16 }
 0x268   : > { %v1923_v31 = vpop.f32.mrf.mxu0 }
 0x269   : > { %v1997_v29 = vmul.f32 %v5545_v55, %v1923_v31  ;;  %v2367_v53 = vshll.u32 %v2241_v45, 16  ;;  %v2371_v49 = vshrl.u32 %v2241_v45, 16  ;;  %v2904_v12 = vunpack.c.l.b16 %v2241_v45  ;;  %v1507_v10 = vpop.permute.xlu1 %1506 }
 0x26a   : > { %v2740_v42 = vrot.slane %v2241_v45, 5  ;;  %v2377_v36 = vshll.u32 %v2242_v57, 16  ;;  %v2743_v60 = vrot.slane %v2242_v57, 5  ;;  %v1755_v57 = vsel %vm1725_vm13, %v1722_v38, %v1472_v3 }
 0x26b   : > { %v2033_v33 = vadd.f32 %v5553_v61, %v1997_v29  ;;  %4058 = vmatmul.msk.bf16.gmra.mxu2 %vm1860_vm1, %v1819_v1  ;;  %v2369_v2 = vrot.slane %v2367_v53, 5  ;;  %v2373_v35 = vrot.slane %v2371_v49, 4  ;;  %v5684_v28 = vpack.c.b16 %v2904_v12, %v2903_v62  ;;  %v1542_v1 = vpop.permute.xlu2 %1541 }
 0x26c   : > { %v2741_v52 = vsel %vm4804_vm7, %v4064_v39, %v2740_v42  ;;  %v2742_v40 = vrot.slane %v2740_v42, 4  ;;  %v2379_v30 = vrot.slane %v2377_v36, 5  ;;  %v1788_v31 = vsel %vm1758_vm14, %v1755_v57, %v1507_v10 }
 0x26d   : > { %6998 = vst [vmem:[#allocation16_spill] sm:$0xff] %v5684_v28  ;;  %v2065_v25 = vmax.f32 %v2033_v33, 0.0  ;;  %v2374_v23 = vor.u32 %v2373_v35, %v2369_v2  ;;  %v2370_v26 = vsel %vm4262_vm4, %v2365_v20, %v2369_v2  ;;  %v3031_v7 = vunpack.c.l.b16 %v2741_v52  ;;  %v7004_v35 = vld [vmem:[#allocation6_spill] sm:$0xff] }
 0x26e   : > { %v2744_v46 = vsel %vm4804_vm7, %v2742_v40, %v2743_v60  ;;  %v2951_v17 = vunpack.c.l.b16 %v2370_v26  ;;  %v2189_v54 = vld [vmem:[#allocation3 + $0x60] sm:$0xff]  ;;  %v1821_v53 = vsel %vm1791_vm15, %v1788_v31, %v1542_v1  ;;  %v1404_v39 = vpop.permute.xlu0 %1403  ;;  %v1592_v36 = vsel %vm280_vm0, %v5031_v44, %v7004_v35 }
 0x26f   : > { %2152 = vst.msk [vmem:[#allocation3 + $0x69] sm:$0xff] %vm280_vm0, %v2065_v25  ;;  %v2375_v34 = vrot.slane %v2374_v23, 4  ;;  %v3032_v6 = vunpack.c.l.b16 %v2744_v46  ;;  %v5710_v21 = vpack.c.bf16 %v2189_v54, %v2189_v54  ;;  %v7005_v52 = vld [vmem:[#allocation30_spill] sm:$0xff] }
 0x270   : > { %v1926_v19 = vpop.f32.mrf.mxu0  ;;  %v1625_v40 = vsel %vm1593_vm10, %v1592_v36, %v7005_v52 }
 0x271   : > { %v1998_v43 = vmul.f32 %v5545_v55, %v1926_v19  ;;  %v2380_v63 = vsel %vm4262_vm4, %v2375_v34, %v2379_v30  ;;  %v5701_v8 = vpack.c.b16 %v3032_v6, %v3031_v7  ;;  %v2905_v49 = vunpack.c.l.b16 %v5710_v21  ;;  %v1439_v33 = vpop.permute.xlu1 %1438 }
 0x272   : > { %v2952_v48 = vunpack.c.l.b16 %v2380_v63  ;;  %v1658_v18 = vsel %vm1626_vm9, %v1625_v40, %v7006_v22 }
 0x273   : > { %7001 = vst [vmem:[#allocation24_spill] sm:$0xff] %v5701_v8  ;;  %v2034_v58 = vadd.f32 %v5553_v61, %v1998_v43  ;;  %v1691_v25 = vsel %vm1659_vm12, %v1658_v18, %v1404_v39  ;;  %v1474_v23 = vpop.permute.xlu2 %1473 }
 0x274   : > { %v5705_v11 = vpack.c.b16 %v2952_v48, %v2951_v17  ;;  %v1724_v20 = vsel %vm1692_vm11, %v1691_v25, %v1439_v33 }
 0x275   : > { %v2066_v45 = vmax.f32 %v2034_v58, 0.0  ;;  %v1757_v46 = vsel %vm1725_vm13, %v1724_v20, %v1474_v23 }
 0x276   : > { %7002 = vst [vmem:[#allocation26_spill] sm:$0xff] %v5705_v11  ;;  %2999 = vrot.lane.b32.xlu2 %v5705_v11, %s4165_s26  ;;  %v2190_v9 = vld [vmem:[#allocation3 + $0x68] sm:$0xff]  ;;  %v1509_v26 = vpop.permute.xlu0 %1508 }
 0x277   : > { %2153 = vst.msk [vmem:[#allocation3 + $0x79] sm:$0xff] %vm280_vm0, %v2066_v45  ;;  %v5714_v37 = vpack.c.bf16 %v2190_v9, %v2190_v9  ;;  %v1790_v7 = vsel %vm1758_vm14, %v1757_v46, %v1509_v26 }
 0x278   : > { %v1928_v29 = vpop.f32.mrf.mxu0 }
 0x279   : > { %v1999_v15 = vmul.f32 %v5545_v55, %v1928_v29  ;;  %v2906_v62 = vunpack.c.l.b16 %v5714_v37  ;;  %v1544_v6 = vpop.permute.xlu1 %1543 }
 0x27a   : > { %v1823_v63 = vsel %vm1791_vm15, %v1790_v7, %v1544_v6 }
 0x27b   : > { %v2035_v12 = vadd.f32 %v5553_v61, %v1999_v15  ;;  %4059 = vmatmul.msk.bf16.gmra.mxu2 %vm1860_vm1, %v1821_v53  ;;  %v5722_v42 = vpack.c.b16 %v2906_v62, %v2905_v49 }
 0x27d   : > { %7003 = vst [vmem:[#allocation25_spill] sm:$0xff] %v5722_v42  ;;  %v2067_v2 = vmax.f32 %v2035_v12, 0.0 }
 0x27e   : > { %v2192_v47 = vld [vmem:[#allocation3 + $0x78] sm:$0xff] }
 0x27f   : > { %2154 = vst.msk [vmem:[#allocation3 + $0x81] sm:$0xff] %vm280_vm0, %v2067_v2  ;;  %v5737_v30 = vpack.c.bf16 %v2192_v47, %v2192_v47 }
 0x280   : > { %v1931_v60 = vpop.f32.mrf.mxu0 }
 0x281   : > { %v2000_v16 = vmul.f32 %v5545_v55, %v1931_v60  ;;  %v2907_v3 = vunpack.c.l.b16 %v5737_v30 }
 0x283   : > { %v2036_v50 = vadd.f32 %v5553_v61, %v2000_v16 }
 0x285   : > { %v2068_v44 = vmax.f32 %v2036_v50, 0.0 }
 0x286   : > { %v2193_v34 = vld [vmem:[#allocation3 + $0x80] sm:$0xff] }
 0x287   : > { %2155 = vst.msk [vmem:[#allocation3 + $0x91] sm:$0xff] %vm280_vm0, %v2068_v44  ;;  %v5740_v14 = vpack.c.bf16 %v2193_v34, %v2193_v34 }
 0x288   : > { %v1933_v19 = vpop.f32.mrf.mxu0 }
 0x289   : > { %v2001_v43 = vmul.f32 %v5545_v55, %v1933_v19  ;;  %v2908_v17 = vunpack.c.l.b16 %v5740_v14 }
 0x28b   : > { %v2037_v48 = vadd.f32 %v5553_v61, %v2001_v43  ;;  %4060 = vmatmul.msk.bf16.gmra.mxu2 %vm1860_vm1, %v1823_v63  ;;  %v5749_v38 = vpack.c.b16 %v2908_v17, %v2907_v3 }
 0x28d   : > { %7007 = vst [vmem:[#allocation27_spill] sm:$0xff] %v5749_v38  ;;  %v2069_v10 = vmax.f32 %v2037_v48, 0.0 }
 0x28e   : > { %v2195_v57 = vld [vmem:[#allocation3 + $0x90] sm:$0xff] }
 0x28f   : > { %2156 = vst.msk [vmem:[#allocation3 + $0x99] sm:$0xff] %vm280_vm0, %v2069_v10  ;;  %v5754_v29 = vpack.c.bf16 %v2195_v57, %v2195_v57 }
 0x290   : > { %v1936_v58 = vpop.f32.mrf.mxu0 }
 0x291   : > { %v2002_v54 = vmul.f32 %v5545_v55, %v1936_v58  ;;  %v2909_v39 = vunpack.c.l.b16 %v5754_v29 }
 0x293   : > { %v2038_v45 = vadd.f32 %v5553_v61, %v2002_v54 }
 0x295   : > { %v2070_v9 = vmax.f32 %v2038_v45, 0.0 }
 0x296   : > { %v1946_v31 = vpop.f32.mrf.mxu2  ;;  %v2196_v1 = vld [vmem:[#allocation3 + $0x98] sm:$0xff] }
 0x297   : > { %2157 = vst.msk [vmem:[#allocation3 + $0xa9] sm:$0xff] %vm280_vm0, %v2070_v9  ;;  %v2006_v15 = vmul.f32 %v5545_v55, %v1946_v31  ;;  %v5758_v53 = vpack.c.bf16 %v2196_v1, %v2196_v1 }
 0x298   : > { %v1938_v49 = vpop.f32.mrf.mxu0 }
 0x299   : > { %v2042_v62 = vadd.f32 %v5553_v61, %v2006_v15  ;;  %v2003_v12 = vmul.f32 %v5545_v55, %v1938_v49  ;;  %v2910_v33 = vunpack.c.l.b16 %v5758_v53 }
 0x29b   : > { %v2074_v2 = vmax.f32 %v2042_v62, 0.0  ;;  %v2039_v35 = vadd.f32 %v5553_v61, %v2003_v12  ;;  %v5765_v36 = vpack.c.b16 %v2910_v33, %v2909_v39 }
 0x29d   : > { %7008 = vst [vmem:[#allocation4_spill] sm:$0xff] %v5765_v36  ;;  %v2071_v52 = vmax.f32 %v2039_v35, 0.0 }
 0x29e   : > { %2161 = vst.msk [vmem:[#allocation3 + $0xd9] sm:$0xff] %vm280_vm0, %v2074_v2  ;;  %v1948_v40 = vpop.f32.mrf.mxu2  ;;  %v2198_v33 = vld [vmem:[#allocation3 + $0xa8] sm:$0xff] }
 0x29f   : > { %2158 = vst.msk [vmem:[#allocation3 + $0xb1] sm:$0xff] %vm280_vm0, %v2071_v52  ;;  %v2007_v60 = vmul.f32 %v5545_v55, %v1948_v40 }
 0x2a1   : > { %v2043_v22 = vadd.f32 %v5553_v61, %v2007_v60 }
 0x2a3   : > { %v2075_v18 = vmax.f32 %v2043_v22, 0.0 }
 0x2a5   : > { %v2204_v16 = vld [vmem:[#allocation3 + $0xd8] sm:$0xff]  ;;  %2162 = vst.msk [vmem:[#allocation3 + $0xe1] sm:$0xff] %vm280_vm0, %v2075_v18  ;;  %v1941_v25 = vpop.f32.mrf.mxu0 }
 0x2a6   : > { %v2258_v20 = vpack.c.bf16 %v2204_v16, %v2204_v16  ;;  %v2004_v23 = vmul.f32 %v5545_v55, %v1941_v25  ;;  %v2199_v57 = vld [vmem:[#allocation3 + $0xb0] sm:$0xff]  ;;  %v2382_v25 = vshrl.u32 %v5710_v21, 16 }
 0x2a7   : > { %v5783_v40 = vpack.c.bf16 %v2199_v57, %v2199_v57 }
 0x2a8   : > { %v2502_v50 = vshrl.u32 %v2258_v20, 16  ;;  %v2505_v47 = vshll.u32 %v2258_v20, 16  ;;  %v2040_v44 = vadd.f32 %v5553_v61, %v2004_v23  ;;  %v2915_v48 = vunpack.c.l.b16 %v2258_v20 }
 0x2a9   : > { %v4070_v1 = vrot.slane %v2258_v20, 9  ;;  %v5787_v23 = vpack.c.bf16 %v2198_v33, %v2198_v33 }
 0x2aa   : > { %v2072_v46 = vmax.f32 %v2040_v44, 0.0  ;;  %v2504_v26 = vrot.slane %v2502_v50, 4  ;;  %v2507_v34 = vrot.slane %v2505_v47, 5 }
 0x2ac   : > { %2159 = vst.msk [vmem:[#allocation3 + $0xc1] sm:$0xff] %vm280_vm0, %v2072_v46  ;;  %v2205_v6 = vld [vmem:[#allocation3 + $0xe0] sm:$0xff]  ;;  %v2206_v19 = vld [vmem:[#allocation3 + $0xe8] sm:$0x3]  ;;  %v2508_v58 = vor.u32 %v2507_v34, %v2504_v26  ;;  %v2385_v46 = vshll.u32 %v5710_v21, 16 }
 0x2ad   : > { %v1943_v7 = vpop.f32.mrf.mxu0  ;;  %v2259_v43 = vpack.c.bf16 %v2205_v6, %v2205_v6  ;;  %v2260_v63 = vpack.c.bf16 %v2206_v19, %v2206_v19  ;;  %v2912_v6 = vunpack.c.l.b16 %v5783_v40 }
 0x2ae   : > { %v2005_v3 = vmul.f32 %v5545_v55, %v1943_v7  ;;  %v1951_v17 = vpop.f32.mrf.mxu2  ;;  %v2509_v22 = vrot.slane %v2508_v58, 4  ;;  %v2384_v58 = vrot.slane %v2382_v25, 4  ;;  %v2747_v25 = vrot.slane %v5714_v37, 5 }
 0x2af   : > { %v2008_v10 = vmul.f32 %v5545_v55, %v1951_v17  ;;  %v2511_v54 = vshll.u32 %v2259_v43, 16  ;;  %v2515_v45 = vshrl.u32 %v2259_v43, 16  ;;  %v2916_v31 = vunpack.c.l.b16 %v2259_v43 }
 0x2b0   : > { %v2041_v9 = vadd.f32 %v5553_v61, %v2005_v3  ;;  %v2782_v15 = vrot.slane %v2259_v43, 5  ;;  %v2521_v39 = vshll.u32 %v2260_v63, 16  ;;  %v2785_v20 = vrot.slane %v2260_v63, 5 }
 0x2b1   : > { %v2044_v49 = vadd.f32 %v5553_v61, %v2008_v10  ;;  %v2513_v62 = vrot.slane %v2511_v54, 5  ;;  %v2517_v12 = vrot.slane %v2515_v45, 4  ;;  %v5779_v35 = vpack.c.b16 %v2916_v31, %v2915_v48 }
 0x2b2   : > { %v2073_v2 = vmax.f32 %v2041_v9, 0.0  ;;  %v2783_v52 = vsel %vm4804_vm7, %v4070_v1, %v2782_v15  ;;  %v2784_v16 = vrot.slane %v2782_v15, 4  ;;  %v2523_v44 = vrot.slane %v2521_v39, 5  ;;  %v2191_v9 = vld [vmem:[#allocation3 + $0x70] sm:$0x3] }
 0x2b3   : > { %v2076_v60 = vmax.f32 %v2044_v49, 0.0  ;;  %v2518_v18 = vor.u32 %v2517_v12, %v2513_v62  ;;  %v2514_v50 = vsel %vm4262_vm4, %v2509_v22, %v2513_v62  ;;  %v3043_v43 = vunpack.c.l.b16 %v2783_v52 }
 0x2b4   : > { %2160 = vst.msk [vmem:[#allocation3 + $0xc9] sm:$0xff] %vm280_vm0, %v2073_v2  ;;  %v2786_v34 = vsel %vm4804_vm7, %v2784_v16, %v2785_v20  ;;  %v2963_v3 = vunpack.c.l.b16 %v2514_v50  ;;  %v2911_v48 = vunpack.c.l.b16 %v5787_v23  ;;  %v2387_v54 = vrot.slane %v2385_v46, 5 }
 0x2b5   : > { %2163 = vst.msk [vmem:[#allocation3 + $0xf1] sm:$0xff] %vm280_vm0, %v2076_v60  ;;  %v2519_v47 = vrot.slane %v2518_v18, 4  ;;  %v3044_v63 = vunpack.c.l.b16 %v2786_v34  ;;  %v2391_v31 = vshll.u32 %v5714_v37, 16  ;;  %v2395_v1 = vshrl.u32 %v5714_v37, 16 }
 0x2b6   : > { %v1953_v26 = vpop.f32.mrf.mxu2  ;;  %v5807_v15 = vpack.c.b16 %v2912_v6, %v2911_v48  ;;  %v2245_v39 = vpack.c.bf16 %v2191_v9, %v2191_v9  ;;  %v2388_v2 = vor.u32 %v2387_v54, %v2384_v58  ;;  %v2749_v37 = vrot.slane %v2747_v25, 4 }
 0x2b7   : > { %v2009_v19 = vmul.f32 %v5545_v55, %v1953_v26  ;;  %v2524_v7 = vsel %vm4262_vm4, %v2519_v47, %v2523_v44  ;;  %v5801_v45 = vpack.c.b16 %v3044_v63, %v3043_v43  ;;  %v2393_v52 = vrot.slane %v2391_v31, 5 }
 0x2b8   : > { %v2964_v17 = vunpack.c.l.b16 %v2524_v7  ;;  %7009 = vst [vmem:[#allocation19_spill] sm:$0xff] %v5807_v15  ;;  %v2397_v60 = vrot.slane %v2395_v1, 4  ;;  %v2401_v50 = vshll.u32 %v2245_v39, 16  ;;  %v4065_v47 = vrot.slane %v5710_v21, 9 }
 0x2b9   : > { %v2045_v10 = vadd.f32 %v5553_v61, %v2009_v19  ;;  %v2389_v44 = vrot.slane %v2388_v2, 4  ;;  %v2750_v63 = vrot.slane %v2245_v39, 5  ;;  %v2406_v9 = vshrl.u32 %v5737_v30, 16 }
 0x2ba   : > { %v5803_v57 = vpack.c.b16 %v2964_v17, %v2963_v3  ;;  %v2398_v46 = vor.u32 %v2397_v60, %v2393_v52  ;;  %v5822_v19 = vsel %vm4804_vm7, %v4065_v47, %v2747_v25  ;;  %v2403_v48 = vrot.slane %v2401_v50, 5  ;;  %v2194_v50 = vld [vmem:[#allocation3 + $0x88] sm:$0x3]  ;;  %v2201_v47 = vld [vmem:[#allocation3 + $0xc0] sm:$0xff] }
 0x2bb   : > { %v2077_v49 = vmax.f32 %v2045_v10, 0.0  ;;  %v2394_v17 = vsel %vm4262_vm4, %v2389_v44, %v2393_v52  ;;  %v2409_v31 = vshll.u32 %v5737_v30, 16  ;;  %v5841_v52 = vsel %vm4804_vm7, %v2749_v37, %v2750_v63 }
 0x2bc   : > { %3011 = vrot.lane.b32.xlu2 %v5803_v57, %s4165_s26  ;;  %v2207_v62 = vld [vmem:[#allocation3 + $0xf0] sm:$0xff]  ;;  %v2399_v58 = vrot.slane %v2398_v46, 4  ;;  %v2953_v2 = vunpack.c.l.b16 %v2394_v17  ;;  %v2408_v44 = vrot.slane %v2406_v9, 4  ;;  %v4066_v54 = vrot.slane %v5737_v30, 9 }
 0x2bd   : > { %2164 = vst.msk [vmem:[#allocation3 + $0xf9] sm:$0xff] %vm280_vm0, %v2077_v49  ;;  %v5812_v12 = vpack.c.bf16 %v2207_v62, %v2207_v62  ;;  %v2411_v46 = vrot.slane %v2409_v31, 5 }
 0x2be   : > { %v1956_v33 = vpop.f32.mrf.mxu2  ;;  %v2404_v37 = vsel %vm4262_vm4, %v2399_v58, %v2403_v48  ;;  %v2419_v58 = vshrl.u32 %v5740_v14, 16 }
 0x2bf   : > { %v2010_v22 = vmul.f32 %v5545_v55, %v1956_v33  ;;  %v2526_v18 = vshrl.u32 %v5812_v12, 16  ;;  %v2529_v16 = vshll.u32 %v5812_v12, 16  ;;  %v2202_v33 = vld [vmem:[#allocation3 + $0xc8] sm:$0xff]  ;;  %v2917_v60 = vunpack.c.l.b16 %v5812_v12 }
 0x2c0   : > { %v2412_v48 = vor.u32 %v2411_v46, %v2408_v44  ;;  %v2719_v44 = vrot.slane %v5590_v5, 5 }
 0x2c1   : > { %v2046_v20 = vadd.f32 %v5553_v61, %v2010_v22  ;;  %v2528_v34 = vrot.slane %v2526_v18, 4  ;;  %v2531_v6 = vrot.slane %v2529_v16, 5 }
 0x2c3   : > { %v2078_v26 = vmax.f32 %v2046_v20, 0.0  ;;  %v2532_v49 = vor.u32 %v2531_v6, %v2528_v34  ;;  %v5849_v34 = vpack.c.bf16 %v2202_v33, %v2202_v33 }
 0x2c4   : > { %3077 = vrot.lane.b32.xlu2 %v5668_v32, %s4166_s8  ;;  %v2208_v7 = vld [vmem:[#allocation3 + $0xf8] sm:$0xff]  ;;  %v2209_v43 = vld [vmem:[#allocation3 + $0x100] sm:$0x3] }
 0x2c5   : > { %2165 = vst.msk [vmem:[#allocation3 + $0x109] sm:$0xff] %vm280_vm0, %v2078_v26  ;;  %v5827_v3 = vpack.c.bf16 %v2208_v7, %v2208_v7  ;;  %v5829_v21 = vpack.c.bf16 %v2209_v43, %v2209_v43  ;;  %v2533_v7 = vrot.slane %v2532_v49, 4 }
 0x2c6   : > { %v1958_v10 = vpop.f32.mrf.mxu2 }
 0x2c7   : > { %v2011_v1 = vmul.f32 %v5545_v55, %v1958_v10  ;;  %v2535_v62 = vshll.u32 %v5827_v3, 16  ;;  %v2539_v39 = vshrl.u32 %v5827_v3, 16  ;;  %v2918_v22 = vunpack.c.l.b16 %v5827_v3 }
 0x2c8   : > { %v2545_v20 = vshll.u32 %v5829_v21, 16  ;;  %v5854_v10 = vpack.c.bf16 %v2194_v50, %v2194_v50 }
 0x2c9   : > { %v2047_v18 = vadd.f32 %v5553_v61, %v2011_v1  ;;  %v2537_v16 = vrot.slane %v2535_v62, 5  ;;  %v2541_v25 = vrot.slane %v2539_v39, 4  ;;  %v5847_v26 = vpack.c.b16 %v2918_v22, %v2917_v60 }
 0x2ca   : > { %v2415_v1 = vshll.u32 %v5740_v14, 16  ;;  %v5857_v62 = vpack.c.bf16 %v2201_v47, %v2201_v47  ;;  %v2547_v49 = vrot.slane %v2545_v20, 5  ;;  %v2954_v60 = vunpack.c.l.b16 %v2404_v37 }
 0x2cb   : > { %v2079_v6 = vmax.f32 %v2047_v18, 0.0  ;;  %v2542_v43 = vor.u32 %v2541_v25, %v2537_v16  ;;  %v2538_v9 = vsel %vm4262_vm4, %v2533_v7, %v2537_v16  ;;  %v2914_v22 = vunpack.c.l.b16 %v5849_v34 }
 0x2cc   : > { %v2210_v63 = vld [vmem:[#allocation3 + $0x108] sm:$0xff]  ;;  %v2425_v16 = vshll.u32 %v5854_v10, 16  ;;  %v2913_v20 = vunpack.c.l.b16 %v5857_v62  ;;  %v5871_v46 = vrot.slane %v2415_v1, 5 }
 0x2cd   : > { %2166 = vst.msk [vmem:[#allocation3 + $0x111] sm:$0xff] %vm280_vm0, %v2079_v6  ;;  %v2543_v31 = vrot.slane %v2542_v43, 4  ;;  %v2264_v39 = vpack.c.bf16 %v2210_v63, %v2210_v63  ;;  %v2965_v6 = vunpack.c.l.b16 %v2538_v9  ;;  %v2754_v43 = vrot.slane %v5740_v14, 5 }
 0x2ce   : > { %v1961_v33 = vpop.f32.mrf.mxu2  ;;  %v4061_v63 = vrot.slane %v5588_v27, 9  ;;  %v5884_v14 = vrot.slane %v2412_v48, 4 }
 0x2cf   : > { %v2012_v18 = vmul.f32 %v5545_v55, %v1961_v33  ;;  %v2548_v25 = vsel %vm4262_vm4, %v2543_v31, %v2547_v49  ;;  %v2550_v50 = vshrl.u32 %v2264_v39, 16  ;;  %v2553_v47 = vshll.u32 %v2264_v39, 16 }
 0x2d0   : > { %v2966_v17 = vunpack.c.l.b16 %v2548_v25  ;;  %v2421_v31 = vrot.slane %v2419_v58, 4  ;;  %v5877_v49 = vpack.c.b16 %v2914_v22, %v2913_v20  ;;  %v2757_v58 = vrot.slane %v5854_v10, 5 }
 0x2d1   : > { %v2048_v7 = vadd.f32 %v5553_v61, %v2012_v18  ;;  %v2552_v33 = vrot.slane %v2550_v50, 4  ;;  %v2555_v25 = vrot.slane %v2553_v47, 5  ;;  %v5882_v61 = vpack.c.b16 %v2954_v60, %v2953_v2 }
 0x2d2   : > { %v5874_v37 = vpack.c.b16 %v2966_v17, %v2965_v6  ;;  %7010 = vst [vmem:[#allocation11_spill] sm:$0xff] %v5877_v49  ;;  %v5886_v17 = vrot.slane %v2425_v16, 5  ;;  %v2721_v22 = vrot.slane %v2719_v44, 4  ;;  %v2722_v50 = vrot.slane %v5602_v41, 5  ;;  %v5898_v41 = vld [vmem:[%s6837_s3] ss:$0 sm:$0xff] }
 0x2d3   : > { %v2080_v9 = vmax.f32 %v2048_v7, 0.0  ;;  %7011 = vst [vmem:[#allocation23_spill] sm:$0xff] %v5882_v61  ;;  %v2720_v2 = vsel %vm4804_vm7, %v4061_v63, %v2719_v44  ;;  %v2422_v60 = vor.u32 %v2421_v31, %v5871_v46  ;;  %v2756_v20 = vrot.slane %v2754_v43, 4 }
 0x2d4   : > { %3013 = vrot.lane.b32.xlu0 %v5874_v37, %s4165_s26  ;;  %v2211_v1 = vld [vmem:[#allocation3 + $0x110] sm:$0xff]  ;;  %v2212_v18 = vld [vmem:[#allocation3 + $0x118] sm:$0x3]  ;;  %v2919_v48 = vunpack.c.l.b16 %v2264_v39  ;;  %v2556_v7 = vor.u32 %v2555_v25, %v2552_v33  ;;  %v4072_v36 = vrot.slane %v2264_v39, 9  ;;  %v2723_v63 = vsel %vm4804_vm7, %v2721_v22, %v2722_v50 }
 0x2d5   : > { %2167 = vst.msk [vmem:[#allocation3 + $0x121] sm:$0xff] %vm280_vm0, %v2080_v9  ;;  %v2265_v47 = vpack.c.bf16 %v2211_v1, %v2211_v1  ;;  %v2266_v30 = vpack.c.bf16 %v2212_v18, %v2212_v18  ;;  %v2423_v42 = vrot.slane %v2422_v60, 4  ;;  %v3026_v11 = vunpack.c.l.b16 %v2723_v63 }
 0x2d6   : > { %v1963_v6 = vpop.f32.mrf.mxu2  ;;  %v5924_v60 = vsel %vm4804_vm7, %v2756_v20, %v2757_v58 }
 0x2d7   : > { %v2013_v16 = vmul.f32 %v5545_v55, %v1963_v6  ;;  %v2559_v49 = vshll.u32 %v2265_v47, 16  ;;  %v2563_v10 = vshrl.u32 %v2265_v47, 16  ;;  %v2569_v15 = vshll.u32 %v2266_v30, 16 }
 0x2d8   : > { %v2920_v9 = vunpack.c.l.b16 %v2265_v47  ;;  %v2796_v38 = vrot.slane %v2265_v47, 5  ;;  %v2799_v39 = vrot.slane %v2266_v30, 5  ;;  %v2557_v47 = vrot.slane %v2556_v7, 4 }
 0x2d9   : > { %v2049_v44 = vadd.f32 %v5898_v41, %v2013_v16  ;;  %v2561_v31 = vrot.slane %v2559_v49, 5  ;;  %v2565_v1 = vrot.slane %v2563_v10, 4  ;;  %v3025_v16 = vunpack.c.l.b16 %v2720_v2  ;;  %v5929_v10 = vld [vmem:[%s6836_s2] ss:$0 sm:$0xff] }
 0x2da   : > { %v5903_v55 = vpack.c.b16 %v2920_v9, %v2919_v48  ;;  %v2797_v33 = vsel %vm4804_vm7, %v4072_v36, %v2796_v38  ;;  %v2798_v25 = vrot.slane %v2796_v38, 4  ;;  %v2571_v28 = vrot.slane %v2569_v15, 5 }
 0x2db   : > { %v2081_v18 = vmax.f32 %v2049_v44, 0.0  ;;  %v2566_v6 = vor.u32 %v2565_v1, %v2561_v31  ;;  %v2562_v38 = vsel %vm4262_vm4, %v2557_v47, %v2561_v31  ;;  %v2418_v2 = vsel %vm4262_vm4, %v5884_v14, %v5871_v46 }
 0x2dc   : > { %3001 = vrot.lane.b32.xlu0 %v5882_v61, %s4165_s26  ;;  %v2213_v22 = vld [vmem:[#allocation3 + $0x120] sm:$0xff]  ;;  %v2800_v49 = vsel %vm4804_vm7, %v2798_v25, %v2799_v39  ;;  %v5920_v15 = vsel %vm4804_vm7, %v4066_v54, %v2754_v43  ;;  %v3047_v7 = vunpack.c.l.b16 %v2797_v33  ;;  %v3057_v63 = vpack.c.b16 %v3026_v11, %v3025_v16 }
 0x2dd   : > { %2168 = vst.msk [vmem:[#allocation3 + $0x129] sm:$0xff] %vm280_vm0, %v2081_v18  ;;  %v2567_v36 = vrot.slane %v2566_v6, 4  ;;  %v2267_v50 = vpack.c.bf16 %v2213_v22, %v2213_v22  ;;  %v3048_v30 = vunpack.c.l.b16 %v2800_v49  ;;  %v2967_v54 = vunpack.c.l.b16 %v2562_v38 }
 0x2de   : > { %v1966_v48 = vpop.f32.mrf.mxu2  ;;  %v2428_v20 = vsel %vm4262_vm4, %v2423_v42, %v5886_v17  ;;  %v2430_v1 = vshrl.u32 %v5754_v29, 16  ;;  %v2433_v33 = vshll.u32 %v5754_v29, 16  ;;  %v2443_v11 = vshrl.u32 %v5758_v53, 16 }
 0x2df   : > { %v2014_v9 = vmul.f32 %v5929_v10, %v1966_v48  ;;  %v2572_v44 = vsel %vm4262_vm4, %v2567_v36, %v2571_v28  ;;  %v2574_v46 = vshrl.u32 %v2267_v50, 16  ;;  %v2577_v14 = vshll.u32 %v2267_v50, 16 }
 0x2e0   : > { %v2968_v43 = vunpack.c.l.b16 %v2572_v44  ;;  %v5934_v31 = vpack.c.b16 %v3048_v30, %v3047_v7  ;;  %v2439_v28 = vshll.u32 %v5758_v53, 16  ;;  %v7012_v18 = vunpack.c.l.b16 %v5822_v19  ;;  %v2197_v44 = vld [vmem:[#allocation3 + $0xa0] sm:$0x3] }
 0x2e1   : > { %v2050_v58 = vadd.f32 %v5898_v41, %v2014_v9  ;;  %v7013_v47 = vunpack.c.l.b16 %v5841_v52  ;;  %v2576_v16 = vrot.slane %v2574_v46, 4  ;;  %v2579_v22 = vrot.slane %v2577_v14, 5 }
 0x2e2   : > { %v5942_v25 = vpack.c.b16 %v2968_v43, %v2967_v54  ;;  %v5955_v49 = vunpack.c.l.b16 %v2418_v2  ;;  %v5957_v38 = vunpack.c.l.b16 %v2428_v20  ;;  %v3035_v36 = vunpack.c.l.b16 %v5920_v15 }
 0x2e3   : > { %v2082_v39 = vmax.f32 %v2050_v58, 0.0  ;;  %v5950_v6 = vpack.c.b16 %v7013_v47, %v7012_v18  ;;  %v3036_v19 = vunpack.c.l.b16 %v5924_v60  ;;  %v2432_v48 = vrot.slane %v2430_v1, 4 }
 0x2e4   : > { %3073 = vrot.lane.b32.xlu0 %v3057_v63, %s4166_s8  ;;  %3015 = vrot.lane.b32.xlu1 %v5942_v25, %s4165_s26  ;;  %v2214_v42 = vld [vmem:[#allocation3 + $0x128] sm:$0xff]  ;;  %v2215_v17 = vld [vmem:[#allocation3 + $0x130] sm:$0x3]  ;;  %v2435_v7 = vrot.slane %v2433_v33, 5  ;;  %v5962_v46 = vrot.slane %v2439_v28, 5  ;;  %v2445_v14 = vrot.slane %v2443_v11, 4  ;;  %v2921_v63 = vunpack.c.l.b16 %v2267_v50 }
 0x2e5   : > { %7014 = vst [vmem:[#allocation8_spill] sm:$0xff] %v5950_v6  ;;  %v2268_v52 = vpack.c.bf16 %v2214_v42, %v2214_v42  ;;  %v2269_v30 = vpack.c.bf16 %v2215_v17, %v2215_v17  ;;  %v2761_v2 = vrot.slane %v5758_v53, 5  ;;  %v2580_v43 = vor.u32 %v2579_v22, %v2576_v16 }
 0x2e6   : > { %2169 = vst.msk [vmem:[#allocation3 + $0x139] sm:$0xff] %vm280_vm0, %v2082_v39  ;;  %v1968_v9 = vpop.f32.mrf.mxu2  ;;  %v4073_v39 = vrot.slane %v2267_v50, 9  ;;  %v2251_v42 = vpack.c.bf16 %v2197_v44, %v2197_v44  ;;  %v4067_v61 = vrot.slane %v5754_v29, 9  ;;  %v2446_v44 = vor.u32 %v2445_v14, %v5962_v46 }
 0x2e7   : > { %v2015_v54 = vmul.f32 %v5929_v10, %v1968_v9  ;;  %v2583_v15 = vshll.u32 %v2268_v52, 16  ;;  %v2587_v58 = vshrl.u32 %v2268_v52, 16  ;;  %v2593_v60 = vshll.u32 %v2269_v30, 16 }
 0x2e8   : > { %v2922_v20 = vunpack.c.l.b16 %v2268_v52  ;;  %v2803_v18 = vrot.slane %v2268_v52, 5  ;;  %v2806_v17 = vrot.slane %v2269_v30, 5  ;;  %v2581_v16 = vrot.slane %v2580_v43, 4 }
 0x2e9   : > { %v2051_v1 = vadd.f32 %v5898_v41, %v2015_v54  ;;  %v2585_v33 = vrot.slane %v2583_v15, 5  ;;  %v2589_v47 = vrot.slane %v2587_v58, 4  ;;  %v2595_v50 = vrot.slane %v2593_v60, 5 }
 0x2ea   : > { %v5967_v28 = vpack.c.b16 %v2922_v20, %v2921_v63  ;;  %v2804_v53 = vsel %vm4804_vm7, %v4073_v39, %v2803_v18  ;;  %v2805_v11 = vrot.slane %v2803_v18, 4  ;;  %v2763_v63 = vrot.slane %v2761_v2, 4 }
 0x2eb   : > { %v2083_v9 = vmax.f32 %v2051_v1, 0.0  ;;  %v2590_v22 = vor.u32 %v2589_v47, %v2585_v33  ;;  %v2586_v30 = vsel %vm4262_vm4, %v2581_v16, %v2585_v33  ;;  %v2436_v20 = vor.u32 %v2435_v7, %v2432_v48 }
 0x2ec   : > { %3079 = vrot.lane.b32.xlu0 %v5701_v8, %s4166_s8  ;;  %3075 = vrot.lane.b32.xlu1 %v5644_v56, %s4166_s8  ;;  %v2807_v54 = vsel %vm4804_vm7, %v2805_v11, %v2806_v17  ;;  %v2449_v39 = vshll.u32 %v2251_v42, 16  ;;  %v2764_v18 = vrot.slane %v2251_v42, 5  ;;  %v3049_v60 = vunpack.c.l.b16 %v2804_v53 }
 0x2ed   : > { %v2216_v52 = vld [vmem:[#allocation3 + $0x138] sm:$0xff]  ;;  %2170 = vst.msk [vmem:[#allocation3 + $0x141] sm:$0xff] %vm280_vm0, %v2083_v9  ;;  %v2591_v29 = vrot.slane %v2590_v22, 4  ;;  %v3050_v15 = vunpack.c.l.b16 %v2807_v54  ;;  %v2969_v17 = vunpack.c.l.b16 %v2586_v30  ;;  %v5985_v8 = vrot.slane %v2446_v44, 4 }
 0x2ee   : > { %v2270_v43 = vpack.c.bf16 %v2216_v52, %v2216_v52  ;;  %v1971_v58 = vpop.f32.mrf.mxu2  ;;  %v5990_v22 = vpack.c.b16 %v3036_v19, %v3035_v36  ;;  %v5994_v48 = vsel %vm4804_vm7, %v4067_v61, %v2761_v2  ;;  %v5998_v7 = vsel %vm4804_vm7, %v2763_v63, %v2764_v18 }
 0x2ef   : > { %v2016_v1 = vmul.f32 %v5929_v10, %v1971_v58  ;;  %v2596_v14 = vsel %vm4262_vm4, %v2591_v29, %v2595_v50  ;;  %v5987_v33 = vpack.c.b16 %v3050_v15, %v3049_v60  ;;  %v2789_v53 = vrot.slane %v5827_v3, 5 }
 0x2f0   : > { %v2598_v47 = vshrl.u32 %v2270_v43, 16  ;;  %v2601_v11 = vshll.u32 %v2270_v43, 16  ;;  %v2970_v9 = vunpack.c.l.b16 %v2596_v14  ;;  %v6003_v50 = vrot.slane %v2436_v20, 4 }
 0x2f1   : > { %v2052_v16 = vadd.f32 %v5898_v41, %v2016_v1  ;;  %v6005_v52 = vrot.slane %v2449_v39, 5  ;;  %v6009_v36 = vpack.c.b16 %v5957_v38, %v5955_v49  ;;  %v2454_v15 = vshrl.u32 %v5787_v23, 16 }
 0x2f2   : > { %v6000_v42 = vpack.c.b16 %v2970_v9, %v2969_v17  ;;  %v2600_v19 = vrot.slane %v2598_v47, 4  ;;  %v2603_v61 = vrot.slane %v2601_v11, 5  ;;  %v2463_v58 = vshll.u32 %v5783_v40, 16 }
 0x2f3   : > { %v2084_v44 = vmax.f32 %v2052_v16, 0.0  ;;  %v2452_v49 = vsel %vm4262_vm4, %v5985_v8, %v6005_v52  ;;  %v4071_v39 = vrot.slane %v5812_v12, 9  ;;  %v2791_v18 = vrot.slane %v2789_v53, 4 }
 0x2f4   : > { %3081 = vrot.lane.b32.xlu1 %v5950_v6, %s4166_s8  ;;  %3017 = vrot.lane.b32.xlu2 %v6000_v42, %s4165_s26  ;;  %v2217_v2 = vld [vmem:[#allocation3 + $0x140] sm:$0xff]  ;;  %v2218_v63 = vld [vmem:[#allocation3 + $0x148] sm:$0x3]  ;;  %v2467_v60 = vshrl.u32 %v5783_v40, 16  ;;  %v2923_v1 = vunpack.c.l.b16 %v2270_v43  ;;  %v2604_v14 = vor.u32 %v2603_v61, %v2600_v19  ;;  %v4074_v16 = vrot.slane %v2270_v43, 9 }
 0x2f5   : > { %2171 = vst.msk [vmem:[#allocation3 + $0x151] sm:$0xff] %vm280_vm0, %v2084_v44  ;;  %v2271_v30 = vpack.c.bf16 %v2217_v2, %v2217_v2  ;;  %v2272_v29 = vpack.c.bf16 %v2218_v63, %v2218_v63  ;;  %v2792_v2 = vrot.slane %v5829_v21, 5  ;;  %v2790_v21 = vsel %vm4804_vm7, %v4071_v39, %v2789_v53 }
 0x2f6   : > { %v1973_v20 = vpop.f32.mrf.mxu2  ;;  %v2605_v6 = vrot.slane %v2604_v14, 4  ;;  %v2469_v53 = vrot.slane %v2467_v60, 4 }
 0x2f7   : > { %v2017_v8 = vmul.f32 %v5929_v10, %v1973_v20  ;;  %v2607_v47 = vshll.u32 %v2271_v30, 16  ;;  %v2611_v11 = vshrl.u32 %v2271_v30, 16  ;;  %v2617_v17 = vshll.u32 %v2272_v29, 16 }
 0x2f8   : > { %v2924_v9 = vunpack.c.l.b16 %v2271_v30  ;;  %v2810_v52 = vrot.slane %v2271_v30, 5  ;;  %v2813_v20 = vrot.slane %v2272_v29, 5  ;;  %v2793_v61 = vsel %vm4804_vm7, %v2791_v18, %v2792_v2  ;;  %v2200_v2 = vld [vmem:[#allocation3 + $0xb8] sm:$0x3] }
 0x2f9   : > { %v2053_v44 = vadd.f32 %v5898_v41, %v2017_v8  ;;  %v2609_v63 = vrot.slane %v2607_v47, 5  ;;  %v2613_v54 = vrot.slane %v2611_v11, 4  ;;  %v2619_v30 = vrot.slane %v2617_v17, 5 }
 0x2fa   : > { %v6033_v12 = vpack.c.b16 %v2924_v9, %v2923_v1  ;;  %v2811_v38 = vsel %vm4804_vm7, %v4074_v16, %v2810_v52  ;;  %v2812_v3 = vrot.slane %v2810_v52, 4  ;;  %v2457_v8 = vshll.u32 %v5787_v23, 16 }
 0x2fb   : > { %v2085_v19 = vmax.f32 %v2053_v44, 0.0  ;;  %v2614_v43 = vor.u32 %v2613_v54, %v2609_v63  ;;  %v2610_v54 = vsel %vm4262_vm4, %v2605_v6, %v2609_v63  ;;  %v3046_v9 = vunpack.c.l.b16 %v2793_v61 }
 0x2fc   : > { %3003 = vrot.lane.b32.xlu1 %v6009_v36, %s4165_s26  ;;  %3083 = vrot.lane.b32.xlu2 %v5990_v22, %s4166_s8  ;;  %v2219_v1 = vld [vmem:[#allocation3 + $0x150] sm:$0xff]  ;;  %v2814_v29 = vsel %vm4804_vm7, %v2812_v3, %v2813_v20  ;;  %v6051_v16 = vrot.slane %v2463_v58, 5  ;;  %v3051_v39 = vunpack.c.l.b16 %v2811_v38  ;;  %v3045_v20 = vunpack.c.l.b16 %v2790_v21 }
 0x2fd   : > { %2172 = vst.msk [vmem:[#allocation3 + $0x159] sm:$0xff] %vm280_vm0, %v2085_v19  ;;  %v2615_v18 = vrot.slane %v2614_v43, 4  ;;  %v2273_v14 = vpack.c.bf16 %v2219_v1, %v2219_v1  ;;  %v3052_v47 = vunpack.c.l.b16 %v2814_v29  ;;  %v2971_v19 = vunpack.c.l.b16 %v2610_v54 }
 0x2fe   : > { %v1976_v11 = vpop.f32.mrf.mxu2  ;;  %v2958_v61 = vunpack.c.l.b16 %v2452_v49  ;;  %v2456_v58 = vrot.slane %v2454_v15, 4  ;;  %v2459_v1 = vrot.slane %v2457_v8, 5  ;;  %v6059_v60 = vpack.c.b16 %v3046_v9, %v3045_v20 }
 0x2ff   : > { %v2018_v17 = vmul.f32 %v5929_v10, %v1976_v11  ;;  %v2620_v52 = vsel %vm4262_vm4, %v2615_v18, %v2619_v30  ;;  %v2622_v3 = vshrl.u32 %v2273_v14, 16  ;;  %v2625_v44 = vshll.u32 %v2273_v14, 16 }
 0x300   : > { %v2972_v6 = vunpack.c.l.b16 %v2620_v52  ;;  %v6056_v63 = vpack.c.b16 %v3052_v47, %v3051_v39  ;;  %v2254_v29 = vpack.c.bf16 %v2200_v2, %v2200_v2  ;;  %v2470_v30 = vor.u32 %v2469_v53, %v6051_v16 }
 0x301   : > { %v2054_v43 = vadd.f32 %v5898_v41, %v2018_v17  ;;  %v7015_v21 = vsel %vm4262_vm4, %v6003_v50, %v5962_v46  ;;  %v2624_v47 = vrot.slane %v2622_v3, 4  ;;  %v2627_v11 = vrot.slane %v2625_v44, 5 }
 0x302   : > { %v6061_v38 = vpack.c.b16 %v2972_v6, %v2971_v19  ;;  %v2957_v54 = vunpack.c.l.b16 %v7015_v21  ;;  %v7016_v49 = vunpack.c.l.b16 %v5994_v48  ;;  %v7017_v15 = vunpack.c.l.b16 %v5998_v7 }
 0x303   : > { %v2086_v18 = vmax.f32 %v2054_v43, 0.0  ;;  %v2768_v17 = vrot.slane %v5783_v40, 5  ;;  %v2460_v3 = vor.u32 %v2459_v1, %v2456_v58  ;;  %v2471_v48 = vrot.slane %v2470_v30, 4 }
 0x304   : > { %3093 = vrot.lane.b32.xlu1 %v6059_v60, %s4166_s8  ;;  %3124 = vrot.lane.b32.xlu2 %v5779_v35, %s4167_s9  ;;  %v6077_v8 = vpack.c.b16 %v7017_v15, %v7016_v49  ;;  %v2220_v9 = vld [vmem:[#allocation3 + $0x158] sm:$0xff]  ;;  %v2221_v53 = vld [vmem:[#allocation3 + $0x160] sm:$0x3]  ;;  %v6082_v46 = vpack.c.b16 %v2958_v61, %v2957_v54  ;;  %v2473_v44 = vshll.u32 %v2254_v29, 16  ;;  %v2925_v7 = vunpack.c.l.b16 %v2273_v14 }
 0x305   : > { %2173 = vst.msk [vmem:[#allocation3 + $0x169] sm:$0xff] %vm280_vm0, %v2086_v18  ;;  %3019 = vrot.lane.b32.xlu0 %v6061_v38, %s4165_s26  ;;  %v2274_v50 = vpack.c.bf16 %v2220_v9, %v2220_v9  ;;  %v2275_v39 = vpack.c.bf16 %v2221_v53, %v2221_v53  ;;  %v2628_v20 = vor.u32 %v2627_v11, %v2624_v47  ;;  %v4075_v21 = vrot.slane %v2273_v14, 9 }
 0x306   : > { %v1978_v52 = vpop.f32.mrf.mxu2  ;;  %v2770_v9 = vrot.slane %v2768_v17, 4 }
 0x307   : > { %v2019_v2 = vmul.f32 %v5929_v10, %v1978_v52  ;;  %v2631_v19 = vshll.u32 %v2274_v50, 16  ;;  %v2635_v6 = vshrl.u32 %v2274_v50, 16  ;;  %v2641_v43 = vshll.u32 %v2275_v39, 16 }
 0x308   : > { %v2926_v18 = vunpack.c.l.b16 %v2274_v50  ;;  %v2817_v49 = vrot.slane %v2274_v50, 5  ;;  %v2820_v30 = vrot.slane %v2275_v39, 5  ;;  %v2629_v47 = vrot.slane %v2628_v20, 4 }
 0x309   : > { %v2055_v61 = vadd.f32 %v5898_v41, %v2019_v2  ;;  %v2633_v54 = vrot.slane %v2631_v19, 5  ;;  %v2637_v15 = vrot.slane %v2635_v6, 4  ;;  %v4068_v52 = vrot.slane %v5787_v23, 9 }
 0x30a   : > { %v6087_v40 = vpack.c.b16 %v2926_v18, %v2925_v7  ;;  %v2818_v58 = vsel %vm4804_vm7, %v4075_v21, %v2817_v49  ;;  %v2819_v1 = vrot.slane %v2817_v49, 4  ;;  %v2643_v14 = vrot.slane %v2641_v43, 5 }
 0x30b   : > { %v2087_v53 = vmax.f32 %v2055_v61, 0.0  ;;  %v2638_v11 = vor.u32 %v2637_v15, %v2633_v54  ;;  %v2475_v50 = vrot.slane %v2473_v44, 5  ;;  %v2771_v2 = vrot.slane %v2254_v29, 5 }
 0x30c   : > { %3005 = vrot.lane.b32.xlu2 %v6082_v46, %s4165_s26  ;;  %v2222_v19 = vld [vmem:[#allocation3 + $0x168] sm:$0xff]  ;;  %v2821_v7 = vsel %vm4804_vm7, %v2819_v1, %v2820_v30  ;;  %v2634_v39 = vsel %vm4262_vm4, %v2629_v47, %v2633_v54  ;;  %v2461_v21 = vrot.slane %v2460_v3, 4  ;;  %v3053_v43 = vunpack.c.l.b16 %v2818_v58 }
 0x30d   : > { %2174 = vst.msk [vmem:[#allocation3 + $0x171] sm:$0xff] %vm280_vm0, %v2087_v53  ;;  %3085 = vrot.lane.b32.xlu0 %v6077_v8, %s4166_s8  ;;  %v2639_v20 = vrot.slane %v2638_v11, 4  ;;  %v2276_v23 = vpack.c.bf16 %v2222_v19, %v2222_v19  ;;  %v3054_v6 = vunpack.c.l.b16 %v2821_v7  ;;  %v2476_v29 = vsel %vm4262_vm4, %v2471_v48, %v2475_v50 }
 0x30e   : > { %v1981_v18 = vpop.f32.mrf.mxu2  ;;  %v2772_v44 = vsel %vm4804_vm7, %v2770_v9, %v2771_v2  ;;  %v2973_v54 = vunpack.c.l.b16 %v2634_v39  ;;  %v2466_v48 = vsel %vm4262_vm4, %v2461_v21, %v6051_v16  ;;  %v2769_v9 = vsel %vm4804_vm7, %v4068_v52, %v2768_v17 }
 0x30f   : > { %v2020_v49 = vmul.f32 %v5929_v10, %v1981_v18  ;;  %v2644_v61 = vsel %vm4262_vm4, %v2639_v20, %v2643_v14  ;;  %v2646_v15 = vshrl.u32 %v2276_v23, 16  ;;  %v2649_v1 = vshll.u32 %v2276_v23, 16 }
 0x310   : > { %v2974_v30 = vunpack.c.l.b16 %v2644_v61  ;;  %v6108_v53 = vpack.c.b16 %v3054_v6, %v3053_v43  ;;  %v2960_v47 = vunpack.c.l.b16 %v2476_v29  ;;  %v3040_v11 = vunpack.c.l.b16 %v2772_v44 }
 0x311   : > { %v2056_v3 = vadd.f32 %v5898_v41, %v2020_v49  ;;  %v2648_v50 = vrot.slane %v2646_v15, 4  ;;  %v2651_v2 = vrot.slane %v2649_v1, 5  ;;  %v2959_v19 = vunpack.c.l.b16 %v2466_v48 }
 0x312   : > { %v6116_v58 = vpack.c.b16 %v2974_v30, %v2973_v54  ;;  %v3039_v7 = vunpack.c.l.b16 %v2769_v9  ;;  %v2775_v21 = vrot.slane %v5849_v34, 5  ;;  %v2927_v29 = vunpack.c.l.b16 %v2276_v23 }
 0x313   : > { %v2088_v14 = vmax.f32 %v2056_v3, 0.0  ;;  %v6125_v6 = vpack.c.b16 %v2960_v47, %v2959_v19  ;;  %v2652_v43 = vor.u32 %v2651_v2, %v2648_v50  ;;  %v4076_v54 = vrot.slane %v2276_v23, 9  ;;  %v2203_v47 = vld [vmem:[#allocation3 + $0xd0] sm:$0x3] }
 0x314   : > { %3229 = vrot.lane.b32.xlu2 %v5847_v26, %s4169_s11  ;;  %3021 = vrot.lane.b32.xlu1 %v6116_v58, %s4165_s26  ;;  %v2223_v39 = vld [vmem:[#allocation3 + $0x170] sm:$0xff]  ;;  %v2224_v16 = vld [vmem:[#allocation3 + $0x178] sm:$0x3]  ;;  %v6127_v18 = vpack.c.b16 %v3040_v11, %v3039_v7  ;;  %v2487_v11 = vshll.u32 %v5849_v34, 16  ;;  %v2491_v23 = vshrl.u32 %v5849_v34, 16  ;;  %v2777_v34 = vrot.slane %v2775_v21, 4 }
 0x315   : > { %2175 = vst.msk [vmem:[#allocation3 + $0x181] sm:$0xff] %vm280_vm0, %v2088_v14  ;;  %3091 = vrot.lane.b32.xlu0 %v5801_v45, %s4166_s8  ;;  %v2277_v17 = vpack.c.bf16 %v2223_v39, %v2223_v39  ;;  %v2278_v52 = vpack.c.bf16 %v2224_v16, %v2224_v16  ;;  %v2653_v7 = vrot.slane %v2652_v43, 4  ;;  %v2257_v16 = vpack.c.bf16 %v2203_v47, %v2203_v47 }
 0x316   : > { %v1983_v20 = vpop.f32.mrf.mxu2  ;;  %v2478_v43 = vshrl.u32 %v5857_v62, 16 }
 0x317   : > { %v2021_v44 = vmul.f32 %v5929_v10, %v1983_v20  ;;  %v2655_v49 = vshll.u32 %v2277_v17, 16  ;;  %v2659_v61 = vshrl.u32 %v2277_v17, 16  ;;  %v2665_v15 = vshll.u32 %v2278_v52, 16 }
 0x318   : > { %v2928_v1 = vunpack.c.l.b16 %v2277_v17  ;;  %v2824_v30 = vrot.slane %v2277_v17, 5  ;;  %v2827_v50 = vrot.slane %v2278_v52, 5 }
 0x319   : > { %v2057_v3 = vadd.f32 %v5898_v41, %v2021_v44  ;;  %v2657_v48 = vrot.slane %v2655_v49, 5  ;;  %v2661_v9 = vrot.slane %v2659_v61, 4  ;;  %v2667_v41 = vrot.slane %v2665_v15, 5 }
 0x31a   : > { %v6133_v14 = vpack.c.b16 %v2928_v1, %v2927_v29  ;;  %v2825_v19 = vsel %vm4804_vm7, %v4076_v54, %v2824_v30  ;;  %v2826_v10 = vrot.slane %v2824_v30, 4  ;;  %v2481_v49 = vshll.u32 %v5857_v62, 16 }
 0x31b   : > { %v2089_v2 = vmax.f32 %v2057_v3, 0.0  ;;  %v2662_v39 = vor.u32 %v2661_v9, %v2657_v48  ;;  %v2658_v52 = vsel %vm4262_vm4, %v2653_v7, %v2657_v48  ;;  %v3055_v29 = vunpack.c.l.b16 %v2825_v19 }
 0x31c   : > { %3087 = vrot.lane.b32.xlu1 %v6127_v18, %s4166_s8  ;;  %v2828_v17 = vsel %vm4804_vm7, %v2826_v10, %v2827_v50  ;;  %v2489_v15 = vrot.slane %v2487_v11, 5  ;;  %v2493_v1 = vrot.slane %v2491_v23, 4  ;;  %v2975_v30 = vunpack.c.l.b16 %v2658_v52  ;;  %v2994_v52 = vpop.permute.xlu2 %2993 }
 0x31d   : > { %2176 = vst.msk [vmem:[#allocation3 + $0x189] sm:$0xff] %vm280_vm0, %v2089_v2  ;;  %3007 = vrot.lane.b32.xlu0 %v6125_v6, %s4165_s26  ;;  %v2663_v20 = vrot.slane %v2662_v39, 4  ;;  %v3056_v44 = vunpack.c.l.b16 %v2828_v17  ;;  %v2778_v9 = vrot.slane %v2257_v16, 5  ;;  %v4069_v48 = vrot.slane %v5857_v62, 9 }
 0x31e   : > { %v2480_v10 = vrot.slane %v2478_v43, 4  ;;  %v2483_v50 = vrot.slane %v2481_v49, 5  ;;  %v2494_v2 = vor.u32 %v2493_v1, %v2489_v15  ;;  %v2497_v7 = vshll.u32 %v2257_v16, 16 }
 0x31f   : > { %v2668_v61 = vsel %vm4262_vm4, %v2663_v20, %v2667_v41  ;;  %v6151_v54 = vpack.c.b16 %v3056_v44, %v3055_v29  ;;  %v2779_v19 = vsel %vm4804_vm7, %v2777_v34, %v2778_v9  ;;  %v2776_v11 = vsel %vm4804_vm7, %v4069_v48, %v2775_v21 }
 0x320   : > { %v2976_v3 = vunpack.c.l.b16 %v2668_v61  ;;  %v3042_v62 = vunpack.c.l.b16 %v2779_v19  ;;  %v2484_v39 = vor.u32 %v2483_v50, %v2480_v10  ;;  %v2495_v23 = vrot.slane %v2494_v2, 4 }
 0x321   : > { %v3041_v41 = vunpack.c.l.b16 %v2776_v11  ;;  %v2499_v17 = vrot.slane %v2497_v7, 5  ;;  %v2898_v48 = vunpack.c.l.b16 %v5590_v5  ;;  %v7018_v11 = vld [vmem:[#allocation16_spill] sm:$0xff] }
 0x322   : > { %v6153_v47 = vpack.c.b16 %v2976_v3, %v2975_v30  ;;  %v2485_v29 = vrot.slane %v2484_v39, 4  ;;  %v6212_v30 = vpop.permute.xlu1 %2997  ;;  %v7020_v39 = vld [vmem:[#allocation24_spill] sm:$0xff] }
 0x323   : > { %v6166_v20 = vpack.c.b16 %v3042_v62, %v3041_v41  ;;  %v2500_v44 = vsel %vm4262_vm4, %v2495_v23, %v2499_v17 }
 0x324   : > { %3194 = vrot.lane.b32.xlu1 %v5801_v45, %s4170_s12  ;;  %3023 = vrot.lane.b32.xlu2 %v6153_v47, %s4165_s26  ;;  %v2490_v21 = vsel %vm4262_vm4, %v2485_v29, %v2489_v15  ;;  %v2962_v16 = vunpack.c.l.b16 %v2500_v44  ;;  %v6180_v49 = vpop.permute.xlu2 %2999  ;;  %v6196_v15 = vpop.permute.xlu0 %2995 }
 0x325   : > { %3159 = vrot.lane.b32.xlu0 %v5803_v57, %s4168_s10  ;;  %v2961_v34 = vunpack.c.l.b16 %v2490_v21 }
 0x327   : > { %v6178_v43 = vpack.c.b16 %v2962_v16, %v2961_v34 }
 0x32c   : > { %3299 = vrot.lane.b32.xlu1 %v6059_v60, %s4172_s14  ;;  %3089 = vrot.lane.b32.xlu2 %v6166_v20, %s4166_s8  ;;  %v6188_v61 = vpop.permute.xlu2 %3011 }
 0x32d   : > { %3264 = vrot.lane.b32.xlu0 %v5874_v37, %s4171_s13 }
 0x334   : > { %3009 = vrot.lane.b32.xlu1 %v6178_v43, %s4165_s26  ;;  %3108 = vrot.lane.b32.xlu2 %v5618_v0, %s4167_s9 }
 0x335   : > { %3143 = vrot.lane.b32.xlu0 %v5631_v59, %s4168_s10  ;;  %v6204_v59 = vpop.permute.xlu2 %3077 }
 0x33c   : > { %3178 = vrot.lane.b32.xlu1 %v5644_v56, %s4170_s12  ;;  %3213 = vrot.lane.b32.xlu2 %v5653_v51, %s4169_s11 }
 0x33d   : > { %3248 = vrot.lane.b32.xlu0 %v5671_v4, %s4171_s13 }
 0x344   : > { %3283 = vrot.lane.b32.xlu1 %v5668_v32, %s4172_s14  ;;  %3126 = vrot.lane.b32.xlu2 %v5847_v26, %s4167_s9 }
 0x345   : > { %3161 = vrot.lane.b32.xlu0 %v5874_v37, %s4168_s10  ;;  %v2897_v37 = vunpack.c.l.b16 %v5588_v27 }
 0x346   : > { %v3014_v56 = vpop.permute.xlu0 %3013 }
 0x347   : > { %v3347_v1 = vsel %vm280_vm0, %v5847_v26, %v3014_v56  ;;  %v2929_v19 = vpack.c.b16 %v2898_v48, %v2897_v37 }
 0x349   : > { %v3317_v10 = vsel %vm280_vm0, %v2929_v19, %v2994_v52 }
 0x34c   : > { %3196 = vrot.lane.b32.xlu1 %v6059_v60, %s4170_s12  ;;  %3231 = vrot.lane.b32.xlu2 %v5903_v55, %s4169_s11 }
 0x34d   : > { %3266 = vrot.lane.b32.xlu0 %v5942_v25, %s4171_s13 }
 0x34e   : > { %v3018_v3 = vpop.permute.xlu2 %3017  ;;  %v3002_v9 = vpop.permute.xlu0 %3001 }
 0x34f   : > { %v6220_v26 = vsel %vm280_vm0, %v5967_v28, %v3018_v3 }
 0x354   : > { %3301 = vrot.lane.b32.xlu1 %v5934_v31, %s4172_s14  ;;  %3110 = vrot.lane.b32.xlu2 %v5653_v51, %s4167_s9 }
 0x355   : > { %3145 = vrot.lane.b32.xlu0 %v5671_v4, %s4168_s10  ;;  %v7019_v4 = vld [vmem:[#allocation26_spill] sm:$0xff] }
 0x356   : > { %v3016_v60 = vpop.permute.xlu1 %3015  ;;  %v3074_v5 = vpop.permute.xlu0 %3073 }
 0x357   : > { %v6231_v27 = vsel %vm280_vm0, %v5903_v55, %v3016_v60  ;;  %v3084_v50 = vpop.permute.xlu2 %3083  ;;  %v6234_v2 = vsel %vm1593_vm10, %v3317_v10, %v3074_v5  ;;  %v7023_v60 = vld [vmem:[#allocation23_spill] sm:$0xff]  ;;  %v7025_v5 = vld [vmem:[#allocation4_spill] sm:$0xff] }
 0x35c   : > { %3180 = vrot.lane.b32.xlu1 %v5668_v32, %s4170_s12  ;;  %3215 = vrot.lane.b32.xlu2 %v7018_v11, %s4169_s11  ;;  %v7021_v32 = vld [vmem:[#allocation25_spill] sm:$0xff] }
 0x35d   : > { %3250 = vrot.lane.b32.xlu0 %v7019_v4, %s4171_s13  ;;  %v3329_v23 = vsel %vm280_vm0, %v7021_v32, %v3002_v9  ;;  %v3595_v9 = vld [vmem:[%s6838_s4 + $0x20] sm:$0xf] }
 0x35e   : > { %v6242_v7 = vpop.permute.xlu1 %3075  ;;  %v6263_v29 = vpop.permute.xlu0 %3079  ;;  %v3613_v48 = vunpack.c.l.b16 %v3595_v9 }
 0x35f   : > { %v6244_v62 = vpop.permute.xlu2 %3124 }
 0x360   : > { %v3618_v19 = vpack.c.b16 %v3613_v48, %v3613_v48 }
 0x364   : > { %3285 = vrot.lane.b32.xlu1 %v7020_v39, %s4172_s14  ;;  %3128 = vrot.lane.b32.xlu2 %v5903_v55, %s4167_s9 }
 0x365   : > { %3163 = vrot.lane.b32.xlu0 %v5942_v25, %s4168_s10  ;;  %v7022_v25 = vld [vmem:[#allocation27_spill] sm:$0xff] }
 0x366   : > { %v3082_v41 = vpop.permute.xlu1 %3081 }
 0x367   : > { %v6255_v17 = vsel %vm1593_vm10, %v3329_v23, %v3082_v41  ;;  %v3006_v52 = vpop.permute.xlu2 %3005  ;;  %v4121_v41 = vld [vmem:[%s6838_s4 + $0x10] sm:$0xff] }
 0x36c   : > { %3198 = vrot.lane.b32.xlu1 %v5934_v31, %s4170_s12  ;;  %3233 = vrot.lane.b32.xlu2 %v5967_v28, %s4169_s11 }
 0x36d   : > { %3268 = vrot.lane.b32.xlu0 %v6000_v42, %s4171_s13 }
 0x36e   : > { %v3004_v55 = vpop.permute.xlu1 %3003 }
 0x36f   : > { %v3332_v44 = vsel %vm280_vm0, %v7022_v25, %v3004_v55  ;;  %v6276_v16 = vpop.permute.xlu2 %3229  ;;  %v7027_v55 = vld [vmem:[#allocation8_spill] sm:$0xff] }
 0x370   : > { %v6268_v21 = vsel %vm1593_vm10, %v3332_v44, %v3084_v50  ;;  %v3335_v50 = vsel %vm280_vm0, %v7025_v5, %v3006_v52 }
 0x374   : > { %3303 = vrot.lane.b32.xlu1 %v5987_v33, %s4172_s14  ;;  %3112 = vrot.lane.b32.xlu2 %v7018_v11, %s4167_s9 }
 0x375   : > { %3147 = vrot.lane.b32.xlu0 %v7019_v4, %s4168_s10 }
 0x376   : > { %v3094_v34 = vpop.permute.xlu1 %3093 }
 0x377   : > { %v6279_v56 = vsel %vm1593_vm10, %v3347_v1, %v3094_v34  ;;  %v3020_v3 = vpop.permute.xlu0 %3019  ;;  %v3656_v1 = vsel %vm1893_vm8, %v3618_v19, 0  ;;  %v7028_v19 = vld [vmem:[#allocation19_spill] sm:$0xff] }
 0x378   : > { %v6286_v37 = vsel %vm280_vm0, %v6033_v12, %v3020_v3  ;;  %4128 = vmatpush.bf16.msra.mxu3 %v3656_v1  ;;  %3661 = vmatpush.bf16.msra.mxu1 %v3656_v1  ;;  %v4120_v3 = vld [vmem:[%s6838_s4 + $0x8] sm:$0xff] }
 0x37c   : > { %3182 = vrot.lane.b32.xlu1 %v7020_v39, %s4170_s12  ;;  %3217 = vrot.lane.b32.xlu2 %v7021_v32, %s4169_s11  ;;  %v4122_v39 = vld [vmem:[%s6838_s4 + $0x18] sm:$0xff] }
 0x37d   : > { %3252 = vrot.lane.b32.xlu0 %v7023_v60, %s4171_s13  ;;  %4129 = vmatpush.bf16.msra.mxu3 %v4122_v39 }
 0x37e   : > { %v6295_v10 = vpop.permute.xlu2 %3023  ;;  %3662 = vmatpush.bf16.msra.mxu1 %v4122_v39 }
 0x37f   : > { %7024 = vst [vmem:[#allocation12_spill] sm:$0xff] %v6295_v10  ;;  %v3086_v4 = vpop.permute.xlu0 %3085 }
 0x380   : > { %v6303_v23 = vsel %vm1593_vm10, %v3335_v50, %v3086_v4 }
 0x381   : > { %7026 = vst [vmem:[#allocation18_spill] sm:$0xff] %v6303_v23  ;;  %4130 = vmatpush.bf16.msra.mxu3 %v4121_v41 }
 0x382   : > { %3663 = vmatpush.bf16.msra.mxu1 %v4121_v41 }
 0x384   : > { %3287 = vrot.lane.b32.xlu1 %v7027_v55, %s4172_s14  ;;  %3095 = vrot.lane.b32.xlu2 %v5934_v31, %s4166_s8  ;;  %v4119_v31 = vld [vmem:[%s6838_s4] sm:$0xff] }
 0x385   : > { %3130 = vrot.lane.b32.xlu0 %v5967_v28, %s4167_s9  ;;  %4131 = vmatpush.bf16.msra.mxu3 %v4120_v3 }
 0x386   : > { %v6314_v52 = vpop.permute.xlu1 %3021  ;;  %v3090_v44 = vpop.permute.xlu2 %3089  ;;  %3664 = vmatpush.bf16.msra.mxu1 %v4120_v3 }
 0x387   : > { %v6316_v34 = vpop.permute.xlu0 %3091 }
 0x389   : > { %4132 = vmatpush.bf16.msra.mxu3 %v4119_v31 }
 0x38a   : > { %3665 = vmatpush.bf16.msra.mxu1 %v4119_v31 }
 0x38c   : > { %3165 = vrot.lane.b32.xlu1 %v6000_v42, %s4168_s10  ;;  %3200 = vrot.lane.b32.xlu2 %v5987_v33, %s4170_s12 }
 0x38d   : > { %3235 = vrot.lane.b32.xlu0 %v6033_v12, %s4169_s11 }
 0x38e   : > { %v3088_v28 = vpop.permute.xlu1 %3087  ;;  %v3109_v9 = vpop.permute.xlu2 %3108 }
 0x38f   : > { %v3008_v48 = vpop.permute.xlu0 %3007 }
 0x390   : > { %v3338_v1 = vsel %vm280_vm0, %v7028_v19, %v3008_v48 }
 0x391   : > { %v6333_v42 = vsel %vm1593_vm10, %v3338_v1, %v3088_v28  ;;  %v7030_v28 = vld [vmem:[#allocation11_spill] sm:$0xff] }
 0x392   : > { %7029 = vst [vmem:[#allocation15_spill] sm:$0xff] %v6333_v42 }
 0x394   : > { %3270 = vrot.lane.b32.xlu1 %v6061_v38, %s4171_s13  ;;  %3305 = vrot.lane.b32.xlu2 %v6056_v63, %s4172_s14 }
 0x395   : > { %3114 = vrot.lane.b32.xlu0 %v7021_v32, %s4167_s9 }
 0x396   : > { %v3195_v50 = vpop.permute.xlu1 %3194  ;;  %v3214_v4 = vpop.permute.xlu2 %3213 }
 0x397   : > { %v3160_v39 = vpop.permute.xlu0 %3159 }
 0x39c   : > { %3149 = vrot.lane.b32.xlu1 %v7023_v60, %s4168_s10  ;;  %3184 = vrot.lane.b32.xlu2 %v7027_v55, %s4170_s12 }
 0x39d   : > { %3219 = vrot.lane.b32.xlu0 %v7022_v25, %s4169_s11 }
 0x39e   : > { %v3300_v41 = vpop.permute.xlu1 %3299  ;;  %v3127_v3 = vpop.permute.xlu2 %3126 }
 0x39f   : > { %v3265_v31 = vpop.permute.xlu0 %3264 }
 0x3a4   : > { %3254 = vrot.lane.b32.xlu1 %v6009_v36, %s4171_s13  ;;  %3289 = vrot.lane.b32.xlu2 %v5990_v22, %s4172_s14 }
 0x3a5   : > { %3097 = vrot.lane.b32.xlu0 %v5987_v33, %s4166_s8 }
 0x3a6   : > { %v3010_v32 = vpop.permute.xlu1 %3009  ;;  %v3232_v60 = vpop.permute.xlu2 %3231 }
 0x3a7   : > { %v3341_v55 = vsel %vm280_vm0, %v7030_v28, %v3010_v32  ;;  %v3144_v48 = vpop.permute.xlu0 %3143 }
 0x3a8   : > { %v3380_v1 = vsel %vm1593_vm10, %v3341_v55, %v3090_v44 }
 0x3a9   : > { %v3412_v42 = vsel %vm1626_vm9, %v3380_v1, %v6244_v62  ;;  %v3396_v62 = vsel %vm1626_vm9, %v6234_v2, %v3109_v9 }
 0x3aa   : > { %v3444_v10 = vsel %vm1659_vm12, %v3412_v42, %v3160_v39 }
 0x3ab   : > { %v3476_v23 = vsel %vm1692_vm11, %v3444_v10, %v3195_v50 }
 0x3ac   : > { %3132 = vrot.lane.b32.xlu1 %v6033_v12, %s4167_s9  ;;  %3167 = vrot.lane.b32.xlu2 %v6061_v38, %s4168_s10  ;;  %v3508_v33 = vsel %vm1725_vm13, %v3476_v23, %v6276_v16  ;;  %v3428_v12 = vsel %vm1659_vm12, %v3396_v62, %v3144_v48 }
 0x3ad   : > { %3202 = vrot.lane.b32.xlu0 %v6056_v63, %s4170_s12  ;;  %v3540_v44 = vsel %vm1758_vm14, %v3508_v33, %v3265_v31 }
 0x3ae   : > { %v3179_v42 = vpop.permute.xlu1 %3178  ;;  %v3111_v39 = vpop.permute.xlu2 %3110  ;;  %v3572_v10 = vsel %vm1791_vm15, %v3540_v44, %v3300_v41 }
 0x3af   : > { %v3249_v50 = vpop.permute.xlu0 %3248  ;;  %4103 = vmatmul.msk.bf16.vlgmr.msra.gmra.mxu3 %vm1860_vm1, %v3572_v10  ;;  %v3460_v38 = vsel %vm1692_vm11, %v3428_v12, %v3179_v42 }
 0x3b0   : > { %v3492_v16 = vsel %vm1725_vm13, %v3460_v38, %v3214_v4  ;;  %v3344_v4 = vsel %vm280_vm0, %v5779_v35, %v6188_v61 }
 0x3b1   : > { %v3524_v2 = vsel %vm1758_vm14, %v3492_v16, %v3249_v50  ;;  %v3382_v32 = vsel %vm1593_vm10, %v3344_v4, %v6316_v34 }
 0x3b2   : > { %v3414_v55 = vsel %vm1626_vm9, %v3382_v32, %v3127_v3 }
 0x3b4   : > { %3237 = vrot.lane.b32.xlu1 %v6087_v40, %s4169_s11  ;;  %3272 = vrot.lane.b32.xlu2 %v6116_v58, %s4171_s13 }
 0x3b5   : > { %3307 = vrot.lane.b32.xlu0 %v6108_v53, %s4172_s14 }
 0x3b6   : > { %v3284_v23 = vpop.permute.xlu1 %3283  ;;  %v3216_v9 = vpop.permute.xlu2 %3215 }
 0x3b7   : > { %v3162_v41 = vpop.permute.xlu0 %3161  ;;  %v3556_v31 = vsel %vm1791_vm15, %v3524_v2, %v3284_v23  ;;  %v2226_v23 = vld [vmem:[#allocation3 + $0x188] sm:$0xff] }
 0x3b8   : > { %4095 = vmatmul.msk.bf16.vlgmr.msra.gmra.mxu1 %vm1860_vm1, %v3556_v31  ;;  %v3446_v33 = vsel %vm1659_vm12, %v3414_v55, %v3162_v41  ;;  %v2225_v55 = vld [vmem:[#allocation3 + $0x180] sm:$0xff] }
 0x3bc   : > { %3116 = vrot.lane.b32.xlu1 %v7022_v25, %s4167_s9  ;;  %3151 = vrot.lane.b32.xlu2 %v6009_v36, %s4168_s10 }
 0x3bd   : > { %3186 = vrot.lane.b32.xlu0 %v5990_v22, %s4170_s12 }
 0x3be   : > { %v3197_v48 = vpop.permute.xlu1 %3196  ;;  %v3129_v1 = vpop.permute.xlu2 %3128 }
 0x3bf   : > { %v3267_v44 = vpop.permute.xlu0 %3266  ;;  %v3478_v61 = vsel %vm1692_vm11, %v3446_v33, %v3197_v48  ;;  %v2280_v48 = vpack.c.bf16 %v2226_v23, %v2226_v23 }
 0x3c0   : > { %v3510_v25 = vsel %vm1725_vm13, %v3478_v61, %v3232_v60  ;;  %v3320_v60 = vsel %vm280_vm0, %v5618_v0, %v6196_v15 }
 0x3c1   : > { %v3542_v22 = vsel %vm1758_vm14, %v3510_v25, %v3267_v44  ;;  %v3366_v42 = vsel %vm1593_vm10, %v3320_v60, %v6242_v7  ;;  %v2279_v44 = vpack.c.bf16 %v2225_v55, %v2225_v55  ;;  %v2839_v61 = vshll.u32 %v2280_v48, 16 }
 0x3c2   : > { %v3398_v10 = vsel %vm1626_vm9, %v3366_v42, %v3111_v39  ;;  %v2843_v25 = vshrl.u32 %v2280_v48, 16 }
 0x3c3   : > { %v2841_v60 = vrot.slane %v2839_v61, 5 }
 0x3c4   : > { %3221 = vrot.lane.b32.xlu1 %v7025_v5, %s4169_s11  ;;  %3256 = vrot.lane.b32.xlu2 %v6082_v46, %s4171_s13  ;;  %v2845_v42 = vrot.slane %v2843_v25, 4 }
 0x3c5   : > { %3291 = vrot.lane.b32.xlu0 %v6077_v8, %s4172_s14 }
 0x3c6   : > { %v3302_v36 = vpop.permute.xlu1 %3301  ;;  %v3234_v34 = vpop.permute.xlu2 %3233 }
 0x3c7   : > { %v3146_v3 = vpop.permute.xlu0 %3145  ;;  %v3574_v62 = vsel %vm1791_vm15, %v3542_v22, %v3302_v36  ;;  %v2227_v22 = vld [vmem:[#allocation3 + $0x190] sm:$0x3]  ;;  %v2830_v36 = vshrl.u32 %v2279_v44, 16 }
 0x3c8   : > { %4104 = vmatmul.msk.bf16.gmra.mxu3 %vm1860_vm1, %v3574_v62  ;;  %v3430_v38 = vsel %vm1659_vm12, %v3398_v10, %v3146_v3  ;;  %v2833_v3 = vshll.u32 %v2279_v44, 16 }
 0x3c9   : > { %v2832_v10 = vrot.slane %v2830_v36, 4 }
 0x3cc   : > { %3099 = vrot.lane.b32.xlu1 %v6056_v63, %s4166_s8  ;;  %3134 = vrot.lane.b32.xlu2 %v6087_v40, %s4167_s9 }
 0x3cd   : > { %3169 = vrot.lane.b32.xlu0 %v6116_v58, %s4168_s10 }
 0x3ce   : > { %v3181_v12 = vpop.permute.xlu1 %3180  ;;  %v3113_v50 = vpop.permute.xlu2 %3112 }
 0x3cf   : > { %v3251_v16 = vpop.permute.xlu0 %3250  ;;  %v3462_v0 = vsel %vm1692_vm11, %v3430_v38, %v3181_v12  ;;  %v2835_v12 = vrot.slane %v2833_v3, 5  ;;  %v2858_v38 = vrot.slane %v2280_v48, 5 }
 0x3d0   : > { %v3494_v63 = vsel %vm1725_vm13, %v3462_v0, %v3216_v9  ;;  %v3416_v9 = vsel %vm1626_vm9, %v6279_v56, %v3129_v1  ;;  %v3323_v0 = vsel %vm280_vm0, %v5653_v51, %v6212_v30 }
 0x3d1   : > { %v3526_v58 = vsel %vm1758_vm14, %v3494_v63, %v3251_v16  ;;  %v2846_v16 = vor.u32 %v2845_v42, %v2841_v60  ;;  %v3368_v63 = vsel %vm1593_vm10, %v3323_v0, %v6204_v59  ;;  %v2836_v23 = vor.u32 %v2835_v12, %v2832_v10  ;;  %v2228_v12 = vld [vmem:[#allocation3 + $0x198] sm:$0xff] }
 0x3d4   : > { %3204 = vrot.lane.b32.xlu1 %v6108_v53, %s4170_s12  ;;  %3239 = vrot.lane.b32.xlu2 %v6133_v14, %s4169_s11 }
 0x3d5   : > { %3274 = vrot.lane.b32.xlu0 %v6153_v47, %s4171_s13 }
 0x3d6   : > { %v3286_v15 = vpop.permute.xlu1 %3285  ;;  %v3218_v7 = vpop.permute.xlu2 %3217 }
 0x3d7   : > { %v3164_v39 = vpop.permute.xlu0 %3163  ;;  %v3558_v2 = vsel %vm1791_vm15, %v3526_v58, %v3286_v15  ;;  %v3400_v15 = vsel %vm1626_vm9, %v3368_v63, %v3113_v50 }
 0x3d8   : > { %4096 = vmatmul.msk.bf16.gmra.mxu1 %vm1860_vm1, %v3558_v2  ;;  %v3448_v4 = vsel %vm1659_vm12, %v3416_v9, %v3164_v39  ;;  %v3106_v9 = vunpack.c.l.b16 %v2280_v48 }
 0x3dc   : > { %3309 = vrot.lane.b32.xlu1 %v6151_v54, %s4172_s14  ;;  %3118 = vrot.lane.b32.xlu2 %v7025_v5, %s4167_s9 }
 0x3dd   : > { %3153 = vrot.lane.b32.xlu0 %v6082_v46, %s4168_s10 }
 0x3de   : > { %v3199_v41 = vpop.permute.xlu1 %3198  ;;  %v6441_v31 = vpop.permute.xlu2 %3095 }
 0x3df   : > { %v3269_v32 = vpop.permute.xlu0 %3268  ;;  %v3480_v33 = vsel %vm1692_vm11, %v3448_v4, %v3199_v41  ;;  %v2860_v41 = vrot.slane %v2858_v38, 4  ;;  %v2847_v4 = vrot.slane %v2846_v16, 4  ;;  %v3386_v0 = vsel %vm1593_vm10, %v6231_v27, %v6441_v31 }
 0x3e0   : > { %v3512_v5 = vsel %vm1725_vm13, %v3480_v33, %v3234_v34  ;;  %v4077_v33 = vrot.slane %v2279_v44, 9 }
 0x3e1   : > { %v3544_v46 = vsel %vm1758_vm14, %v3512_v5, %v3269_v32  ;;  %v3105_v32 = vunpack.c.l.b16 %v2279_v44  ;;  %v2837_v5 = vrot.slane %v2836_v23, 4 }
 0x3e3   : > { %v6474_v50 = vpack.c.b16 %v3106_v9, %v3105_v32  ;;  %v2842_v48 = vsel %vm4262_vm4, %v2837_v5, %v2841_v60  ;;  %v6502_v60 = vpack.c.bf16 %v2228_v12, %v2228_v12 }
 0x3e4   : > { %3188 = vrot.lane.b32.xlu1 %v6077_v8, %s4170_s12  ;;  %3223 = vrot.lane.b32.xlu2 %v7028_v19, %s4169_s11  ;;  %v2281_v8 = vpack.c.bf16 %v2227_v22, %v2227_v22  ;;  %v3140_v42 = vunpack.c.l.b16 %v2842_v48  ;;  %v3326_v48 = vsel %vm280_vm0, %v7018_v11, %v6180_v49 }
 0x3e5   : > { %3258 = vrot.lane.b32.xlu0 %v6125_v6, %s4171_s13 }
 0x3e6   : > { %v3304_v56 = vpop.permute.xlu1 %3303  ;;  %v6453_v1 = vpop.permute.xlu2 %3200  ;;  %v2849_v58 = vshll.u32 %v2281_v8, 16  ;;  %v2861_v59 = vrot.slane %v2281_v8, 5 }
 0x3e7   : > { %v3148_v34 = vpop.permute.xlu0 %3147  ;;  %v3576_v62 = vsel %vm1791_vm15, %v3544_v46, %v3304_v56 }
 0x3e8   : > { %4105 = vmatmul.msk.bf16.gmra.mxu3 %vm1860_vm1, %v3576_v62  ;;  %v3432_v51 = vsel %vm1659_vm12, %v3400_v15, %v3148_v34  ;;  %v2851_v55 = vrot.slane %v2849_v58, 5  ;;  %v2862_v25 = vsel %vm4804_vm7, %v2860_v41, %v2861_v59 }
 0x3e9   : > { %v3176_v36 = vunpack.c.l.b16 %v2862_v25 }
 0x3ea   : > { %v2852_v46 = vsel %vm4262_vm4, %v2847_v4, %v2851_v55 }
 0x3eb   : > { %v3141_v3 = vunpack.c.l.b16 %v2852_v46 }
 0x3ec   : > { %3293 = vrot.lane.b32.xlu1 %v6127_v18, %s4172_s14  ;;  %3101 = vrot.lane.b32.xlu2 %v6108_v53, %s4166_s8 }
 0x3ed   : > { %3136 = vrot.lane.b32.xlu0 %v6133_v14, %s4167_s9  ;;  %v3142_v10 = vpack.c.b16 %v3141_v3, %v3140_v42 }
 0x3ee   : > { %v3183_v39 = vpop.permute.xlu1 %3182  ;;  %v6469_v2 = vpop.permute.xlu2 %3305 }
 0x3ef   : > { %v3253_v30 = vpop.permute.xlu0 %3252  ;;  %v3464_v53 = vsel %vm1692_vm11, %v3432_v51, %v3183_v39  ;;  %v2230_v51 = vld [vmem:[#allocation3 + $0x1a8] sm:$0x3] }
 0x3f0   : > { %v3496_v61 = vsel %vm1725_vm13, %v3464_v53, %v3218_v7  ;;  %v2859_v7 = vsel %vm4804_vm7, %v4077_v33, %v2858_v38  ;;  %v2229_v38 = vld [vmem:[#allocation3 + $0x1a0] sm:$0xff]  ;;  %v2284_v31 = vpack.c.bf16 %v2230_v51, %v2230_v51 }
 0x3f1   : > { %v3528_v44 = vsel %vm1758_vm14, %v3496_v61, %v3253_v30  ;;  %v3175_v62 = vunpack.c.l.b16 %v2859_v7  ;;  %v6504_v16 = vpack.c.bf16 %v2229_v38, %v2229_v38  ;;  %v2864_v30 = vshrl.u32 %v6502_v60, 16 }
 0x3f2   : > { %v2883_v46 = vshll.u32 %v2284_v31, 16  ;;  %v2895_v42 = vrot.slane %v2284_v31, 5 }
 0x3f3   : > { %v6495_v8 = vpack.c.b16 %v3176_v36, %v3175_v62  ;;  %v2873_v9 = vshll.u32 %v6504_v16, 16  ;;  %v2877_v41 = vshrl.u32 %v6504_v16, 16  ;;  %v2866_v4 = vrot.slane %v2864_v30, 4 }
 0x3f4   : > { %3171 = vrot.lane.b32.xlu1 %v6153_v47, %s4168_s10  ;;  %3206 = vrot.lane.b32.xlu2 %v6151_v54, %s4170_s12  ;;  %v2892_v7 = vrot.slane %v6504_v16, 5  ;;  %v3370_v36 = vsel %vm1593_vm10, %v3326_v48, %v6263_v29  ;;  %v3211_v13 = vunpack.c.l.b16 %v6504_v16 }
 0x3f5   : > { %3241 = vrot.lane.b32.xlu0 %v6474_v50, %s4169_s11  ;;  %v2875_v32 = vrot.slane %v2873_v9, 5  ;;  %v2879_v59 = vrot.slane %v2877_v41, 4 }
 0x3f6   : > { %v3288_v56 = vpop.permute.xlu1 %3287  ;;  %v6491_v22 = vpop.permute.xlu2 %3184  ;;  %v2894_v62 = vrot.slane %v2892_v7, 4 }
 0x3f7   : > { %v3131_v47 = vpop.permute.xlu0 %3130  ;;  %v3560_v34 = vsel %vm1791_vm15, %v3528_v44, %v3288_v56  ;;  %v2880_v25 = vor.u32 %v2879_v59, %v2875_v32  ;;  %v2885_v56 = vrot.slane %v2883_v46, 5 }
 0x3f8   : > { %4097 = vmatmul.msk.bf16.gmra.mxu1 %vm1860_vm1, %v3560_v34  ;;  %v3418_v15 = vsel %vm1626_vm9, %v3386_v0, %v3131_v47  ;;  %v4078_v34 = vrot.slane %v6502_v60, 9  ;;  %v2896_v0 = vsel %vm4804_vm7, %v2894_v62, %v2895_v42 }
 0x3f9   : > { %v2881_v44 = vrot.slane %v2880_v25, 4  ;;  %v3281_v24 = vunpack.c.l.b16 %v2896_v0  ;;  %v3835_v25 = vld [vmem:[%s4459_s30 + $0x80] sm:$0xff] }
 0x3fa   : > { %v2893_v29 = vsel %vm4804_vm7, %v4078_v34, %v2892_v7 }
 0x3fb   : > { %v2886_v11 = vsel %vm4262_vm4, %v2881_v44, %v2885_v56  ;;  %v3280_v51 = vunpack.c.l.b16 %v2893_v29  ;;  %v3819_v56 = vld [vmem:[%s4459_s30] sm:$0xff]  ;;  %v3836_v29 = vld [vmem:[%s4459_s30 + $0x88] sm:$0xff] }
 0x3fc   : > { %3311 = vrot.lane.b32.xlu2 %v6495_v8, %s4172_s14  ;;  %3276 = vrot.lane.b32.xlu1 %v3142_v10, %s4171_s13 }
 0x3fd   : > { %3120 = vrot.lane.b32.xlu0 %v7028_v19, %s4167_s9  ;;  %v2867_v19 = vshll.u32 %v6502_v60, 16 }
 0x3fe   : > { %v3166_v63 = vpop.permute.xlu1 %3165  ;;  %v6509_v58 = vpop.permute.xlu2 %3289 }
 0x3ff   : > { %v3236_v39 = vpop.permute.xlu0 %3235  ;;  %v3450_v23 = vsel %vm1659_vm12, %v3418_v15, %v3166_v63  ;;  %v2869_v53 = vrot.slane %v2867_v19, 5 }
 0x400   : > { %v3482_v27 = vsel %vm1692_vm11, %v3450_v23, %v6453_v1  ;;  %v3210_v23 = vunpack.c.l.b16 %v6502_v60  ;;  %v3282_v60 = vpack.c.b16 %v3281_v24, %v3280_v51 }
 0x401   : > { %v3514_v55 = vsel %vm1725_vm13, %v3482_v27, %v3236_v39  ;;  %v3246_v39 = vunpack.c.l.b16 %v2886_v11 }
 0x402   : > { %v3212_v27 = vpack.c.b16 %v3211_v13, %v3210_v23  ;;  %v3820_v13 = vld [vmem:[%s4459_s30 + $0x8] sm:$0xff] }
 0x404   : > { %3190 = vrot.lane.b32.xlu2 %v6127_v18, %s4170_s12  ;;  %3155 = vrot.lane.b32.xlu1 %v6125_v6, %s4168_s10  ;;  %v2870_v6 = vor.u32 %v2869_v53, %v2866_v4 }
 0x405   : > { %3225 = vrot.lane.b32.xlu0 %v7030_v28, %s4169_s11 }
 0x406   : > { %v3271_v33 = vpop.permute.xlu1 %3270  ;;  %v3168_v5 = vpop.permute.xlu2 %3167 }
 0x407   : > { %v3546_v1 = vsel %vm1758_vm14, %v3514_v55, %v3271_v33  ;;  %v3115_v61 = vpop.permute.xlu0 %3114 }
 0x408   : > { %v3578_v18 = vsel %vm1791_vm15, %v3546_v1, %v6469_v2  ;;  %v2871_v2 = vrot.slane %v2870_v6, 4  ;;  %v3402_v12 = vsel %vm1626_vm9, %v3370_v36, %v3115_v61 }
 0x409   : > { %4106 = vmatmul.msk.bf16.gmra.mxu3 %vm1860_vm1, %v3578_v18 }
 0x40c   : > { %3295 = vrot.lane.b32.xlu2 %v6166_v20, %s4172_s14  ;;  %3260 = vrot.lane.b32.xlu1 %v6178_v43, %s4171_s13 }
 0x40d   : > { %3103 = vrot.lane.b32.xlu0 %v6151_v54, %s4166_s8  ;;  %v2876_v54 = vsel %vm4262_vm4, %v2871_v2, %v2875_v32 }
 0x40e   : > { %v3150_v3 = vpop.permute.xlu1 %3149  ;;  %v3273_v47 = vpop.permute.xlu2 %3272  ;;  %v3245_v15 = vunpack.c.l.b16 %v2876_v54 }
 0x40f   : > { %v3220_v38 = vpop.permute.xlu0 %3219  ;;  %v3434_v49 = vsel %vm1659_vm12, %v3402_v12, %v3150_v3 }
 0x410   : > { %v3466_v63 = vsel %vm1692_vm11, %v3434_v49, %v6491_v22  ;;  %v3247_v41 = vpack.c.b16 %v3246_v39, %v3245_v15 }
 0x411   : > { %v3498_v30 = vsel %vm1725_vm13, %v3466_v63, %v3220_v38 }
 0x414   : > { %3173 = vrot.lane.b32.xlu2 %v3142_v10, %s4168_s10  ;;  %3138 = vrot.lane.b32.xlu1 %v6474_v50, %s4167_s9 }
 0x415   : > { %3208 = vrot.lane.b32.xlu0 %v6495_v8, %s4170_s12 }
 0x416   : > { %v3255_v19 = vpop.permute.xlu1 %3254  ;;  %v3152_v22 = vpop.permute.xlu2 %3151 }
 0x417   : > { %v3530_v10 = vsel %vm1758_vm14, %v3498_v30, %v3255_v19  ;;  %v3098_v9 = vpop.permute.xlu0 %3097 }
 0x418   : > { %v3562_v50 = vsel %vm1791_vm15, %v3530_v10, %v6509_v58  ;;  %v3388_v31 = vsel %vm1593_vm10, %v6220_v26, %v3098_v9 }
 0x419   : > { %4098 = vmatmul.msk.bf16.gmra.mxu1 %vm1860_vm1, %v3562_v50 }
 0x41c   : > { %3278 = vrot.lane.b32.xlu2 %v3247_v41, %s4171_s13  ;;  %3243 = vrot.lane.b32.xlu1 %v3212_v27, %s4169_s11 }
 0x41d   : > { %3313 = vrot.lane.b32.xlu0 %v3282_v60, %s4172_s14 }
 0x41e   : > { %v3133_v8 = vpop.permute.xlu1 %3132  ;;  %v3257_v16 = vpop.permute.xlu2 %3256 }
 0x41f   : > { %v3203_v4 = vpop.permute.xlu0 %3202  ;;  %v3420_v53 = vsel %vm1626_vm9, %v3388_v31, %v3133_v8 }
 0x420   : > { %v3452_v58 = vsel %vm1659_vm12, %v3420_v53, %v3168_v5 }
 0x421   : > { %v3484_v32 = vsel %vm1692_vm11, %v3452_v58, %v3203_v4  ;;  %v3837_v4 = vld [vmem:[%s4459_s30 + $0x90] sm:$0xff] }
 0x424   : > { %3157 = vrot.lane.b32.xlu2 %v6178_v43, %s4168_s10  ;;  %3122 = vrot.lane.b32.xlu1 %v7030_v28, %s4167_s9  ;;  %v6594_v28 = vld [vmem:[%s6839_s5] ss:$0 sm:$0xff] }
 0x425   : > { %3192 = vrot.lane.b32.xlu0 %v6166_v20, %s4170_s12 }
 0x426   : > { %v3238_v59 = vpop.permute.xlu1 %3237  ;;  %v3135_v26 = vpop.permute.xlu2 %3134 }
 0x427   : > { %v3516_v55 = vsel %vm1725_vm13, %v3484_v32, %v3238_v59  ;;  %v3308_v33 = vpop.permute.xlu0 %3307 }
 0x428   : > { %v3548_v1 = vsel %vm1758_vm14, %v3516_v55, %v3273_v47 }
 0x429   : > { %v3580_v5 = vsel %vm1791_vm15, %v3548_v1, %v3308_v33 }
 0x42a   : > { %4107 = vmatmul.msk.bf16.gmra.mxu3 %vm1860_vm1, %v3580_v5 }
 0x42c   : > { %3262 = vrot.lane.b32.xlu2 %v5803_v57, %s4171_s13  ;;  %3227 = vrot.lane.b32.xlu1 %v5779_v35, %s4169_s11  ;;  %v6601_v35 = vld [vmem:[%s6840_s6] ss:$0 sm:$0xff] }
 0x42d   : > { %3297 = vrot.lane.b32.xlu0 %v5801_v45, %s4172_s14  ;;  %s6616_s14 = scalar_lea.vmem %s6841_s7, %s4113_s27 }
 0x42e   : > { %v3117_v20 = vpop.permute.xlu1 %3116  ;;  %v3240_v18 = vpop.permute.xlu2 %3239 }
 0x42f   : > { %v3187_v43 = vpop.permute.xlu0 %3186  ;;  %v3404_v61 = vsel %vm1626_vm9, %v6255_v17, %v3117_v20 }
 0x430   : > { %v3436_v45 = vsel %vm1659_vm12, %v3404_v61, %v3152_v22 }
 0x431   : > { %v3468_v48 = vsel %vm1692_vm11, %v3436_v45, %v3187_v43  ;;  %v3838_v43 = vld [vmem:[%s4459_s30 + $0x98] sm:$0xff] }
 0x432   : > { %v3707_v57 = vpop.f32.mrf.mxu3 }
 0x433   : > { %v3767_v6 = vmul.f32 %v6594_v28, %v3707_v57 }
 0x435   : > { %v3803_v46 = vadd.f32 %v6601_v35, %v3767_v6  ;;  %v3667_v7 = vpop.f32.mrf.mxu1 }
 0x436   : > { %v3751_v17 = vmul.f32 %v6594_v28, %v3667_v7  ;;  %v3222_v2 = vpop.permute.xlu1 %3221  ;;  %v3119_v49 = vpop.permute.xlu2 %3118 }
 0x437   : > { %v3867_v44 = vadd.f32 %v3835_v25, %v3803_v46  ;;  %v3500_v36 = vsel %vm1725_vm13, %v3468_v48, %v3222_v2  ;;  %v3292_v3 = vpop.permute.xlu0 %3291  ;;  %v3821_v46 = vld [vmem:[%s4459_s30 + $0x10] sm:$0xff] }
 0x438   : > { %v3787_v47 = vadd.f32 %v6601_v35, %v3751_v17  ;;  %v3532_v34 = vsel %vm1758_vm14, %v3500_v36, %v3257_v16 }
 0x439   : > { %v3899_v62 = vmax.f32 %v3867_v44, 0.0  ;;  %v3564_v42 = vsel %vm1791_vm15, %v3532_v34, %v3292_v3 }
 0x43a   : > { %v3851_v12 = vadd.f32 %v3819_v56, %v3787_v47  ;;  %4099 = vmatmul.msk.bf16.gmra.mxu1 %vm1860_vm1, %v3564_v42  ;;  %v3709_v38 = vpop.f32.mrf.mxu3 }
 0x43b   : > { %3931 = vst.msk [vmem:[%s6616_s14 + $0x80] sm:$0xff] %vm280_vm0, %v3899_v62  ;;  %v3768_v54 = vmul.f32 %v6594_v28, %v3709_v38 }
 0x43c   : > { %v3883_v11 = vmax.f32 %v3851_v12, 0.0  ;;  %v3822_v12 = vld [vmem:[%s4459_s30 + $0x18] sm:$0xff] }
 0x43d   : > { %v3804_v0 = vadd.f32 %v6601_v35, %v3768_v54  ;;  %v3669_v63 = vpop.f32.mrf.mxu1 }
 0x43e   : > { %3915 = vst.msk [vmem:[%s6616_s14] sm:$0xff] %vm280_vm0, %v3883_v11  ;;  %v3752_v15 = vmul.f32 %v6594_v28, %v3669_v63  ;;  %v3100_v39 = vpop.permute.xlu1 %3099  ;;  %v3224_v50 = vpop.permute.xlu2 %3223  ;;  %v3359_v63 = vsel %vm280_vm0, %v6087_v40, %v6314_v52 }
 0x43f   : > { %v3868_v23 = vadd.f32 %v3836_v29, %v3804_v0  ;;  %v3170_v51 = vpop.permute.xlu0 %3169  ;;  %v3390_v19 = vsel %vm1593_vm10, %v6286_v37, %v3100_v39 }
 0x440   : > { %v3788_v24 = vadd.f32 %v6601_v35, %v3752_v15  ;;  %v3422_v9 = vsel %vm1626_vm9, %v3390_v19, %v3135_v26 }
 0x441   : > { %v3900_v30 = vmax.f32 %v3868_v23, 0.0  ;;  %v3454_v27 = vsel %vm1659_vm12, %v3422_v9, %v3170_v51 }
 0x442   : > { %v3852_v22 = vadd.f32 %v3820_v13, %v3788_v24 }
 0x443   : > { %3932 = vst.msk [vmem:[%s6616_s14 + $0x88] sm:$0xff] %vm280_vm0, %v3900_v30 }
 0x444   : > { %v3884_v10 = vmax.f32 %v3852_v22, 0.0 }
 0x446   : > { %3916 = vst.msk [vmem:[%s6616_s14 + $0x8] sm:$0xff] %vm280_vm0, %v3884_v10  ;;  %v3205_v41 = vpop.permute.xlu1 %3204  ;;  %v3102_v59 = vpop.permute.xlu2 %3101  ;;  %v3839_v10 = vld [vmem:[%s4459_s30 + $0xa0] sm:$0xff] }
 0x447   : > { %v3275_v60 = vpop.permute.xlu0 %3274  ;;  %v3486_v8 = vsel %vm1692_vm11, %v3454_v27, %v3205_v41  ;;  %v3392_v15 = vsel %vm1593_vm10, %v3359_v63, %v3102_v59  ;;  %v3841_v63 = vld [vmem:[%s4459_s30 + $0xb0] sm:$0xff] }
 0x448   : > { %v3518_v16 = vsel %vm1725_vm13, %v3486_v8, %v3240_v18  ;;  %v3406_v18 = vsel %vm1626_vm9, %v6268_v21, %v3119_v49 }
 0x449   : > { %v3550_v53 = vsel %vm1758_vm14, %v3518_v16, %v3275_v60 }
 0x44b   : > { %v3712_v37 = vpop.f32.mrf.mxu3 }
 0x44c   : > { %v3769_v31 = vmul.f32 %v6594_v28, %v3712_v37 }
 0x44e   : > { %v3805_v58 = vadd.f32 %v6601_v35, %v3769_v31  ;;  %v3310_v32 = vpop.permute.xlu1 %3309  ;;  %v3207_v44 = vpop.permute.xlu2 %3206  ;;  %v3840_v31 = vld [vmem:[%s4459_s30 + $0xa8] sm:$0xff] }
 0x44f   : > { %v3154_v55 = vpop.permute.xlu0 %3153  ;;  %v3582_v26 = vsel %vm1791_vm15, %v3550_v53, %v3310_v32 }
 0x450   : > { %v3869_v33 = vadd.f32 %v3837_v4, %v3805_v58  ;;  %4108 = vmatmul.msk.bf16.gmra.mxu3 %vm1860_vm1, %v3582_v26  ;;  %v3438_v25 = vsel %vm1659_vm12, %v3406_v18, %v3154_v55  ;;  %v7031_v55 = vld [vmem:[#allocation18_spill] sm:$0xff] }
 0x452   : > { %v3901_v1 = vmax.f32 %v3869_v33, 0.0  ;;  %v3823_v33 = vld [vmem:[%s4459_s30 + $0x20] sm:$0xff] }
 0x453   : > { %v3714_v5 = vpop.f32.mrf.mxu3 }
 0x454   : > { %3933 = vst.msk [vmem:[%s6616_s14 + $0x90] sm:$0xff] %vm280_vm0, %v3901_v1  ;;  %v3770_v20 = vmul.f32 %v6594_v28, %v3714_v5 }
 0x455   : > { %v3672_v61 = vpop.f32.mrf.mxu1 }
 0x456   : > { %v3806_v57 = vadd.f32 %v6601_v35, %v3770_v20  ;;  %v3753_v45 = vmul.f32 %v6594_v28, %v3672_v61  ;;  %v3189_v6 = vpop.permute.xlu1 %3188  ;;  %v3312_v29 = vpop.permute.xlu2 %3311 }
 0x457   : > { %v3259_v7 = vpop.permute.xlu0 %3258  ;;  %v3470_v2 = vsel %vm1692_vm11, %v3438_v25, %v3189_v6 }
 0x458   : > { %v3870_v48 = vadd.f32 %v3838_v43, %v3806_v57  ;;  %v3789_v17 = vadd.f32 %v6601_v35, %v3753_v45  ;;  %v3502_v21 = vsel %vm1725_vm13, %v3470_v2, %v3224_v50 }
 0x459   : > { %v3534_v34 = vsel %vm1758_vm14, %v3502_v21, %v3259_v7 }
 0x45a   : > { %v3902_v56 = vmax.f32 %v3870_v48, 0.0  ;;  %v3853_v36 = vadd.f32 %v3821_v46, %v3789_v17  ;;  %v3824_v48 = vld [vmem:[%s4459_s30 + $0x28] sm:$0xff] }
 0x45c   : > { %3934 = vst.msk [vmem:[%s6616_s14 + $0x98] sm:$0xff] %vm280_vm0, %v3902_v56  ;;  %v3885_v3 = vmax.f32 %v3853_v36, 0.0 }
 0x45d   : > { %v3674_v47 = vpop.f32.mrf.mxu1 }
 0x45e   : > { %3917 = vst.msk [vmem:[%s6616_s14 + $0x10] sm:$0xff] %vm280_vm0, %v3885_v3  ;;  %v3754_v62 = vmul.f32 %v6594_v28, %v3674_v47  ;;  %v3294_v42 = vpop.permute.xlu1 %3293  ;;  %v3191_v22 = vpop.permute.xlu2 %3190  ;;  %v7032_v47 = vld [vmem:[#allocation12_spill] sm:$0xff] }
 0x45f   : > { %v3137_v38 = vpop.permute.xlu0 %3136  ;;  %v3566_v49 = vsel %vm1791_vm15, %v3534_v34, %v3294_v42  ;;  %v3362_v34 = vsel %vm280_vm0, %v6133_v14, %v7032_v47 }
 0x460   : > { %v3790_v54 = vadd.f32 %v6601_v35, %v3754_v62  ;;  %4100 = vmatmul.msk.bf16.gmra.mxu1 %vm1860_vm1, %v3566_v49  ;;  %v3424_v23 = vsel %vm1626_vm9, %v3392_v15, %v3137_v38 }
 0x462   : > { %v3854_v11 = vadd.f32 %v3822_v12, %v3790_v54 }
 0x464   : > { %v3886_v0 = vmax.f32 %v3854_v11, 0.0 }
 0x466   : > { %3918 = vst.msk [vmem:[%s6616_s14 + $0x18] sm:$0xff] %vm280_vm0, %v3886_v0  ;;  %v3172_v39 = vpop.permute.xlu1 %3171  ;;  %v3296_v59 = vpop.permute.xlu2 %3295 }
 0x467   : > { %v3242_v13 = vpop.permute.xlu0 %3241  ;;  %v3456_v51 = vsel %vm1659_vm12, %v3424_v23, %v3172_v39 }
 0x468   : > { %v3488_v24 = vsel %vm1692_vm11, %v3456_v51, %v3207_v44 }
 0x469   : > { %v3520_v40 = vsel %vm1725_vm13, %v3488_v24, %v3242_v13 }
 0x46b   : > { %v3717_v30 = vpop.f32.mrf.mxu3 }
 0x46c   : > { %v3771_v19 = vmul.f32 %v6594_v28, %v3717_v30 }
 0x46e   : > { %v3807_v52 = vadd.f32 %v6601_v35, %v3771_v19  ;;  %v3277_v9 = vpop.permute.xlu1 %3276  ;;  %v3174_v36 = vpop.permute.xlu2 %3173 }
 0x46f   : > { %v3552_v50 = vsel %vm1758_vm14, %v3520_v40, %v3277_v9  ;;  %v3121_v41 = vpop.permute.xlu0 %3120  ;;  %v3842_v40 = vld [vmem:[%s4459_s30 + $0xb8] sm:$0xff] }
 0x470   : > { %v3871_v27 = vadd.f32 %v3839_v10, %v3807_v52  ;;  %v3584_v60 = vsel %vm1791_vm15, %v3552_v50, %v3312_v29  ;;  %v3408_v26 = vsel %vm1626_vm9, %v7031_v55, %v3121_v41 }
 0x471   : > { %4109 = vmatmul.msk.bf16.gmra.mxu3 %vm1860_vm1, %v3584_v60  ;;  %v7033_v60 = vld [vmem:[#allocation15_spill] sm:$0xff] }
 0x472   : > { %v3903_v8 = vmax.f32 %v3871_v27, 0.0 }
 0x473   : > { %v3719_v16 = vpop.f32.mrf.mxu3 }
 0x474   : > { %3935 = vst.msk [vmem:[%s6616_s14 + $0xa0] sm:$0xff] %vm280_vm0, %v3903_v8  ;;  %v3772_v37 = vmul.f32 %v6594_v28, %v3719_v16  ;;  %v3825_v16 = vld [vmem:[%s4459_s30 + $0x30] sm:$0xff] }
 0x475   : > { %v3677_v4 = vpop.f32.mrf.mxu1 }
 0x476   : > { %v3808_v53 = vadd.f32 %v6601_v35, %v3772_v37  ;;  %v3755_v58 = vmul.f32 %v6594_v28, %v3677_v4  ;;  %v3156_v32 = vpop.permute.xlu1 %3155  ;;  %v3279_v49 = vpop.permute.xlu2 %3278 }
 0x477   : > { %v3226_v1 = vpop.permute.xlu0 %3225  ;;  %v3440_v43 = vsel %vm1659_vm12, %v3408_v26, %v3156_v32 }
 0x478   : > { %v3872_v5 = vadd.f32 %v3840_v31, %v3808_v53  ;;  %v3791_v20 = vadd.f32 %v6601_v35, %v3755_v58  ;;  %v3472_v57 = vsel %vm1692_vm11, %v3440_v43, %v3191_v22 }
 0x479   : > { %v3504_v25 = vsel %vm1725_vm13, %v3472_v57, %v3226_v1 }
 0x47a   : > { %v3904_v61 = vmax.f32 %v3872_v5, 0.0  ;;  %v3855_v18 = vadd.f32 %v3823_v33, %v3791_v20  ;;  %v3826_v20 = vld [vmem:[%s4459_s30 + $0x38] sm:$0xff] }
 0x47c   : > { %3936 = vst.msk [vmem:[%s6616_s14 + $0xa8] sm:$0xff] %vm280_vm0, %v3904_v61  ;;  %v3887_v45 = vmax.f32 %v3855_v18, 0.0 }
 0x47d   : > { %v3679_v6 = vpop.f32.mrf.mxu1 }
 0x47e   : > { %3919 = vst.msk [vmem:[%s6616_s14 + $0x20] sm:$0xff] %vm280_vm0, %v3887_v45  ;;  %v3756_v46 = vmul.f32 %v6594_v28, %v3679_v6  ;;  %v3261_v7 = vpop.permute.xlu1 %3260  ;;  %v3158_v22 = vpop.permute.xlu2 %3157 }
 0x47f   : > { %v3536_v17 = vsel %vm1758_vm14, %v3504_v25, %v3261_v7  ;;  %v3104_v2 = vpop.permute.xlu0 %3103  ;;  %v3843_v7 = vld [vmem:[%s4459_s30 + $0xc0] sm:$0xff] }
 0x480   : > { %v3792_v44 = vadd.f32 %v6601_v35, %v3756_v46  ;;  %v3568_v56 = vsel %vm1791_vm15, %v3536_v17, %v3296_v59  ;;  %v3394_v42 = vsel %vm1593_vm10, %v3362_v34, %v3104_v2  ;;  %v3827_v34 = vld [vmem:[%s4459_s30 + $0x40] sm:$0xff] }
 0x481   : > { %4101 = vmatmul.msk.bf16.gmra.mxu1 %vm1860_vm1, %v3568_v56 }
 0x482   : > { %v3856_v21 = vadd.f32 %v3824_v48, %v3792_v44 }
 0x484   : > { %v3888_v3 = vmax.f32 %v3856_v21, 0.0 }
 0x486   : > { %3920 = vst.msk [vmem:[%s6616_s14 + $0x28] sm:$0xff] %vm280_vm0, %v3888_v3  ;;  %v3139_v62 = vpop.permute.xlu1 %3138  ;;  %v3263_v33 = vpop.permute.xlu2 %3262 }
 0x487   : > { %v3209_v12 = vpop.permute.xlu0 %3208  ;;  %v3426_v38 = vsel %vm1626_vm9, %v3394_v42, %v3139_v62 }
 0x488   : > { %v3458_v54 = vsel %vm1659_vm12, %v3426_v38, %v3174_v36  ;;  %v3844_v36 = vld [vmem:[%s4459_s30 + $0xc8] sm:$0xff] }
 0x489   : > { %v3490_v0 = vsel %vm1692_vm11, %v3458_v54, %v3209_v12 }
 0x48c   : > { %v3722_v11 = vpop.f32.mrf.mxu3 }
 0x48d   : > { %v3773_v29 = vmul.f32 %v6594_v28, %v3722_v11 }
 0x48e   : > { %v3244_v14 = vpop.permute.xlu1 %3243 }
 0x48f   : > { %v3809_v15 = vadd.f32 %v6601_v35, %v3773_v29  ;;  %v3522_v39 = vsel %vm1725_vm13, %v3490_v0, %v3244_v14  ;;  %v3314_v23 = vpop.permute.xlu0 %3313  ;;  %v3828_v29 = vld [vmem:[%s4459_s30 + $0x48] sm:$0xff] }
 0x490   : > { %v3554_v13 = vsel %vm1758_vm14, %v3522_v39, %v3279_v49 }
 0x491   : > { %v3873_v51 = vadd.f32 %v3841_v63, %v3809_v15  ;;  %v3586_v24 = vsel %vm1791_vm15, %v3554_v13, %v3314_v23  ;;  %v3845_v23 = vld [vmem:[%s4459_s30 + $0xd0] sm:$0xff] }
 0x492   : > { %4110 = vmatmul.msk.bf16.gmra.mxu3 %vm1860_vm1, %v3586_v24 }
 0x493   : > { %v3905_v30 = vmax.f32 %v3873_v51, 0.0 }
 0x494   : > { %v3724_v19 = vpop.f32.mrf.mxu3 }
 0x495   : > { %3937 = vst.msk [vmem:[%s6616_s14 + $0xb0] sm:$0xff] %vm280_vm0, %v3905_v30  ;;  %v3774_v10 = vmul.f32 %v6594_v28, %v3724_v19 }
 0x496   : > { %v3123_v52 = vpop.permute.xlu1 %3122  ;;  %v3682_v9 = vpop.f32.mrf.mxu1 }
 0x497   : > { %v3810_v50 = vadd.f32 %v6601_v35, %v3774_v10  ;;  %v3757_v41 = vmul.f32 %v6594_v28, %v3682_v9  ;;  %v3193_v27 = vpop.permute.xlu0 %3192  ;;  %v3410_v8 = vsel %vm1626_vm9, %v7033_v60, %v3123_v52  ;;  %v3829_v9 = vld [vmem:[%s4459_s30 + $0x50] sm:$0xff] }
 0x498   : > { %v3442_v58 = vsel %vm1659_vm12, %v3410_v8, %v3158_v22  ;;  %v3846_v22 = vld [vmem:[%s4459_s30 + $0xd8] sm:$0xff] }
 0x499   : > { %v3874_v37 = vadd.f32 %v3842_v40, %v3810_v50  ;;  %v3793_v31 = vadd.f32 %v6601_v35, %v3757_v41  ;;  %v3474_v59 = vsel %vm1692_vm11, %v3442_v58, %v3193_v27 }
 0x49b   : > { %v3906_v4 = vmax.f32 %v3874_v37, 0.0  ;;  %v3857_v53 = vadd.f32 %v3825_v16, %v3793_v31  ;;  %v3830_v31 = vld [vmem:[%s4459_s30 + $0x58] sm:$0xff] }
 0x49d   : > { %3938 = vst.msk [vmem:[%s6616_s14 + $0xb8] sm:$0xff] %vm280_vm0, %v3906_v4  ;;  %v3889_v32 = vmax.f32 %v3857_v53, 0.0 }
 0x49e   : > { %v3228_v55 = vpop.permute.xlu1 %3227  ;;  %v3684_v26 = vpop.f32.mrf.mxu1 }
 0x49f   : > { %3921 = vst.msk [vmem:[%s6616_s14 + $0x30] sm:$0xff] %vm280_vm0, %v3889_v32  ;;  %v3506_v1 = vsel %vm1725_vm13, %v3474_v59, %v3228_v55  ;;  %v3758_v5 = vmul.f32 %v6594_v28, %v3684_v26  ;;  %v3298_v43 = vpop.permute.xlu0 %3297  ;;  %v3847_v55 = vld [vmem:[%s4459_s30 + $0xe0] sm:$0xff] }
 0x4a0   : > { %v3538_v61 = vsel %vm1758_vm14, %v3506_v1, %v3263_v33 }
 0x4a1   : > { %v3794_v18 = vadd.f32 %v6601_v35, %v3758_v5  ;;  %v3570_v57 = vsel %vm1791_vm15, %v3538_v61, %v3298_v43  ;;  %v3848_v43 = vld [vmem:[%s4459_s30 + $0xe8] sm:$0xff] }
 0x4a2   : > { %4102 = vmatmul.msk.bf16.gmra.mxu1 %vm1860_vm1, %v3570_v57 }
 0x4a3   : > { %v3858_v45 = vadd.f32 %v3826_v20, %v3794_v18 }
 0x4a5   : > { %v3890_v6 = vmax.f32 %v3858_v45, 0.0  ;;  %v3831_v45 = vld [vmem:[%s4459_s30 + $0x60] sm:$0xff] }
 0x4a7   : > { %3922 = vst.msk [vmem:[%s6616_s14 + $0x38] sm:$0xff] %vm280_vm0, %v3890_v6 }
 0x4ad   : > { %v3727_v25 = vpop.f32.mrf.mxu3 }
 0x4ae   : > { %v3775_v46 = vmul.f32 %v6594_v28, %v3727_v25 }
 0x4b0   : > { %v3811_v48 = vadd.f32 %v6601_v35, %v3775_v46 }
 0x4b2   : > { %v3875_v17 = vadd.f32 %v3843_v7, %v3811_v48 }
 0x4b4   : > { %v3907_v2 = vmax.f32 %v3875_v17, 0.0 }
 0x4b5   : > { %v3729_v44 = vpop.f32.mrf.mxu3 }
 0x4b6   : > { %3939 = vst.msk [vmem:[%s6616_s14 + $0xc0] sm:$0xff] %vm280_vm0, %v3907_v2  ;;  %v3776_v56 = vmul.f32 %v6594_v28, %v3729_v44  ;;  %v3832_v44 = vld [vmem:[%s4459_s30 + $0x68] sm:$0xff] }
 0x4b7   : > { %v3687_v21 = vpop.f32.mrf.mxu1 }
 0x4b8   : > { %v3812_v3 = vadd.f32 %v6601_v35, %v3776_v56  ;;  %v3759_v47 = vmul.f32 %v6594_v28, %v3687_v21 }
 0x4ba   : > { %v3876_v62 = vadd.f32 %v3844_v36, %v3812_v3  ;;  %v3795_v42 = vadd.f32 %v6601_v35, %v3759_v47 }
 0x4bc   : > { %v3908_v12 = vmax.f32 %v3876_v62, 0.0  ;;  %v3859_v38 = vadd.f32 %v3827_v34, %v3795_v42  ;;  %v3849_v34 = vld [vmem:[%s4459_s30 + $0xf0] sm:$0xff] }
 0x4be   : > { %3940 = vst.msk [vmem:[%s6616_s14 + $0xc8] sm:$0xff] %vm280_vm0, %v3908_v12  ;;  %v3891_v49 = vmax.f32 %v3859_v38, 0.0 }
 0x4bf   : > { %v3689_v54 = vpop.f32.mrf.mxu1 }
 0x4c0   : > { %3923 = vst.msk [vmem:[%s6616_s14 + $0x40] sm:$0xff] %vm280_vm0, %v3891_v49  ;;  %v3760_v11 = vmul.f32 %v6594_v28, %v3689_v54  ;;  %v3850_v54 = vld [vmem:[%s4459_s30 + $0xf8] sm:$0xff] }
 0x4c2   : > { %v3796_v0 = vadd.f32 %v6601_v35, %v3760_v11 }
 0x4c4   : > { %v3860_v63 = vadd.f32 %v3828_v29, %v3796_v0 }
 0x4c6   : > { %v3892_v14 = vmax.f32 %v3860_v63, 0.0  ;;  %v3833_v63 = vld [vmem:[%s4459_s30 + $0x70] sm:$0xff] }
 0x4c8   : > { %3924 = vst.msk [vmem:[%s6616_s14 + $0x48] sm:$0xff] %vm280_vm0, %v3892_v14 }
 0x4d3   : > { %v3732_v15 = vpop.f32.mrf.mxu3 }
 0x4d4   : > { %v3777_v39 = vmul.f32 %v6594_v28, %v3732_v15 }
 0x4d6   : > { %v3813_v13 = vadd.f32 %v6601_v35, %v3777_v39 }
 0x4d8   : > { %v3877_v51 = vadd.f32 %v3845_v23, %v3813_v13 }
 0x4da   : > { %v3909_v24 = vmax.f32 %v3877_v51, 0.0 }
 0x4db   : > { %v3734_v30 = vpop.f32.mrf.mxu3 }
 0x4dc   : > { %3941 = vst.msk [vmem:[%s6616_s14 + $0xd0] sm:$0xff] %vm280_vm0, %v3909_v24  ;;  %v3778_v19 = vmul.f32 %v6594_v28, %v3734_v30  ;;  %v3834_v30 = vld [vmem:[%s4459_s30 + $0x78] sm:$0xff] }
 0x4dd   : > { %v3692_v10 = vpop.f32.mrf.mxu1 }
 0x4de   : > { %v3814_v40 = vadd.f32 %v6601_v35, %v3778_v19  ;;  %v3761_v52 = vmul.f32 %v6594_v28, %v3692_v10 }
 0x4e0   : > { %v3878_v50 = vadd.f32 %v3846_v22, %v3814_v40  ;;  %v3797_v41 = vadd.f32 %v6601_v35, %v3761_v52 }
 0x4e2   : > { %v3910_v27 = vmax.f32 %v3878_v50, 0.0  ;;  %v3861_v60 = vadd.f32 %v3829_v9, %v3797_v41 }
 0x4e4   : > { %3942 = vst.msk [vmem:[%s6616_s14 + $0xd8] sm:$0xff] %vm280_vm0, %v3910_v27  ;;  %v3893_v8 = vmax.f32 %v3861_v60, 0.0 }
 0x4e5   : > { %v3694_v16 = vpop.f32.mrf.mxu1 }
 0x4e6   : > { %3925 = vst.msk [vmem:[%s6616_s14 + $0x50] sm:$0xff] %vm280_vm0, %v3893_v8  ;;  %v3762_v37 = vmul.f32 %v6594_v28, %v3694_v16 }
 0x4e8   : > { %v3798_v4 = vadd.f32 %v6601_v35, %v3762_v37 }
 0x4ea   : > { %v3862_v53 = vadd.f32 %v3830_v31, %v3798_v4 }
 0x4ec   : > { %v3894_v58 = vmax.f32 %v3862_v53, 0.0 }
 0x4ee   : > { %3926 = vst.msk [vmem:[%s6616_s14 + $0x58] sm:$0xff] %vm280_vm0, %v3894_v58 }
 0x4f4   : > { %v3737_v32 = vpop.f32.mrf.mxu3 }
 0x4f5   : > { %v3779_v59 = vmul.f32 %v6594_v28, %v3737_v32 }
 0x4f7   : > { %v3815_v26 = vadd.f32 %v6601_v35, %v3779_v59 }
 0x4f9   : > { %v3879_v33 = vadd.f32 %v3847_v55, %v3815_v26 }
 0x4fb   : > { %v3911_v1 = vmax.f32 %v3879_v33, 0.0 }
 0x4fc   : > { %v3739_v5 = vpop.f32.mrf.mxu3 }
 0x4fd   : > { %3943 = vst.msk [vmem:[%s6616_s14 + $0xe0] sm:$0xff] %vm280_vm0, %v3911_v1  ;;  %v3780_v20 = vmul.f32 %v6594_v28, %v3739_v5 }
 0x4fe   : > { %v3697_v61 = vpop.f32.mrf.mxu1 }
 0x4ff   : > { %v3816_v18 = vadd.f32 %v6601_v35, %v3780_v20  ;;  %v3763_v57 = vmul.f32 %v6594_v28, %v3697_v61 }
 0x501   : > { %v3880_v6 = vadd.f32 %v3848_v43, %v3816_v18  ;;  %v3799_v25 = vadd.f32 %v6601_v35, %v3763_v57 }
 0x503   : > { %v3912_v46 = vmax.f32 %v3880_v6, 0.0  ;;  %v3863_v7 = vadd.f32 %v3831_v45, %v3799_v25 }
 0x505   : > { %3944 = vst.msk [vmem:[%s6616_s14 + $0xe8] sm:$0xff] %vm280_vm0, %v3912_v46  ;;  %v3895_v48 = vmax.f32 %v3863_v7, 0.0 }
 0x506   : > { %v3699_v17 = vpop.f32.mrf.mxu1 }
 0x507   : > { %3927 = vst.msk [vmem:[%s6616_s14 + $0x60] sm:$0xff] %vm280_vm0, %v3895_v48  ;;  %v3764_v2 = vmul.f32 %v6594_v28, %v3699_v17 }
 0x509   : > { %v3800_v56 = vadd.f32 %v6601_v35, %v3764_v2 }
 0x50b   : > { %v3864_v36 = vadd.f32 %v3832_v44, %v3800_v56 }
 0x50d   : > { %v3896_v21 = vmax.f32 %v3864_v36, 0.0 }
 0x50f   : > { %3928 = vst.msk [vmem:[%s6616_s14 + $0x68] sm:$0xff] %vm280_vm0, %v3896_v21 }
 0x515   : > { %v3742_v3 = vpop.f32.mrf.mxu3 }
 0x516   : > { %v3781_v47 = vmul.f32 %v6594_v28, %v3742_v3 }
 0x518   : > { %v3817_v62 = vadd.f32 %v6601_v35, %v3781_v47 }
 0x51a   : > { %v3881_v42 = vadd.f32 %v3849_v34, %v3817_v62 }
 0x51c   : > { %v3913_v12 = vmax.f32 %v3881_v42, 0.0 }
 0x51d   : > { %v3744_v38 = vpop.f32.mrf.mxu3 }
 0x51e   : > { %3945 = vst.msk [vmem:[%s6616_s14 + $0xf0] sm:$0xff] %vm280_vm0, %v3913_v12  ;;  %v3782_v49 = vmul.f32 %v6594_v28, %v3744_v38 }
 0x51f   : > { %v3702_v11 = vpop.f32.mrf.mxu1 }
 0x520   : > { %v3818_v29 = vadd.f32 %v6601_v35, %v3782_v49  ;;  %v3765_v0 = vmul.f32 %v6594_v28, %v3702_v11 }
 0x522   : > { %v3882_v14 = vadd.f32 %v3850_v54, %v3818_v29  ;;  %v3801_v15 = vadd.f32 %v6601_v35, %v3765_v0 }
 0x524   : > { %v3914_v39 = vmax.f32 %v3882_v14, 0.0  ;;  %v3865_v23 = vadd.f32 %v3833_v63, %v3801_v15 }
 0x526   : > { %3946 = vst.msk [vmem:[%s6616_s14 + $0xf8] sm:$0xff] %vm280_vm0, %v3914_v39  ;;  %v3897_v13 = vmax.f32 %v3865_v23, 0.0 }
 0x527   : > { %v3704_v51 = vpop.f32.mrf.mxu1 }
 0x528   : > { %3929 = vst.msk [vmem:[%s6616_s14 + $0x70] sm:$0xff] %vm280_vm0, %v3897_v13  ;;  %v3766_v24 = vmul.f32 %v6594_v28, %v3704_v51 }
 0x52a   : > { %v3802_v19 = vadd.f32 %v6601_v35, %v3766_v24 }
 0x52c   : > { %v3866_v22 = vadd.f32 %v3834_v30, %v3802_v19 }
 0x52e   : > { %v3898_v10 = vmax.f32 %v3866_v22, 0.0 }
 0x530   : > { %3930 = vst.msk [vmem:[%s6616_s14 + $0x78] sm:$0xff] %vm280_vm0, %v3898_v10 }
 0x531 PF: > { %s17_s24 = sadd.s32 1, %s4162_s24  }
 0x532   : > { %p14_p4 = scmp.ge.s32.totalorder %s17_s24, 4  }
 0x534   :  { %16 = sbr.rel (!%p14_p4) target bundleno = 1 (0x1), region = 80 }

</bundles_post_ra>
